<compile_context>
chip_gen: v7x
topology: tpu7x:2x2x1
jax: 0.10.0
libtpu: 0.0.40
codegen_flags: <defaults>
</compile_context>

<pallas_src>
import functools

import jax
import jax.numpy as jnp
from jax import lax
from jax.experimental import pallas as pl
from jax.experimental.pallas import tpu as pltpu


# ----------------------------- fused Pallas kernel ---------------------------

def _fused_kernel(x1_ref, x2_ref, upw_ref, upb_ref, s_ref, wc_ref, sc_ref,
                  sh_ref, mask_ref, o_ref, feat,
                  *, C2, Cup, Cin, C, NP, Wp, MG):
    """Whole Residual_upsampling forward (all batch elements) in one step.

    Layout: (channels, N*Hp*Wp) -- channels on sublanes, flat zero-padded
    spatial grid (batch folded) on lanes.

    x1_ref  : (C1, N*Hi*Wi) f32   deep feature, CHW-flat
    x2_ref  : (C2, N*P)     f32   skip feature, 1-px zero halo added by wrapper
    upw_ref : (4, Cup, C1)  f32   ConvTranspose2d weight, one (Cup,C1) per (a,b)
    upb_ref : (Cup, 1)      f32   ConvTranspose2d bias
    s_ref   : (4, N*Hi*Wi, N*P) bf16  0/1 scatter mats: sub-pixel placement + F.pad
    wc_ref  : (36, C, Cin)  bf16  4 convs x 9 taps, (Cout, Cin) each
    sc_ref / sh_ref : (4, C, 1) f32  folded BatchNorm scale / shift
    mask_ref: (1, N*P)      f32   1 on interior pixels, 0 on the 1-px halo
    o_ref   : (Cout, N*P)   f32   lane-dense output (padded layout; wrapper slices)
    feat    : (Cin, 2*MG+N*P) f32 scratch; the feature lives at lanes [MG, MG+NP)
    """
    f32, bf16 = jnp.float32, jnp.bfloat16

    # Interior mask, hoisted once.  Conv halos are kept at zero via a select,
    # never via full-buffer zero fills.
    mask = jnp.broadcast_to(mask_ref[...] > 0.5, (C, NP))

    # Only the two MG-lane scratch margins ever hold undefined data; zero once.
    feat[:, :MG] = jnp.zeros((Cin, MG), f32)
    feat[:, MG + NP:] = jnp.zeros((Cin, MG), f32)

    # --- ConvTranspose2d(C1 -> Cup, k=2, s=2) + bias + F.pad via 4 scatter
    #     matmuls (no strided lane writes, no relayouts).
    x1 = x1_ref[...]                                          # (C1, N*Hi*Wi)
    up = jnp.zeros((Cup, NP), f32)
    for ab in range(4):
        u = jnp.dot(upw_ref[ab], x1, preferred_element_type=f32) + upb_ref[...]
        up = up + jnp.dot(u.astype(bf16), s_ref[ab], preferred_element_type=f32)

    # --- x = cat([x2, up], channel): channels are sublanes -> sublane concat.
    xcat = jnp.concatenate([x2_ref[...], up], axis=0)         # (Cin, N*P) f32

    def conv_bn_relu(idx):
        # 3x3 conv (padding=1, no bias): 9 accumulated MXU matmuls whose RHS are
        # static lane-offset slices of the scratch (dy/dx shift == lane offset).
        acc = jnp.zeros((C, NP), f32)
        for dy in range(3):
            for dx in range(3):
                k = (dy - 1) * Wp + (dx - 1)
                xt = feat[:, MG + k: MG + k + NP].astype(bf16)    # (Cin, N*P)
                acc = acc + jnp.dot(wc_ref[idx * 9 + dy * 3 + dx], xt,
                                    preferred_element_type=f32)
        y = acc * sc_ref[idx] + sh_ref[idx]          # folded BatchNorm (eval), f32
        y = jnp.maximum(y, 0.0)                      # ReLU
        return jnp.where(mask, y, 0.0)               # keep conv halo exactly zero

    # Residual_DoubleConv (Dropout2d == identity in eval mode).
    feat[:, MG: MG + NP] = xcat
    h1 = conv_bn_relu(0)
    feat[:, MG: MG + NP] = h1
    h2 = conv_bn_relu(1) + xcat                      # + skip_1
    feat[:, MG: MG + NP] = h2
    h3 = conv_bn_relu(2)
    feat[:, MG: MG + NP] = h3
    h4 = conv_bn_relu(3) + h2                        # + skip_2

    o_ref[...] = h4                                  # single dense lane store


# ------------------------------ wrapper --------------------------------------

def fold_bn(gamma, beta, mean, var, eps=1e-5):
    scale = gamma / jnp.sqrt(var + eps)
    shift = beta - mean * scale
    return scale, shift


def residual_upsampling_forward(x1_nchw, x2_nchw, p):
    """Matches Residual_upsampling(in_ch, out_ch, bilinear=False).forward(x1, x2)."""
    N, C1, Hi, Wi = x1_nchw.shape
    _, C2, H, W = x2_nchw.shape
    Cup = p["up_w"].shape[1]
    Cin = C2 + Cup
    C = p["w1"].shape[-1]                  # mid == out channels
    Cout = p["w4"].shape[-1]
    assert Cin == C == Cout, "residual skip-adds require in_ch == out_ch"

    Hp, Wp = H + 2, W + 2                  # 1-pixel conv halo around the image
    P = Hp * Wp
    NP = N * P
    NHW1 = N * Hi * Wi
    MG = Wp + 1                            # scratch margin >= max |tap lane offset|

    diffY, diffX = H - 2 * Hi, W - 2 * Wi
    py0, px0 = diffY // 2, diffX // 2

    # ---- boundary layout (wrapper-side XLA, O(input/output) bytes) ----------
    x1k = jnp.transpose(x1_nchw.reshape(N, C1, Hi * Wi), (1, 0, 2)).reshape(C1, NHW1)
    x2p = jnp.pad(x2_nchw, ((0, 0), (0, 0), (1, 1), (1, 1)))
    x2k = jnp.transpose(x2p.reshape(N, C2, P), (1, 0, 2)).reshape(C2, NP)

    # ---- parameter packing (tiny, O(params)) ---------------------------------
    # up_w: (ci, co, a, b) -> (a*2+b, co, ci)
    upw = jnp.transpose(p["up_w"], (2, 3, 1, 0)).reshape(4, Cup, C1).astype(jnp.float32)
    upb = p["up_b"].reshape(Cup, 1).astype(jnp.float32)

    # 0/1 scatter matrices: sub-pixel (a,b) placement + F.pad offset, block-
    # diagonal over the lane-folded batch.
    n_i = jnp.arange(N)[:, None, None]
    y_i = jnp.arange(Hi)[None, :, None]
    x_i = jnp.arange(Wi)[None, None, :]
    cols = jnp.arange(NP)[None, :]
    smats = []
    for a in range(2):
        for b in range(2):
            dest = (n_i * P + (1 + py0 + 2 * y_i + a) * Wp
                    + (1 + px0 + 2 * x_i + b)).reshape(NHW1, 1)
            smats.append((dest == cols).astype(jnp.bfloat16))
    smat = jnp.stack(smats, axis=0)                               # (4, NHW1, NP)

    # conv weights -> (36, Cout, Cin) bf16, tap index = dy*3 + dx
    wconv = jnp.concatenate(
        [jnp.transpose(p[f"w{i}"], (0, 1, 3, 2)).reshape(9, C, Cin)
         for i in (1, 2, 3, 4)], axis=0).astype(jnp.bfloat16)

    scales, shifts = [], []
    for bn in (p["bn1"], p["bn2"], p["bn3"], p["bn4"]):
        s_, t_ = fold_bn(*bn)
        scales.append(s_)
        shifts.append(t_)
    scale = jnp.stack(scales, 0).reshape(4, C, 1).astype(jnp.float32)
    shift = jnp.stack(shifts, 0).reshape(4, C, 1).astype(jnp.float32)

    # interior (non-halo) mask in the flat padded layout
    pos = jnp.arange(P)
    row, col = pos // Wp, pos % Wp
    m = ((row >= 1) & (row <= H) & (col >= 1) & (col <= W)).astype(jnp.float32)
    mask = jnp.tile(m, (N,)).reshape(1, NP)

    kernel = functools.partial(_fused_kernel, C2=C2, Cup=Cup, Cin=Cin, C=C,
                               NP=NP, Wp=Wp, MG=MG)

    out = pl.pallas_call(
        kernel,
        out_shape=jax.ShapeDtypeStruct((Cout, NP), jnp.float32),
        grid=(1,),
        in_specs=[
            pl.BlockSpec((C1, NHW1), lambda i: (0, 0)),
            pl.BlockSpec((C2, NP), lambda i: (0, 0)),
            pl.BlockSpec((4, Cup, C1), lambda i: (0, 0, 0)),
            pl.BlockSpec((Cup, 1), lambda i: (0, 0)),
            pl.BlockSpec((4, NHW1, NP), lambda i: (0, 0, 0)),
            pl.BlockSpec((36, C, Cin), lambda i: (0, 0, 0)),
            pl.BlockSpec((4, C, 1), lambda i: (0, 0, 0)),
            pl.BlockSpec((4, C, 1), lambda i: (0, 0, 0)),
            pl.BlockSpec((1, NP), lambda i: (0, 0)),
        ],
        out_specs=pl.BlockSpec((Cout, NP), lambda i: (0, 0)),
        scratch_shapes=[pltpu.VMEM((Cin, 2 * MG + NP), jnp.float32)],
        compiler_params=pltpu.CompilerParams(
            dimension_semantics=("arbitrary",),
            vmem_limit_bytes=32 * 1024 * 1024,
        ),
    )(x1k, x2k, upw, upb, smat, wconv, scale, shift, mask)

    # (Cout, N*P) -> drop the 1-pixel halo -> NCHW.  O(output) wrapper ops only.
    out = out.reshape(Cout, N, Hp, Wp)[:, :, 1:H + 1, 1:W + 1]
    return jnp.transpose(out, (1, 0, 2, 3))


# ------------------------- pure-JAX f32 reference ----------------------------

def _ref_forward(x1_nchw, x2_nchw, p):
    x1 = jnp.transpose(x1_nchw, (0, 2, 3, 1))
    x2 = jnp.transpose(x2_nchw, (0, 2, 3, 1))

    up = jnp.einsum("nhwc,cdab->nhawbd", x1, p["up_w"],
                    precision=lax.Precision.HIGHEST)
    N, Hi, _, Wi, _, Co = up.shape
    up = up.reshape(N, 2 * Hi, 2 * Wi, Co) + p["up_b"]

    diffY = x2.shape[1] - up.shape[1]
    diffX = x2.shape[2] - up.shape[2]
    up = jnp.pad(up, ((0, 0),
                      (diffY // 2, diffY - diffY // 2),
                      (diffX // 2, diffX - diffX // 2),
                      (0, 0)))
    x = jnp.concatenate([x2, up], axis=-1)

    def cbr(h, w, bn):
        scale, shift = fold_bn(*bn)
        y = lax.conv_general_dilated(h, w, (1, 1), "SAME",
                                     dimension_numbers=("NHWC", "HWIO", "NHWC"),
                                     precision=lax.Precision.HIGHEST)
        return jnp.maximum(y * scale + shift, 0.0)

    skip1 = x
    h = cbr(x, p["w1"], p["bn1"])
    h = cbr(h, p["w2"], p["bn2"]) + skip1
    skip2 = h
    h = cbr(h, p["w3"], p["bn3"])
    h = cbr(h, p["w4"], p["bn4"]) + skip2
    return jnp.transpose(h, (0, 3, 1, 2))


# --------------------------- parameter init ----------------------------------

def init_params(key, in_ch, out_ch):
    mid = out_ch                 # Residual_DoubleConv(in_ch, out_ch): mid = out_ch
    ks = jax.random.split(key, 10)

    def conv_w(k, ci, co):
        bound = 1.0 / ((ci * 9) ** 0.5)
        return jax.random.uniform(k, (3, 3, ci, co), jnp.float32, -bound, bound)

    def bn(k, c):
        k1, k2, k3, k4 = jax.random.split(k, 4)
        gamma = jax.random.uniform(k1, (c,), jnp.float32, 0.5, 1.5)
        beta = 0.1 * jax.random.normal(k2, (c,), jnp.float32)
        mean = 0.1 * jax.random.normal(k3, (c,), jnp.float32)
        var = jax.random.uniform(k4, (c,), jnp.float32, 0.5, 1.5)
        return (gamma, beta, mean, var)

    up_bound = 1.0 / ((in_ch * 4) ** 0.5)
    return dict(
        up_w=jax.random.uniform(ks[0], (in_ch, in_ch // 2, 2, 2), jnp.float32,
                                -up_bound, up_bound),
        up_b=jax.random.uniform(ks[1], (in_ch // 2,), jnp.float32,
                                -up_bound, up_bound),
        w1=conv_w(ks[2], in_ch, mid), bn1=bn(ks[3], mid),
        w2=conv_w(ks[4], mid, mid),   bn2=bn(ks[5], mid),
        w3=conv_w(ks[6], mid, mid),   bn3=bn(ks[7], mid),
        w4=conv_w(ks[8], mid, out_ch), bn4=bn(ks[9], out_ch),
    )


# --------------------------------- main ---------------------------------------

if __name__ == "__main__":
    key = jax.random.PRNGKey(0)
    # residual skip-adds require in_ch == out_ch (same constraint as in PyTorch)
    in_ch, out_ch = 8, 8
    N, Hi, Wi = 2, 8, 8

    k0, k1, k2 = jax.random.split(key, 3)
    x1 = jax.random.normal(k0, (N, in_ch, Hi, Wi), jnp.float32)               # deep (NCHW)
    x2 = jax.random.normal(k1, (N, in_ch // 2, 2 * Hi, 2 * Wi), jnp.float32)  # skip (NCHW)
    params = init_params(k2, in_ch, out_ch)

    fwd = jax.jit(residual_upsampling_forward)
    out = jax.block_until_ready(fwd(x1, x2, params))
    ref = jax.block_until_ready(_ref_forward(x1, x2, params))

    assert out.shape == (N, out_ch, 2 * Hi, 2 * Wi), out.shape
    if not jnp.allclose(out, ref, rtol=2e-2, atol=2e-2):
        raise AssertionError(
            f"mismatch vs reference, max abs diff = {float(jnp.max(jnp.abs(out - ref)))}")
    print("KERNEL_OK")
</pallas_src>

<mosaic_0001>
module attributes {stable_mosaic.version = 11 : i64} {
  func.func @_fused_kernel(%arg0: i32, %arg1: memref<8x128xf32, #tpu.memory_space<vmem>>, %arg2: memref<4x648xf32, #tpu.memory_space<vmem>>, %arg3: memref<4x4x8xf32, #tpu.memory_space<vmem>>, %arg4: memref<4x1xf32, #tpu.memory_space<vmem>>, %arg5: memref<4x128x648xbf16, #tpu.memory_space<vmem>>, %arg6: memref<36x8x8xbf16, #tpu.memory_space<vmem>>, %arg7: memref<4x8x1xf32, #tpu.memory_space<vmem>>, %arg8: memref<4x8x1xf32, #tpu.memory_space<vmem>>, %arg9: memref<1x648xf32, #tpu.memory_space<vmem>>, %arg10: memref<8x648xf32, #tpu.memory_space<vmem>>, %arg11: memref<8x686xf32, #tpu.memory_space<vmem>>) attributes {dimension_semantics = [#tpu.dimension_semantics<arbitrary>], iteration_bounds = array<i64: 1>, scalar_prefetch = 0 : i64, scratch_operands = 1 : i64, tpu.core_type = #tpu.core_type<tc>, window_params = [{pipeline_mode = #tpu.pipeline_mode<synchronous>, transform_indices = @transform_0, window_bounds = array<i64: 8, 128>}, {pipeline_mode = #tpu.pipeline_mode<synchronous>, transform_indices = @transform_1, window_bounds = array<i64: 4, 648>}, {pipeline_mode = #tpu.pipeline_mode<synchronous>, transform_indices = @transform_2, window_bounds = array<i64: 4, 4, 8>}, {pipeline_mode = #tpu.pipeline_mode<synchronous>, transform_indices = @transform_3, window_bounds = array<i64: 4, 1>}, {pipeline_mode = #tpu.pipeline_mode<synchronous>, transform_indices = @transform_4, window_bounds = array<i64: 4, 128, 648>}, {pipeline_mode = #tpu.pipeline_mode<synchronous>, transform_indices = @transform_5, window_bounds = array<i64: 36, 8, 8>}, {pipeline_mode = #tpu.pipeline_mode<synchronous>, transform_indices = @transform_6, window_bounds = array<i64: 4, 8, 1>}, {pipeline_mode = #tpu.pipeline_mode<synchronous>, transform_indices = @transform_7, window_bounds = array<i64: 4, 8, 1>}, {pipeline_mode = #tpu.pipeline_mode<synchronous>, transform_indices = @transform_8, window_bounds = array<i64: 1, 648>}, {pipeline_mode = #tpu.pipeline_mode<synchronous>, transform_indices = @transform_9, window_bounds = array<i64: 8, 648>}]} {
    %c0 = arith.constant 0 : index
    %c0_0 = arith.constant 0 : index
    %0 = vector.load %arg9[%c0, %c0_0] : memref<1x648xf32, #tpu.memory_space<vmem>>, vector<1x648xf32>
    %cst = arith.constant 5.000000e-01 : f32
    %1 = vector.broadcast %cst : f32 to vector<1x648xf32>
    %2 = arith.cmpf ogt, %0, %1 : vector<1x648xf32>
    %3 = vector.shape_cast %2 : vector<1x648xi1> to vector<1x648xi1>
    %4 = vector.broadcast %3 : vector<1x648xi1> to vector<8x648xi1>
    %cst_1 = arith.constant 0.000000e+00 : f32
    %5 = vector.broadcast %cst_1 : f32 to vector<8x19xf32>
    %c0_2 = arith.constant 0 : index
    %c0_3 = arith.constant 0 : index
    %6 = vector.load %arg11[%c0_2, %c0_3] : memref<8x686xf32, #tpu.memory_space<vmem>>, vector<8x19xf32>
    tpu.vector_store %arg11[%c0_2, %c0_3], %5 {strides = array<i32>} : memref<8x686xf32, #tpu.memory_space<vmem>>, vector<8x19xf32>,
    %cst_4 = arith.constant 0.000000e+00 : f32
    %7 = vector.broadcast %cst_4 : f32 to vector<8x19xf32>
    %c0_5 = arith.constant 0 : index
    %c667 = arith.constant 667 : index
    %8 = vector.load %arg11[%c0_5, %c667] : memref<8x686xf32, #tpu.memory_space<vmem>>, vector<8x19xf32>
    tpu.vector_store %arg11[%c0_5, %c667], %7 {strides = array<i32>} : memref<8x686xf32, #tpu.memory_space<vmem>>, vector<8x19xf32>,
    %c0_6 = arith.constant 0 : index
    %c0_7 = arith.constant 0 : index
    %9 = vector.load %arg1[%c0_6, %c0_7] : memref<8x128xf32, #tpu.memory_space<vmem>>, vector<8x128xf32>
    %cst_8 = arith.constant 0.000000e+00 : f32
    %10 = vector.broadcast %cst_8 : f32 to vector<4x648xf32>
    %c0_9 = arith.constant 0 : index
    %c0_10 = arith.constant 0 : index
    %c0_11 = arith.constant 0 : index
    %11 = vector.load %arg3[%c0_9, %c0_10, %c0_11] : memref<4x4x8xf32, #tpu.memory_space<vmem>>, vector<1x4x8xf32>
    %12 = vector.shape_cast %11 : vector<1x4x8xf32> to vector<4x8xf32>
    %cst_12 = arith.constant dense<0.000000e+00> : vector<4x128xf32>
    %13 = tpu.matmul %12, %9, %cst_12 {dimension_numbers = #tpu.dot_dimension_numbers<[1], [0], [0], [1], [0, 0, 1, 1], [], []>} : vector<4x8xf32>, vector<8x128xf32>, vector<4x128xf32> -> vector<4x128xf32>
    %c0_13 = arith.constant 0 : index
    %c0_14 = arith.constant 0 : index
    %14 = vector.load %arg4[%c0_13, %c0_14] : memref<4x1xf32, #tpu.memory_space<vmem>>, vector<4x1xf32>
    %15 = vector.broadcast %14 : vector<4x1xf32> to vector<4x128xf32>
    %16 = arith.addf %13, %15 : vector<4x128xf32>
    %17 = arith.truncf %16 : vector<4x128xf32> to vector<4x128xbf16>
    %c0_15 = arith.constant 0 : index
    %c0_16 = arith.constant 0 : index
    %c0_17 = arith.constant 0 : index
    %18 = vector.load %arg5[%c0_15, %c0_16, %c0_17] : memref<4x128x648xbf16, #tpu.memory_space<vmem>>, vector<1x128x648xbf16>
    %19 = vector.shape_cast %18 : vector<1x128x648xbf16> to vector<128x648xbf16>
    %cst_18 = arith.constant dense<0.000000e+00> : vector<4x648xf32>
    %20 = tpu.matmul %17, %19, %cst_18 {dimension_numbers = #tpu.dot_dimension_numbers<[1], [0], [0], [1], [0, 0, 1, 1], [], []>} : vector<4x128xbf16>, vector<128x648xbf16>, vector<4x648xf32> -> vector<4x648xf32>
    %21 = arith.addf %10, %20 : vector<4x648xf32>
    %c1 = arith.constant 1 : index
    %c0_19 = arith.constant 0 : index
    %c0_20 = arith.constant 0 : index
    %22 = vector.load %arg3[%c1, %c0_19, %c0_20] : memref<4x4x8xf32, #tpu.memory_space<vmem>>, vector<1x4x8xf32>
    %23 = vector.shape_cast %22 : vector<1x4x8xf32> to vector<4x8xf32>
    %cst_21 = arith.constant dense<0.000000e+00> : vector<4x128xf32>
    %24 = tpu.matmul %23, %9, %cst_21 {dimension_numbers = #tpu.dot_dimension_numbers<[1], [0], [0], [1], [0, 0, 1, 1], [], []>} : vector<4x8xf32>, vector<8x128xf32>, vector<4x128xf32> -> vector<4x128xf32>
    %c0_22 = arith.constant 0 : index
    %c0_23 = arith.constant 0 : index
    %25 = vector.load %arg4[%c0_22, %c0_23] : memref<4x1xf32, #tpu.memory_space<vmem>>, vector<4x1xf32>
    %26 = vector.broadcast %25 : vector<4x1xf32> to vector<4x128xf32>
    %27 = arith.addf %24, %26 : vector<4x128xf32>
    %28 = arith.truncf %27 : vector<4x128xf32> to vector<4x128xbf16>
    %c1_24 = arith.constant 1 : index
    %c0_25 = arith.constant 0 : index
    %c0_26 = arith.constant 0 : index
    %29 = vector.load %arg5[%c1_24, %c0_25, %c0_26] : memref<4x128x648xbf16, #tpu.memory_space<vmem>>, vector<1x128x648xbf16>
    %30 = vector.shape_cast %29 : vector<1x128x648xbf16> to vector<128x648xbf16>
    %cst_27 = arith.constant dense<0.000000e+00> : vector<4x648xf32>
    %31 = tpu.matmul %28, %30, %cst_27 {dimension_numbers = #tpu.dot_dimension_numbers<[1], [0], [0], [1], [0, 0, 1, 1], [], []>} : vector<4x128xbf16>, vector<128x648xbf16>, vector<4x648xf32> -> vector<4x648xf32>
    %32 = arith.addf %21, %31 : vector<4x648xf32>
    %c2 = arith.constant 2 : index
    %c0_28 = arith.constant 0 : index
    %c0_29 = arith.constant 0 : index
    %33 = vector.load %arg3[%c2, %c0_28, %c0_29] : memref<4x4x8xf32, #tpu.memory_space<vmem>>, vector<1x4x8xf32>
    %34 = vector.shape_cast %33 : vector<1x4x8xf32> to vector<4x8xf32>
    %cst_30 = arith.constant dense<0.000000e+00> : vector<4x128xf32>
    %35 = tpu.matmul %34, %9, %cst_30 {dimension_numbers = #tpu.dot_dimension_numbers<[1], [0], [0], [1], [0, 0, 1, 1], [], []>} : vector<4x8xf32>, vector<8x128xf32>, vector<4x128xf32> -> vector<4x128xf32>
    %c0_31 = arith.constant 0 : index
    %c0_32 = arith.constant 0 : index
    %36 = vector.load %arg4[%c0_31, %c0_32] : memref<4x1xf32, #tpu.memory_space<vmem>>, vector<4x1xf32>
    %37 = vector.broadcast %36 : vector<4x1xf32> to vector<4x128xf32>
    %38 = arith.addf %35, %37 : vector<4x128xf32>
    %39 = arith.truncf %38 : vector<4x128xf32> to vector<4x128xbf16>
    %c2_33 = arith.constant 2 : index
    %c0_34 = arith.constant 0 : index
    %c0_35 = arith.constant 0 : index
    %40 = vector.load %arg5[%c2_33, %c0_34, %c0_35] : memref<4x128x648xbf16, #tpu.memory_space<vmem>>, vector<1x128x648xbf16>
    %41 = vector.shape_cast %40 : vector<1x128x648xbf16> to vector<128x648xbf16>
    %cst_36 = arith.constant dense<0.000000e+00> : vector<4x648xf32>
    %42 = tpu.matmul %39, %41, %cst_36 {dimension_numbers = #tpu.dot_dimension_numbers<[1], [0], [0], [1], [0, 0, 1, 1], [], []>} : vector<4x128xbf16>, vector<128x648xbf16>, vector<4x648xf32> -> vector<4x648xf32>
    %43 = arith.addf %32, %42 : vector<4x648xf32>
    %c3 = arith.constant 3 : index
    %c0_37 = arith.constant 0 : index
    %c0_38 = arith.constant 0 : index
    %44 = vector.load %arg3[%c3, %c0_37, %c0_38] : memref<4x4x8xf32, #tpu.memory_space<vmem>>, vector<1x4x8xf32>
    %45 = vector.shape_cast %44 : vector<1x4x8xf32> to vector<4x8xf32>
    %cst_39 = arith.constant dense<0.000000e+00> : vector<4x128xf32>
    %46 = tpu.matmul %45, %9, %cst_39 {dimension_numbers = #tpu.dot_dimension_numbers<[1], [0], [0], [1], [0, 0, 1, 1], [], []>} : vector<4x8xf32>, vector<8x128xf32>, vector<4x128xf32> -> vector<4x128xf32>
    %c0_40 = arith.constant 0 : index
    %c0_41 = arith.constant 0 : index
    %47 = vector.load %arg4[%c0_40, %c0_41] : memref<4x1xf32, #tpu.memory_space<vmem>>, vector<4x1xf32>
    %48 = vector.broadcast %47 : vector<4x1xf32> to vector<4x128xf32>
    %49 = arith.addf %46, %48 : vector<4x128xf32>
    %50 = arith.truncf %49 : vector<4x128xf32> to vector<4x128xbf16>
    %c3_42 = arith.constant 3 : index
    %c0_43 = arith.constant 0 : index
    %c0_44 = arith.constant 0 : index
    %51 = vector.load %arg5[%c3_42, %c0_43, %c0_44] : memref<4x128x648xbf16, #tpu.memory_space<vmem>>, vector<1x128x648xbf16>
    %52 = vector.shape_cast %51 : vector<1x128x648xbf16> to vector<128x648xbf16>
    %cst_45 = arith.constant dense<0.000000e+00> : vector<4x648xf32>
    %53 = tpu.matmul %50, %52, %cst_45 {dimension_numbers = #tpu.dot_dimension_numbers<[1], [0], [0], [1], [0, 0, 1, 1], [], []>} : vector<4x128xbf16>, vector<128x648xbf16>, vector<4x648xf32> -> vector<4x648xf32>
    %54 = arith.addf %43, %53 : vector<4x648xf32>
    %c0_46 = arith.constant 0 : index
    %c0_47 = arith.constant 0 : index
    %55 = vector.load %arg2[%c0_46, %c0_47] : memref<4x648xf32, #tpu.memory_space<vmem>>, vector<4x648xf32>
    %56 = tpu.concatenate %55, %54 in 0 : vector<4x648xf32>, vector<4x648xf32> -> vector<8x648xf32>
    %c0_48 = arith.constant 0 : index
    %c19 = arith.constant 19 : index
    %57 = vector.load %arg11[%c0_48, %c19] : memref<8x686xf32, #tpu.memory_space<vmem>>, vector<8x648xf32>
    tpu.vector_store %arg11[%c0_48, %c19], %56 {strides = array<i32>} : memref<8x686xf32, #tpu.memory_space<vmem>>, vector<8x648xf32>,
    %cst_49 = arith.constant 0.000000e+00 : f32
    %58 = vector.broadcast %cst_49 : f32 to vector<8x648xf32>
    %c0_50 = arith.constant 0 : index
    %c0_51 = arith.constant 0 : index
    %59 = vector.load %arg11[%c0_50, %c0_51] : memref<8x686xf32, #tpu.memory_space<vmem>>, vector<8x648xf32>
    %60 = arith.truncf %59 : vector<8x648xf32> to vector<8x648xbf16>
    %c0_52 = arith.constant 0 : index
    %c0_53 = arith.constant 0 : index
    %c0_54 = arith.constant 0 : index
    %61 = vector.load %arg6[%c0_52, %c0_53, %c0_54] : memref<36x8x8xbf16, #tpu.memory_space<vmem>>, vector<1x8x8xbf16>
    %62 = vector.shape_cast %61 : vector<1x8x8xbf16> to vector<8x8xbf16>
    %cst_55 = arith.constant dense<0.000000e+00> : vector<8x648xf32>
    %63 = tpu.matmul %62, %60, %cst_55 {dimension_numbers = #tpu.dot_dimension_numbers<[1], [0], [0], [1], [0, 0, 1, 1], [], []>} : vector<8x8xbf16>, vector<8x648xbf16>, vector<8x648xf32> -> vector<8x648xf32>
    %64 = arith.addf %58, %63 : vector<8x648xf32>
    %c0_56 = arith.constant 0 : index
    %c1_57 = arith.constant 1 : index
    %65 = vector.load %arg11[%c0_56, %c1_57] : memref<8x686xf32, #tpu.memory_space<vmem>>, vector<8x648xf32>
    %66 = arith.truncf %65 : vector<8x648xf32> to vector<8x648xbf16>
    %c1_58 = arith.constant 1 : index
    %c0_59 = arith.constant 0 : index
    %c0_60 = arith.constant 0 : index
    %67 = vector.load %arg6[%c1_58, %c0_59, %c0_60] : memref<36x8x8xbf16, #tpu.memory_space<vmem>>, vector<1x8x8xbf16>
    %68 = vector.shape_cast %67 : vector<1x8x8xbf16> to vector<8x8xbf16>
    %cst_61 = arith.constant dense<0.000000e+00> : vector<8x648xf32>
    %69 = tpu.matmul %68, %66, %cst_61 {dimension_numbers = #tpu.dot_dimension_numbers<[1], [0], [0], [1], [0, 0, 1, 1], [], []>} : vector<8x8xbf16>, vector<8x648xbf16>, vector<8x648xf32> -> vector<8x648xf32>
    %70 = arith.addf %64, %69 : vector<8x648xf32>
    %c0_62 = arith.constant 0 : index
    %c2_63 = arith.constant 2 : index
    %71 = vector.load %arg11[%c0_62, %c2_63] : memref<8x686xf32, #tpu.memory_space<vmem>>, vector<8x648xf32>
    %72 = arith.truncf %71 : vector<8x648xf32> to vector<8x648xbf16>
    %c2_64 = arith.constant 2 : index
    %c0_65 = arith.constant 0 : index
    %c0_66 = arith.constant 0 : index
    %73 = vector.load %arg6[%c2_64, %c0_65, %c0_66] : memref<36x8x8xbf16, #tpu.memory_space<vmem>>, vector<1x8x8xbf16>
    %74 = vector.shape_cast %73 : vector<1x8x8xbf16> to vector<8x8xbf16>
    %cst_67 = arith.constant dense<0.000000e+00> : vector<8x648xf32>
    %75 = tpu.matmul %74, %72, %cst_67 {dimension_numbers = #tpu.dot_dimension_numbers<[1], [0], [0], [1], [0, 0, 1, 1], [], []>} : vector<8x8xbf16>, vector<8x648xbf16>, vector<8x648xf32> -> vector<8x648xf32>
    %76 = arith.addf %70, %75 : vector<8x648xf32>
    %c0_68 = arith.constant 0 : index
    %c18 = arith.constant 18 : index
    %77 = vector.load %arg11[%c0_68, %c18] : memref<8x686xf32, #tpu.memory_space<vmem>>, vector<8x648xf32>
    %78 = arith.truncf %77 : vector<8x648xf32> to vector<8x648xbf16>
    %c3_69 = arith.constant 3 : index
    %c0_70 = arith.constant 0 : index
    %c0_71 = arith.constant 0 : index
    %79 = vector.load %arg6[%c3_69, %c0_70, %c0_71] : memref<36x8x8xbf16, #tpu.memory_space<vmem>>, vector<1x8x8xbf16>
    %80 = vector.shape_cast %79 : vector<1x8x8xbf16> to vector<8x8xbf16>
    %cst_72 = arith.constant dense<0.000000e+00> : vector<8x648xf32>
    %81 = tpu.matmul %80, %78, %cst_72 {dimension_numbers = #tpu.dot_dimension_numbers<[1], [0], [0], [1], [0, 0, 1, 1], [], []>} : vector<8x8xbf16>, vector<8x648xbf16>, vector<8x648xf32> -> vector<8x648xf32>
    %82 = arith.addf %76, %81 : vector<8x648xf32>
    %c0_73 = arith.constant 0 : index
    %c19_74 = arith.constant 19 : index
    %83 = vector.load %arg11[%c0_73, %c19_74] : memref<8x686xf32, #tpu.memory_space<vmem>>, vector<8x648xf32>
    %84 = arith.truncf %83 : vector<8x648xf32> to vector<8x648xbf16>
    %c4 = arith.constant 4 : index
    %c0_75 = arith.constant 0 : index
    %c0_76 = arith.constant 0 : index
    %85 = vector.load %arg6[%c4, %c0_75, %c0_76] : memref<36x8x8xbf16, #tpu.memory_space<vmem>>, vector<1x8x8xbf16>
    %86 = vector.shape_cast %85 : vector<1x8x8xbf16> to vector<8x8xbf16>
    %cst_77 = arith.constant dense<0.000000e+00> : vector<8x648xf32>
    %87 = tpu.matmul %86, %84, %cst_77 {dimension_numbers = #tpu.dot_dimension_numbers<[1], [0], [0], [1], [0, 0, 1, 1], [], []>} : vector<8x8xbf16>, vector<8x648xbf16>, vector<8x648xf32> -> vector<8x648xf32>
    %88 = arith.addf %82, %87 : vector<8x648xf32>
    %c0_78 = arith.constant 0 : index
    %c20 = arith.constant 20 : index
    %89 = vector.load %arg11[%c0_78, %c20] : memref<8x686xf32, #tpu.memory_space<vmem>>, vector<8x648xf32>
    %90 = arith.truncf %89 : vector<8x648xf32> to vector<8x648xbf16>
    %c5 = arith.constant 5 : index
    %c0_79 = arith.constant 0 : index
    %c0_80 = arith.constant 0 : index
    %91 = vector.load %arg6[%c5, %c0_79, %c0_80] : memref<36x8x8xbf16, #tpu.memory_space<vmem>>, vector<1x8x8xbf16>
    %92 = vector.shape_cast %91 : vector<1x8x8xbf16> to vector<8x8xbf16>
    %cst_81 = arith.constant dense<0.000000e+00> : vector<8x648xf32>
    %93 = tpu.matmul %92, %90, %cst_81 {dimension_numbers = #tpu.dot_dimension_numbers<[1], [0], [0], [1], [0, 0, 1, 1], [], []>} : vector<8x8xbf16>, vector<8x648xbf16>, vector<8x648xf32> -> vector<8x648xf32>
    %94 = arith.addf %88, %93 : vector<8x648xf32>
    %c0_82 = arith.constant 0 : index
    %c36 = arith.constant 36 : index
    %95 = vector.load %arg11[%c0_82, %c36] : memref<8x686xf32, #tpu.memory_space<vmem>>, vector<8x648xf32>
    %96 = arith.truncf %95 : vector<8x648xf32> to vector<8x648xbf16>
    %c6 = arith.constant 6 : index
    %c0_83 = arith.constant 0 : index
    %c0_84 = arith.constant 0 : index
    %97 = vector.load %arg6[%c6, %c0_83, %c0_84] : memref<36x8x8xbf16, #tpu.memory_space<vmem>>, vector<1x8x8xbf16>
    %98 = vector.shape_cast %97 : vector<1x8x8xbf16> to vector<8x8xbf16>
    %cst_85 = arith.constant dense<0.000000e+00> : vector<8x648xf32>
    %99 = tpu.matmul %98, %96, %cst_85 {dimension_numbers = #tpu.dot_dimension_numbers<[1], [0], [0], [1], [0, 0, 1, 1], [], []>} : vector<8x8xbf16>, vector<8x648xbf16>, vector<8x648xf32> -> vector<8x648xf32>
    %100 = arith.addf %94, %99 : vector<8x648xf32>
    %c0_86 = arith.constant 0 : index
    %c37 = arith.constant 37 : index
    %101 = vector.load %arg11[%c0_86, %c37] : memref<8x686xf32, #tpu.memory_space<vmem>>, vector<8x648xf32>
    %102 = arith.truncf %101 : vector<8x648xf32> to vector<8x648xbf16>
    %c7 = arith.constant 7 : index
    %c0_87 = arith.constant 0 : index
    %c0_88 = arith.constant 0 : index
    %103 = vector.load %arg6[%c7, %c0_87, %c0_88] : memref<36x8x8xbf16, #tpu.memory_space<vmem>>, vector<1x8x8xbf16>
    %104 = vector.shape_cast %103 : vector<1x8x8xbf16> to vector<8x8xbf16>
    %cst_89 = arith.constant dense<0.000000e+00> : vector<8x648xf32>
    %105 = tpu.matmul %104, %102, %cst_89 {dimension_numbers = #tpu.dot_dimension_numbers<[1], [0], [0], [1], [0, 0, 1, 1], [], []>} : vector<8x8xbf16>, vector<8x648xbf16>, vector<8x648xf32> -> vector<8x648xf32>
    %106 = arith.addf %100, %105 : vector<8x648xf32>
    %c0_90 = arith.constant 0 : index
    %c38 = arith.constant 38 : index
    %107 = vector.load %arg11[%c0_90, %c38] : memref<8x686xf32, #tpu.memory_space<vmem>>, vector<8x648xf32>
    %108 = arith.truncf %107 : vector<8x648xf32> to vector<8x648xbf16>
    %c8 = arith.constant 8 : index
    %c0_91 = arith.constant 0 : index
    %c0_92 = arith.constant 0 : index
    %109 = vector.load %arg6[%c8, %c0_91, %c0_92] : memref<36x8x8xbf16, #tpu.memory_space<vmem>>, vector<1x8x8xbf16>
    %110 = vector.shape_cast %109 : vector<1x8x8xbf16> to vector<8x8xbf16>
    %cst_93 = arith.constant dense<0.000000e+00> : vector<8x648xf32>
    %111 = tpu.matmul %110, %108, %cst_93 {dimension_numbers = #tpu.dot_dimension_numbers<[1], [0], [0], [1], [0, 0, 1, 1], [], []>} : vector<8x8xbf16>, vector<8x648xbf16>, vector<8x648xf32> -> vector<8x648xf32>
    %112 = arith.addf %106, %111 : vector<8x648xf32>
    %c0_94 = arith.constant 0 : index
    %c0_95 = arith.constant 0 : index
    %c0_96 = arith.constant 0 : index
    %113 = vector.load %arg7[%c0_94, %c0_95, %c0_96] : memref<4x8x1xf32, #tpu.memory_space<vmem>>, vector<1x8x1xf32>
    %114 = vector.shape_cast %113 : vector<1x8x1xf32> to vector<8x1xf32>
    %115 = vector.broadcast %114 : vector<8x1xf32> to vector<8x648xf32>
    %116 = arith.mulf %112, %115 : vector<8x648xf32>
    %c0_97 = arith.constant 0 : index
    %c0_98 = arith.constant 0 : index
    %c0_99 = arith.constant 0 : index
    %117 = vector.load %arg8[%c0_97, %c0_98, %c0_99] : memref<4x8x1xf32, #tpu.memory_space<vmem>>, vector<1x8x1xf32>
    %118 = vector.shape_cast %117 : vector<1x8x1xf32> to vector<8x1xf32>
    %119 = vector.broadcast %118 : vector<8x1xf32> to vector<8x648xf32>
    %120 = arith.addf %116, %119 : vector<8x648xf32>
    %cst_100 = arith.constant 0.000000e+00 : f32
    %121 = vector.broadcast %cst_100 : f32 to vector<8x648xf32>
    %122 = arith.maximumf %120, %121 : vector<8x648xf32>
    %cst_101 = arith.constant 0.000000e+00 : f32
    %123 = vector.broadcast %cst_101 : f32 to vector<8x648xf32>
    %124 = arith.select %4, %122, %123 : vector<8x648xi1>, vector<8x648xf32>
    %c0_102 = arith.constant 0 : index
    %c19_103 = arith.constant 19 : index
    %125 = vector.load %arg11[%c0_102, %c19_103] : memref<8x686xf32, #tpu.memory_space<vmem>>, vector<8x648xf32>
    tpu.vector_store %arg11[%c0_102, %c19_103], %124 {strides = array<i32>} : memref<8x686xf32, #tpu.memory_space<vmem>>, vector<8x648xf32>,
    %cst_104 = arith.constant 0.000000e+00 : f32
    %126 = vector.broadcast %cst_104 : f32 to vector<8x648xf32>
    %c0_105 = arith.constant 0 : index
    %c0_106 = arith.constant 0 : index
    %127 = vector.load %arg11[%c0_105, %c0_106] : memref<8x686xf32, #tpu.memory_space<vmem>>, vector<8x648xf32>
    %128 = arith.truncf %127 : vector<8x648xf32> to vector<8x648xbf16>
    %c9 = arith.constant 9 : index
    %c0_107 = arith.constant 0 : index
    %c0_108 = arith.constant 0 : index
    %129 = vector.load %arg6[%c9, %c0_107, %c0_108] : memref<36x8x8xbf16, #tpu.memory_space<vmem>>, vector<1x8x8xbf16>
    %130 = vector.shape_cast %129 : vector<1x8x8xbf16> to vector<8x8xbf16>
    %cst_109 = arith.constant dense<0.000000e+00> : vector<8x648xf32>
    %131 = tpu.matmul %130, %128, %cst_109 {dimension_numbers = #tpu.dot_dimension_numbers<[1], [0], [0], [1], [0, 0, 1, 1], [], []>} : vector<8x8xbf16>, vector<8x648xbf16>, vector<8x648xf32> -> vector<8x648xf32>
    %132 = arith.addf %126, %131 : vector<8x648xf32>
    %c0_110 = arith.constant 0 : index
    %c1_111 = arith.constant 1 : index
    %133 = vector.load %arg11[%c0_110, %c1_111] : memref<8x686xf32, #tpu.memory_space<vmem>>, vector<8x648xf32>
    %134 = arith.truncf %133 : vector<8x648xf32> to vector<8x648xbf16>
    %c10 = arith.constant 10 : index
    %c0_112 = arith.constant 0 : index
    %c0_113 = arith.constant 0 : index
    %135 = vector.load %arg6[%c10, %c0_112, %c0_113] : memref<36x8x8xbf16, #tpu.memory_space<vmem>>, vector<1x8x8xbf16>
    %136 = vector.shape_cast %135 : vector<1x8x8xbf16> to vector<8x8xbf16>
    %cst_114 = arith.constant dense<0.000000e+00> : vector<8x648xf32>
    %137 = tpu.matmul %136, %134, %cst_114 {dimension_numbers = #tpu.dot_dimension_numbers<[1], [0], [0], [1], [0, 0, 1, 1], [], []>} : vector<8x8xbf16>, vector<8x648xbf16>, vector<8x648xf32> -> vector<8x648xf32>
    %138 = arith.addf %132, %137 : vector<8x648xf32>
    %c0_115 = arith.constant 0 : index
    %c2_116 = arith.constant 2 : index
    %139 = vector.load %arg11[%c0_115, %c2_116] : memref<8x686xf32, #tpu.memory_space<vmem>>, vector<8x648xf32>
    %140 = arith.truncf %139 : vector<8x648xf32> to vector<8x648xbf16>
    %c11 = arith.constant 11 : index
    %c0_117 = arith.constant 0 : index
    %c0_118 = arith.constant 0 : index
    %141 = vector.load %arg6[%c11, %c0_117, %c0_118] : memref<36x8x8xbf16, #tpu.memory_space<vmem>>, vector<1x8x8xbf16>
    %142 = vector.shape_cast %141 : vector<1x8x8xbf16> to vector<8x8xbf16>
    %cst_119 = arith.constant dense<0.000000e+00> : vector<8x648xf32>
    %143 = tpu.matmul %142, %140, %cst_119 {dimension_numbers = #tpu.dot_dimension_numbers<[1], [0], [0], [1], [0, 0, 1, 1], [], []>} : vector<8x8xbf16>, vector<8x648xbf16>, vector<8x648xf32> -> vector<8x648xf32>
    %144 = arith.addf %138, %143 : vector<8x648xf32>
    %c0_120 = arith.constant 0 : index
    %c18_121 = arith.constant 18 : index
    %145 = vector.load %arg11[%c0_120, %c18_121] : memref<8x686xf32, #tpu.memory_space<vmem>>, vector<8x648xf32>
    %146 = arith.truncf %145 : vector<8x648xf32> to vector<8x648xbf16>
    %c12 = arith.constant 12 : index
    %c0_122 = arith.constant 0 : index
    %c0_123 = arith.constant 0 : index
    %147 = vector.load %arg6[%c12, %c0_122, %c0_123] : memref<36x8x8xbf16, #tpu.memory_space<vmem>>, vector<1x8x8xbf16>
    %148 = vector.shape_cast %147 : vector<1x8x8xbf16> to vector<8x8xbf16>
    %cst_124 = arith.constant dense<0.000000e+00> : vector<8x648xf32>
    %149 = tpu.matmul %148, %146, %cst_124 {dimension_numbers = #tpu.dot_dimension_numbers<[1], [0], [0], [1], [0, 0, 1, 1], [], []>} : vector<8x8xbf16>, vector<8x648xbf16>, vector<8x648xf32> -> vector<8x648xf32>
    %150 = arith.addf %144, %149 : vector<8x648xf32>
    %c0_125 = arith.constant 0 : index
    %c19_126 = arith.constant 19 : index
    %151 = vector.load %arg11[%c0_125, %c19_126] : memref<8x686xf32, #tpu.memory_space<vmem>>, vector<8x648xf32>
    %152 = arith.truncf %151 : vector<8x648xf32> to vector<8x648xbf16>
    %c13 = arith.constant 13 : index
    %c0_127 = arith.constant 0 : index
    %c0_128 = arith.constant 0 : index
    %153 = vector.load %arg6[%c13, %c0_127, %c0_128] : memref<36x8x8xbf16, #tpu.memory_space<vmem>>, vector<1x8x8xbf16>
    %154 = vector.shape_cast %153 : vector<1x8x8xbf16> to vector<8x8xbf16>
    %cst_129 = arith.constant dense<0.000000e+00> : vector<8x648xf32>
    %155 = tpu.matmul %154, %152, %cst_129 {dimension_numbers = #tpu.dot_dimension_numbers<[1], [0], [0], [1], [0, 0, 1, 1], [], []>} : vector<8x8xbf16>, vector<8x648xbf16>, vector<8x648xf32> -> vector<8x648xf32>
    %156 = arith.addf %150, %155 : vector<8x648xf32>
    %c0_130 = arith.constant 0 : index
    %c20_131 = arith.constant 20 : index
    %157 = vector.load %arg11[%c0_130, %c20_131] : memref<8x686xf32, #tpu.memory_space<vmem>>, vector<8x648xf32>
    %158 = arith.truncf %157 : vector<8x648xf32> to vector<8x648xbf16>
    %c14 = arith.constant 14 : index
    %c0_132 = arith.constant 0 : index
    %c0_133 = arith.constant 0 : index
    %159 = vector.load %arg6[%c14, %c0_132, %c0_133] : memref<36x8x8xbf16, #tpu.memory_space<vmem>>, vector<1x8x8xbf16>
    %160 = vector.shape_cast %159 : vector<1x8x8xbf16> to vector<8x8xbf16>
    %cst_134 = arith.constant dense<0.000000e+00> : vector<8x648xf32>
    %161 = tpu.matmul %160, %158, %cst_134 {dimension_numbers = #tpu.dot_dimension_numbers<[1], [0], [0], [1], [0, 0, 1, 1], [], []>} : vector<8x8xbf16>, vector<8x648xbf16>, vector<8x648xf32> -> vector<8x648xf32>
    %162 = arith.addf %156, %161 : vector<8x648xf32>
    %c0_135 = arith.constant 0 : index
    %c36_136 = arith.constant 36 : index
    %163 = vector.load %arg11[%c0_135, %c36_136] : memref<8x686xf32, #tpu.memory_space<vmem>>, vector<8x648xf32>
    %164 = arith.truncf %163 : vector<8x648xf32> to vector<8x648xbf16>
    %c15 = arith.constant 15 : index
    %c0_137 = arith.constant 0 : index
    %c0_138 = arith.constant 0 : index
    %165 = vector.load %arg6[%c15, %c0_137, %c0_138] : memref<36x8x8xbf16, #tpu.memory_space<vmem>>, vector<1x8x8xbf16>
    %166 = vector.shape_cast %165 : vector<1x8x8xbf16> to vector<8x8xbf16>
    %cst_139 = arith.constant dense<0.000000e+00> : vector<8x648xf32>
    %167 = tpu.matmul %166, %164, %cst_139 {dimension_numbers = #tpu.dot_dimension_numbers<[1], [0], [0], [1], [0, 0, 1, 1], [], []>} : vector<8x8xbf16>, vector<8x648xbf16>, vector<8x648xf32> -> vector<8x648xf32>
    %168 = arith.addf %162, %167 : vector<8x648xf32>
    %c0_140 = arith.constant 0 : index
    %c37_141 = arith.constant 37 : index
    %169 = vector.load %arg11[%c0_140, %c37_141] : memref<8x686xf32, #tpu.memory_space<vmem>>, vector<8x648xf32>
    %170 = arith.truncf %169 : vector<8x648xf32> to vector<8x648xbf16>
    %c16 = arith.constant 16 : index
    %c0_142 = arith.constant 0 : index
    %c0_143 = arith.constant 0 : index
    %171 = vector.load %arg6[%c16, %c0_142, %c0_143] : memref<36x8x8xbf16, #tpu.memory_space<vmem>>, vector<1x8x8xbf16>
    %172 = vector.shape_cast %171 : vector<1x8x8xbf16> to vector<8x8xbf16>
    %cst_144 = arith.constant dense<0.000000e+00> : vector<8x648xf32>
    %173 = tpu.matmul %172, %170, %cst_144 {dimension_numbers = #tpu.dot_dimension_numbers<[1], [0], [0], [1], [0, 0, 1, 1], [], []>} : vector<8x8xbf16>, vector<8x648xbf16>, vector<8x648xf32> -> vector<8x648xf32>
    %174 = arith.addf %168, %173 : vector<8x648xf32>
    %c0_145 = arith.constant 0 : index
    %c38_146 = arith.constant 38 : index
    %175 = vector.load %arg11[%c0_145, %c38_146] : memref<8x686xf32, #tpu.memory_space<vmem>>, vector<8x648xf32>
    %176 = arith.truncf %175 : vector<8x648xf32> to vector<8x648xbf16>
    %c17 = arith.constant 17 : index
    %c0_147 = arith.constant 0 : index
    %c0_148 = arith.constant 0 : index
    %177 = vector.load %arg6[%c17, %c0_147, %c0_148] : memref<36x8x8xbf16, #tpu.memory_space<vmem>>, vector<1x8x8xbf16>
    %178 = vector.shape_cast %177 : vector<1x8x8xbf16> to vector<8x8xbf16>
    %cst_149 = arith.constant dense<0.000000e+00> : vector<8x648xf32>
    %179 = tpu.matmul %178, %176, %cst_149 {dimension_numbers = #tpu.dot_dimension_numbers<[1], [0], [0], [1], [0, 0, 1, 1], [], []>} : vector<8x8xbf16>, vector<8x648xbf16>, vector<8x648xf32> -> vector<8x648xf32>
    %180 = arith.addf %174, %179 : vector<8x648xf32>
    %c1_150 = arith.constant 1 : index
    %c0_151 = arith.constant 0 : index
    %c0_152 = arith.constant 0 : index
    %181 = vector.load %arg7[%c1_150, %c0_151, %c0_152] : memref<4x8x1xf32, #tpu.memory_space<vmem>>, vector<1x8x1xf32>
    %182 = vector.shape_cast %181 : vector<1x8x1xf32> to vector<8x1xf32>
    %183 = vector.broadcast %182 : vector<8x1xf32> to vector<8x648xf32>
    %184 = arith.mulf %180, %183 : vector<8x648xf32>
    %c1_153 = arith.constant 1 : index
    %c0_154 = arith.constant 0 : index
    %c0_155 = arith.constant 0 : index
    %185 = vector.load %arg8[%c1_153, %c0_154, %c0_155] : memref<4x8x1xf32, #tpu.memory_space<vmem>>, vector<1x8x1xf32>
    %186 = vector.shape_cast %185 : vector<1x8x1xf32> to vector<8x1xf32>
    %187 = vector.broadcast %186 : vector<8x1xf32> to vector<8x648xf32>
    %188 = arith.addf %184, %187 : vector<8x648xf32>
    %cst_156 = arith.constant 0.000000e+00 : f32
    %189 = vector.broadcast %cst_156 : f32 to vector<8x648xf32>
    %190 = arith.maximumf %188, %189 : vector<8x648xf32>
    %cst_157 = arith.constant 0.000000e+00 : f32
    %191 = vector.broadcast %cst_157 : f32 to vector<8x648xf32>
    %192 = arith.select %4, %190, %191 : vector<8x648xi1>, vector<8x648xf32>
    %193 = arith.addf %192, %56 : vector<8x648xf32>
    %c0_158 = arith.constant 0 : index
    %c19_159 = arith.constant 19 : index
    %194 = vector.load %arg11[%c0_158, %c19_159] : memref<8x686xf32, #tpu.memory_space<vmem>>, vector<8x648xf32>
    tpu.vector_store %arg11[%c0_158, %c19_159], %193 {strides = array<i32>} : memref<8x686xf32, #tpu.memory_space<vmem>>, vector<8x648xf32>,
    %cst_160 = arith.constant 0.000000e+00 : f32
    %195 = vector.broadcast %cst_160 : f32 to vector<8x648xf32>
    %c0_161 = arith.constant 0 : index
    %c0_162 = arith.constant 0 : index
    %196 = vector.load %arg11[%c0_161, %c0_162] : memref<8x686xf32, #tpu.memory_space<vmem>>, vector<8x648xf32>
    %197 = arith.truncf %196 : vector<8x648xf32> to vector<8x648xbf16>
    %c18_163 = arith.constant 18 : index
    %c0_164 = arith.constant 0 : index
    %c0_165 = arith.constant 0 : index
    %198 = vector.load %arg6[%c18_163, %c0_164, %c0_165] : memref<36x8x8xbf16, #tpu.memory_space<vmem>>, vector<1x8x8xbf16>
    %199 = vector.shape_cast %198 : vector<1x8x8xbf16> to vector<8x8xbf16>
    %cst_166 = arith.constant dense<0.000000e+00> : vector<8x648xf32>
    %200 = tpu.matmul %199, %197, %cst_166 {dimension_numbers = #tpu.dot_dimension_numbers<[1], [0], [0], [1], [0, 0, 1, 1], [], []>} : vector<8x8xbf16>, vector<8x648xbf16>, vector<8x648xf32> -> vector<8x648xf32>
    %201 = arith.addf %195, %200 : vector<8x648xf32>
    %c0_167 = arith.constant 0 : index
    %c1_168 = arith.constant 1 : index
    %202 = vector.load %arg11[%c0_167, %c1_168] : memref<8x686xf32, #tpu.memory_space<vmem>>, vector<8x648xf32>
    %203 = arith.truncf %202 : vector<8x648xf32> to vector<8x648xbf16>
    %c19_169 = arith.constant 19 : index
    %c0_170 = arith.constant 0 : index
    %c0_171 = arith.constant 0 : index
    %204 = vector.load %arg6[%c19_169, %c0_170, %c0_171] : memref<36x8x8xbf16, #tpu.memory_space<vmem>>, vector<1x8x8xbf16>
    %205 = vector.shape_cast %204 : vector<1x8x8xbf16> to vector<8x8xbf16>
    %cst_172 = arith.constant dense<0.000000e+00> : vector<8x648xf32>
    %206 = tpu.matmul %205, %203, %cst_172 {dimension_numbers = #tpu.dot_dimension_numbers<[1], [0], [0], [1], [0, 0, 1, 1], [], []>} : vector<8x8xbf16>, vector<8x648xbf16>, vector<8x648xf32> -> vector<8x648xf32>
    %207 = arith.addf %201, %206 : vector<8x648xf32>
    %c0_173 = arith.constant 0 : index
    %c2_174 = arith.constant 2 : index
    %208 = vector.load %arg11[%c0_173, %c2_174] : memref<8x686xf32, #tpu.memory_space<vmem>>, vector<8x648xf32>
    %209 = arith.truncf %208 : vector<8x648xf32> to vector<8x648xbf16>
    %c20_175 = arith.constant 20 : index
    %c0_176 = arith.constant 0 : index
    %c0_177 = arith.constant 0 : index
    %210 = vector.load %arg6[%c20_175, %c0_176, %c0_177] : memref<36x8x8xbf16, #tpu.memory_space<vmem>>, vector<1x8x8xbf16>
    %211 = vector.shape_cast %210 : vector<1x8x8xbf16> to vector<8x8xbf16>
    %cst_178 = arith.constant dense<0.000000e+00> : vector<8x648xf32>
    %212 = tpu.matmul %211, %209, %cst_178 {dimension_numbers = #tpu.dot_dimension_numbers<[1], [0], [0], [1], [0, 0, 1, 1], [], []>} : vector<8x8xbf16>, vector<8x648xbf16>, vector<8x648xf32> -> vector<8x648xf32>
    %213 = arith.addf %207, %212 : vector<8x648xf32>
    %c0_179 = arith.constant 0 : index
    %c18_180 = arith.constant 18 : index
    %214 = vector.load %arg11[%c0_179, %c18_180] : memref<8x686xf32, #tpu.memory_space<vmem>>, vector<8x648xf32>
    %215 = arith.truncf %214 : vector<8x648xf32> to vector<8x648xbf16>
    %c21 = arith.constant 21 : index
    %c0_181 = arith.constant 0 : index
    %c0_182 = arith.constant 0 : index
    %216 = vector.load %arg6[%c21, %c0_181, %c0_182] : memref<36x8x8xbf16, #tpu.memory_space<vmem>>, vector<1x8x8xbf16>
    %217 = vector.shape_cast %216 : vector<1x8x8xbf16> to vector<8x8xbf16>
    %cst_183 = arith.constant dense<0.000000e+00> : vector<8x648xf32>
    %218 = tpu.matmul %217, %215, %cst_183 {dimension_numbers = #tpu.dot_dimension_numbers<[1], [0], [0], [1], [0, 0, 1, 1], [], []>} : vector<8x8xbf16>, vector<8x648xbf16>, vector<8x648xf32> -> vector<8x648xf32>
    %219 = arith.addf %213, %218 : vector<8x648xf32>
    %c0_184 = arith.constant 0 : index
    %c19_185 = arith.constant 19 : index
    %220 = vector.load %arg11[%c0_184, %c19_185] : memref<8x686xf32, #tpu.memory_space<vmem>>, vector<8x648xf32>
    %221 = arith.truncf %220 : vector<8x648xf32> to vector<8x648xbf16>
    %c22 = arith.constant 22 : index
    %c0_186 = arith.constant 0 : index
    %c0_187 = arith.constant 0 : index
    %222 = vector.load %arg6[%c22, %c0_186, %c0_187] : memref<36x8x8xbf16, #tpu.memory_space<vmem>>, vector<1x8x8xbf16>
    %223 = vector.shape_cast %222 : vector<1x8x8xbf16> to vector<8x8xbf16>
    %cst_188 = arith.constant dense<0.000000e+00> : vector<8x648xf32>
    %224 = tpu.matmul %223, %221, %cst_188 {dimension_numbers = #tpu.dot_dimension_numbers<[1], [0], [0], [1], [0, 0, 1, 1], [], []>} : vector<8x8xbf16>, vector<8x648xbf16>, vector<8x648xf32> -> vector<8x648xf32>
    %225 = arith.addf %219, %224 : vector<8x648xf32>
    %c0_189 = arith.constant 0 : index
    %c20_190 = arith.constant 20 : index
    %226 = vector.load %arg11[%c0_189, %c20_190] : memref<8x686xf32, #tpu.memory_space<vmem>>, vector<8x648xf32>
    %227 = arith.truncf %226 : vector<8x648xf32> to vector<8x648xbf16>
    %c23 = arith.constant 23 : index
    %c0_191 = arith.constant 0 : index
    %c0_192 = arith.constant 0 : index
    %228 = vector.load %arg6[%c23, %c0_191, %c0_192] : memref<36x8x8xbf16, #tpu.memory_space<vmem>>, vector<1x8x8xbf16>
    %229 = vector.shape_cast %228 : vector<1x8x8xbf16> to vector<8x8xbf16>
    %cst_193 = arith.constant dense<0.000000e+00> : vector<8x648xf32>
    %230 = tpu.matmul %229, %227, %cst_193 {dimension_numbers = #tpu.dot_dimension_numbers<[1], [0], [0], [1], [0, 0, 1, 1], [], []>} : vector<8x8xbf16>, vector<8x648xbf16>, vector<8x648xf32> -> vector<8x648xf32>
    %231 = arith.addf %225, %230 : vector<8x648xf32>
    %c0_194 = arith.constant 0 : index
    %c36_195 = arith.constant 36 : index
    %232 = vector.load %arg11[%c0_194, %c36_195] : memref<8x686xf32, #tpu.memory_space<vmem>>, vector<8x648xf32>
    %233 = arith.truncf %232 : vector<8x648xf32> to vector<8x648xbf16>
    %c24 = arith.constant 24 : index
    %c0_196 = arith.constant 0 : index
    %c0_197 = arith.constant 0 : index
    %234 = vector.load %arg6[%c24, %c0_196, %c0_197] : memref<36x8x8xbf16, #tpu.memory_space<vmem>>, vector<1x8x8xbf16>
    %235 = vector.shape_cast %234 : vector<1x8x8xbf16> to vector<8x8xbf16>
    %cst_198 = arith.constant dense<0.000000e+00> : vector<8x648xf32>
    %236 = tpu.matmul %235, %233, %cst_198 {dimension_numbers = #tpu.dot_dimension_numbers<[1], [0], [0], [1], [0, 0, 1, 1], [], []>} : vector<8x8xbf16>, vector<8x648xbf16>, vector<8x648xf32> -> vector<8x648xf32>
    %237 = arith.addf %231, %236 : vector<8x648xf32>
    %c0_199 = arith.constant 0 : index
    %c37_200 = arith.constant 37 : index
    %238 = vector.load %arg11[%c0_199, %c37_200] : memref<8x686xf32, #tpu.memory_space<vmem>>, vector<8x648xf32>
    %239 = arith.truncf %238 : vector<8x648xf32> to vector<8x648xbf16>
    %c25 = arith.constant 25 : index
    %c0_201 = arith.constant 0 : index
    %c0_202 = arith.constant 0 : index
    %240 = vector.load %arg6[%c25, %c0_201, %c0_202] : memref<36x8x8xbf16, #tpu.memory_space<vmem>>, vector<1x8x8xbf16>
    %241 = vector.shape_cast %240 : vector<1x8x8xbf16> to vector<8x8xbf16>
    %cst_203 = arith.constant dense<0.000000e+00> : vector<8x648xf32>
    %242 = tpu.matmul %241, %239, %cst_203 {dimension_numbers = #tpu.dot_dimension_numbers<[1], [0], [0], [1], [0, 0, 1, 1], [], []>} : vector<8x8xbf16>, vector<8x648xbf16>, vector<8x648xf32> -> vector<8x648xf32>
    %243 = arith.addf %237, %242 : vector<8x648xf32>
    %c0_204 = arith.constant 0 : index
    %c38_205 = arith.constant 38 : index
    %244 = vector.load %arg11[%c0_204, %c38_205] : memref<8x686xf32, #tpu.memory_space<vmem>>, vector<8x648xf32>
    %245 = arith.truncf %244 : vector<8x648xf32> to vector<8x648xbf16>
    %c26 = arith.constant 26 : index
    %c0_206 = arith.constant 0 : index
    %c0_207 = arith.constant 0 : index
    %246 = vector.load %arg6[%c26, %c0_206, %c0_207] : memref<36x8x8xbf16, #tpu.memory_space<vmem>>, vector<1x8x8xbf16>
    %247 = vector.shape_cast %246 : vector<1x8x8xbf16> to vector<8x8xbf16>
    %cst_208 = arith.constant dense<0.000000e+00> : vector<8x648xf32>
    %248 = tpu.matmul %247, %245, %cst_208 {dimension_numbers = #tpu.dot_dimension_numbers<[1], [0], [0], [1], [0, 0, 1, 1], [], []>} : vector<8x8xbf16>, vector<8x648xbf16>, vector<8x648xf32> -> vector<8x648xf32>
    %249 = arith.addf %243, %248 : vector<8x648xf32>
    %c2_209 = arith.constant 2 : index
    %c0_210 = arith.constant 0 : index
    %c0_211 = arith.constant 0 : index
    %250 = vector.load %arg7[%c2_209, %c0_210, %c0_211] : memref<4x8x1xf32, #tpu.memory_space<vmem>>, vector<1x8x1xf32>
    %251 = vector.shape_cast %250 : vector<1x8x1xf32> to vector<8x1xf32>
    %252 = vector.broadcast %251 : vector<8x1xf32> to vector<8x648xf32>
    %253 = arith.mulf %249, %252 : vector<8x648xf32>
    %c2_212 = arith.constant 2 : index
    %c0_213 = arith.constant 0 : index
    %c0_214 = arith.constant 0 : index
    %254 = vector.load %arg8[%c2_212, %c0_213, %c0_214] : memref<4x8x1xf32, #tpu.memory_space<vmem>>, vector<1x8x1xf32>
    %255 = vector.shape_cast %254 : vector<1x8x1xf32> to vector<8x1xf32>
    %256 = vector.broadcast %255 : vector<8x1xf32> to vector<8x648xf32>
    %257 = arith.addf %253, %256 : vector<8x648xf32>
    %cst_215 = arith.constant 0.000000e+00 : f32
    %258 = vector.broadcast %cst_215 : f32 to vector<8x648xf32>
    %259 = arith.maximumf %257, %258 : vector<8x648xf32>
    %cst_216 = arith.constant 0.000000e+00 : f32
    %260 = vector.broadcast %cst_216 : f32 to vector<8x648xf32>
    %261 = arith.select %4, %259, %260 : vector<8x648xi1>, vector<8x648xf32>
    %c0_217 = arith.constant 0 : index
    %c19_218 = arith.constant 19 : index
    %262 = vector.load %arg11[%c0_217, %c19_218] : memref<8x686xf32, #tpu.memory_space<vmem>>, vector<8x648xf32>
    tpu.vector_store %arg11[%c0_217, %c19_218], %261 {strides = array<i32>} : memref<8x686xf32, #tpu.memory_space<vmem>>, vector<8x648xf32>,
    %cst_219 = arith.constant 0.000000e+00 : f32
    %263 = vector.broadcast %cst_219 : f32 to vector<8x648xf32>
    %c0_220 = arith.constant 0 : index
    %c0_221 = arith.constant 0 : index
    %264 = vector.load %arg11[%c0_220, %c0_221] : memref<8x686xf32, #tpu.memory_space<vmem>>, vector<8x648xf32>
    %265 = arith.truncf %264 : vector<8x648xf32> to vector<8x648xbf16>
    %c27 = arith.constant 27 : index
    %c0_222 = arith.constant 0 : index
    %c0_223 = arith.constant 0 : index
    %266 = vector.load %arg6[%c27, %c0_222, %c0_223] : memref<36x8x8xbf16, #tpu.memory_space<vmem>>, vector<1x8x8xbf16>
    %267 = vector.shape_cast %266 : vector<1x8x8xbf16> to vector<8x8xbf16>
    %cst_224 = arith.constant dense<0.000000e+00> : vector<8x648xf32>
    %268 = tpu.matmul %267, %265, %cst_224 {dimension_numbers = #tpu.dot_dimension_numbers<[1], [0], [0], [1], [0, 0, 1, 1], [], []>} : vector<8x8xbf16>, vector<8x648xbf16>, vector<8x648xf32> -> vector<8x648xf32>
    %269 = arith.addf %263, %268 : vector<8x648xf32>
    %c0_225 = arith.constant 0 : index
    %c1_226 = arith.constant 1 : index
    %270 = vector.load %arg11[%c0_225, %c1_226] : memref<8x686xf32, #tpu.memory_space<vmem>>, vector<8x648xf32>
    %271 = arith.truncf %270 : vector<8x648xf32> to vector<8x648xbf16>
    %c28 = arith.constant 28 : index
    %c0_227 = arith.constant 0 : index
    %c0_228 = arith.constant 0 : index
    %272 = vector.load %arg6[%c28, %c0_227, %c0_228] : memref<36x8x8xbf16, #tpu.memory_space<vmem>>, vector<1x8x8xbf16>
    %273 = vector.shape_cast %272 : vector<1x8x8xbf16> to vector<8x8xbf16>
    %cst_229 = arith.constant dense<0.000000e+00> : vector<8x648xf32>
    %274 = tpu.matmul %273, %271, %cst_229 {dimension_numbers = #tpu.dot_dimension_numbers<[1], [0], [0], [1], [0, 0, 1, 1], [], []>} : vector<8x8xbf16>, vector<8x648xbf16>, vector<8x648xf32> -> vector<8x648xf32>
    %275 = arith.addf %269, %274 : vector<8x648xf32>
    %c0_230 = arith.constant 0 : index
    %c2_231 = arith.constant 2 : index
    %276 = vector.load %arg11[%c0_230, %c2_231] : memref<8x686xf32, #tpu.memory_space<vmem>>, vector<8x648xf32>
    %277 = arith.truncf %276 : vector<8x648xf32> to vector<8x648xbf16>
    %c29 = arith.constant 29 : index
    %c0_232 = arith.constant 0 : index
    %c0_233 = arith.constant 0 : index
    %278 = vector.load %arg6[%c29, %c0_232, %c0_233] : memref<36x8x8xbf16, #tpu.memory_space<vmem>>, vector<1x8x8xbf16>
    %279 = vector.shape_cast %278 : vector<1x8x8xbf16> to vector<8x8xbf16>
    %cst_234 = arith.constant dense<0.000000e+00> : vector<8x648xf32>
    %280 = tpu.matmul %279, %277, %cst_234 {dimension_numbers = #tpu.dot_dimension_numbers<[1], [0], [0], [1], [0, 0, 1, 1], [], []>} : vector<8x8xbf16>, vector<8x648xbf16>, vector<8x648xf32> -> vector<8x648xf32>
    %281 = arith.addf %275, %280 : vector<8x648xf32>
    %c0_235 = arith.constant 0 : index
    %c18_236 = arith.constant 18 : index
    %282 = vector.load %arg11[%c0_235, %c18_236] : memref<8x686xf32, #tpu.memory_space<vmem>>, vector<8x648xf32>
    %283 = arith.truncf %282 : vector<8x648xf32> to vector<8x648xbf16>
    %c30 = arith.constant 30 : index
    %c0_237 = arith.constant 0 : index
    %c0_238 = arith.constant 0 : index
    %284 = vector.load %arg6[%c30, %c0_237, %c0_238] : memref<36x8x8xbf16, #tpu.memory_space<vmem>>, vector<1x8x8xbf16>
    %285 = vector.shape_cast %284 : vector<1x8x8xbf16> to vector<8x8xbf16>
    %cst_239 = arith.constant dense<0.000000e+00> : vector<8x648xf32>
    %286 = tpu.matmul %285, %283, %cst_239 {dimension_numbers = #tpu.dot_dimension_numbers<[1], [0], [0], [1], [0, 0, 1, 1], [], []>} : vector<8x8xbf16>, vector<8x648xbf16>, vector<8x648xf32> -> vector<8x648xf32>
    %287 = arith.addf %281, %286 : vector<8x648xf32>
    %c0_240 = arith.constant 0 : index
    %c19_241 = arith.constant 19 : index
    %288 = vector.load %arg11[%c0_240, %c19_241] : memref<8x686xf32, #tpu.memory_space<vmem>>, vector<8x648xf32>
    %289 = arith.truncf %288 : vector<8x648xf32> to vector<8x648xbf16>
    %c31 = arith.constant 31 : index
    %c0_242 = arith.constant 0 : index
    %c0_243 = arith.constant 0 : index
    %290 = vector.load %arg6[%c31, %c0_242, %c0_243] : memref<36x8x8xbf16, #tpu.memory_space<vmem>>, vector<1x8x8xbf16>
    %291 = vector.shape_cast %290 : vector<1x8x8xbf16> to vector<8x8xbf16>
    %cst_244 = arith.constant dense<0.000000e+00> : vector<8x648xf32>
    %292 = tpu.matmul %291, %289, %cst_244 {dimension_numbers = #tpu.dot_dimension_numbers<[1], [0], [0], [1], [0, 0, 1, 1], [], []>} : vector<8x8xbf16>, vector<8x648xbf16>, vector<8x648xf32> -> vector<8x648xf32>
    %293 = arith.addf %287, %292 : vector<8x648xf32>
    %c0_245 = arith.constant 0 : index
    %c20_246 = arith.constant 20 : index
    %294 = vector.load %arg11[%c0_245, %c20_246] : memref<8x686xf32, #tpu.memory_space<vmem>>, vector<8x648xf32>
    %295 = arith.truncf %294 : vector<8x648xf32> to vector<8x648xbf16>
    %c32 = arith.constant 32 : index
    %c0_247 = arith.constant 0 : index
    %c0_248 = arith.constant 0 : index
    %296 = vector.load %arg6[%c32, %c0_247, %c0_248] : memref<36x8x8xbf16, #tpu.memory_space<vmem>>, vector<1x8x8xbf16>
    %297 = vector.shape_cast %296 : vector<1x8x8xbf16> to vector<8x8xbf16>
    %cst_249 = arith.constant dense<0.000000e+00> : vector<8x648xf32>
    %298 = tpu.matmul %297, %295, %cst_249 {dimension_numbers = #tpu.dot_dimension_numbers<[1], [0], [0], [1], [0, 0, 1, 1], [], []>} : vector<8x8xbf16>, vector<8x648xbf16>, vector<8x648xf32> -> vector<8x648xf32>
    %299 = arith.addf %293, %298 : vector<8x648xf32>
    %c0_250 = arith.constant 0 : index
    %c36_251 = arith.constant 36 : index
    %300 = vector.load %arg11[%c0_250, %c36_251] : memref<8x686xf32, #tpu.memory_space<vmem>>, vector<8x648xf32>
    %301 = arith.truncf %300 : vector<8x648xf32> to vector<8x648xbf16>
    %c33 = arith.constant 33 : index
    %c0_252 = arith.constant 0 : index
    %c0_253 = arith.constant 0 : index
    %302 = vector.load %arg6[%c33, %c0_252, %c0_253] : memref<36x8x8xbf16, #tpu.memory_space<vmem>>, vector<1x8x8xbf16>
    %303 = vector.shape_cast %302 : vector<1x8x8xbf16> to vector<8x8xbf16>
    %cst_254 = arith.constant dense<0.000000e+00> : vector<8x648xf32>
    %304 = tpu.matmul %303, %301, %cst_254 {dimension_numbers = #tpu.dot_dimension_numbers<[1], [0], [0], [1], [0, 0, 1, 1], [], []>} : vector<8x8xbf16>, vector<8x648xbf16>, vector<8x648xf32> -> vector<8x648xf32>
    %305 = arith.addf %299, %304 : vector<8x648xf32>
    %c0_255 = arith.constant 0 : index
    %c37_256 = arith.constant 37 : index
    %306 = vector.load %arg11[%c0_255, %c37_256] : memref<8x686xf32, #tpu.memory_space<vmem>>, vector<8x648xf32>
    %307 = arith.truncf %306 : vector<8x648xf32> to vector<8x648xbf16>
    %c34 = arith.constant 34 : index
    %c0_257 = arith.constant 0 : index
    %c0_258 = arith.constant 0 : index
    %308 = vector.load %arg6[%c34, %c0_257, %c0_258] : memref<36x8x8xbf16, #tpu.memory_space<vmem>>, vector<1x8x8xbf16>
    %309 = vector.shape_cast %308 : vector<1x8x8xbf16> to vector<8x8xbf16>
    %cst_259 = arith.constant dense<0.000000e+00> : vector<8x648xf32>
    %310 = tpu.matmul %309, %307, %cst_259 {dimension_numbers = #tpu.dot_dimension_numbers<[1], [0], [0], [1], [0, 0, 1, 1], [], []>} : vector<8x8xbf16>, vector<8x648xbf16>, vector<8x648xf32> -> vector<8x648xf32>
    %311 = arith.addf %305, %310 : vector<8x648xf32>
    %c0_260 = arith.constant 0 : index
    %c38_261 = arith.constant 38 : index
    %312 = vector.load %arg11[%c0_260, %c38_261] : memref<8x686xf32, #tpu.memory_space<vmem>>, vector<8x648xf32>
    %313 = arith.truncf %312 : vector<8x648xf32> to vector<8x648xbf16>
    %c35 = arith.constant 35 : index
    %c0_262 = arith.constant 0 : index
    %c0_263 = arith.constant 0 : index
    %314 = vector.load %arg6[%c35, %c0_262, %c0_263] : memref<36x8x8xbf16, #tpu.memory_space<vmem>>, vector<1x8x8xbf16>
    %315 = vector.shape_cast %314 : vector<1x8x8xbf16> to vector<8x8xbf16>
    %cst_264 = arith.constant dense<0.000000e+00> : vector<8x648xf32>
    %316 = tpu.matmul %315, %313, %cst_264 {dimension_numbers = #tpu.dot_dimension_numbers<[1], [0], [0], [1], [0, 0, 1, 1], [], []>} : vector<8x8xbf16>, vector<8x648xbf16>, vector<8x648xf32> -> vector<8x648xf32>
    %317 = arith.addf %311, %316 : vector<8x648xf32>
    %c3_265 = arith.constant 3 : index
    %c0_266 = arith.constant 0 : index
    %c0_267 = arith.constant 0 : index
    %318 = vector.load %arg7[%c3_265, %c0_266, %c0_267] : memref<4x8x1xf32, #tpu.memory_space<vmem>>, vector<1x8x1xf32>
    %319 = vector.shape_cast %318 : vector<1x8x1xf32> to vector<8x1xf32>
    %320 = vector.broadcast %319 : vector<8x1xf32> to vector<8x648xf32>
    %321 = arith.mulf %317, %320 : vector<8x648xf32>
    %c3_268 = arith.constant 3 : index
    %c0_269 = arith.constant 0 : index
    %c0_270 = arith.constant 0 : index
    %322 = vector.load %arg8[%c3_268, %c0_269, %c0_270] : memref<4x8x1xf32, #tpu.memory_space<vmem>>, vector<1x8x1xf32>
    %323 = vector.shape_cast %322 : vector<1x8x1xf32> to vector<8x1xf32>
    %324 = vector.broadcast %323 : vector<8x1xf32> to vector<8x648xf32>
    %325 = arith.addf %321, %324 : vector<8x648xf32>
    %cst_271 = arith.constant 0.000000e+00 : f32
    %326 = vector.broadcast %cst_271 : f32 to vector<8x648xf32>
    %327 = arith.maximumf %325, %326 : vector<8x648xf32>
    %cst_272 = arith.constant 0.000000e+00 : f32
    %328 = vector.broadcast %cst_272 : f32 to vector<8x648xf32>
    %329 = arith.select %4, %327, %328 : vector<8x648xi1>, vector<8x648xf32>
    %330 = arith.addf %329, %193 : vector<8x648xf32>
    %c0_273 = arith.constant 0 : index
    %c0_274 = arith.constant 0 : index
    %331 = vector.load %arg10[%c0_273, %c0_274] : memref<8x648xf32, #tpu.memory_space<vmem>>, vector<8x648xf32>
    tpu.vector_store %arg10[%c0_273, %c0_274], %330 {strides = array<i32>} : memref<8x648xf32, #tpu.memory_space<vmem>>, vector<8x648xf32>,
    return
  }
  func.func @transform_0(%arg0: i32) -> (i32, i32) {
    %c0_i32 = arith.constant 0 : i32
    %c0_i32_0 = arith.constant 0 : i32
    %c0_i32_1 = arith.constant 0 : i32
    return %c0_i32, %c0_i32_0 : i32, i32
  }
  func.func @transform_1(%arg0: i32) -> (i32, i32) {
    %c0_i32 = arith.constant 0 : i32
    %c0_i32_0 = arith.constant 0 : i32
    %c0_i32_1 = arith.constant 0 : i32
    return %c0_i32, %c0_i32_0 : i32, i32
  }
  func.func @transform_2(%arg0: i32) -> (i32, i32, i32) {
    %c0_i32 = arith.constant 0 : i32
    %c0_i32_0 = arith.constant 0 : i32
    %c0_i32_1 = arith.constant 0 : i32
    %c0_i32_2 = arith.constant 0 : i32
    return %c0_i32, %c0_i32_0, %c0_i32_1 : i32, i32, i32
  }
  func.func @transform_3(%arg0: i32) -> (i32, i32) {
    %c0_i32 = arith.constant 0 : i32
    %c0_i32_0 = arith.constant 0 : i32
    %c0_i32_1 = arith.constant 0 : i32
    return %c0_i32, %c0_i32_0 : i32, i32
  }
  func.func @transform_4(%arg0: i32) -> (i32, i32, i32) {
    %c0_i32 = arith.constant 0 : i32
    %c0_i32_0 = arith.constant 0 : i32
    %c0_i32_1 = arith.constant 0 : i32
    %c0_i32_2 = arith.constant 0 : i32
    return %c0_i32, %c0_i32_0, %c0_i32_1 : i32, i32, i32
  }
  func.func @transform_5(%arg0: i32) -> (i32, i32, i32) {
    %c0_i32 = arith.constant 0 : i32
    %c0_i32_0 = arith.constant 0 : i32
    %c0_i32_1 = arith.constant 0 : i32
    %c0_i32_2 = arith.constant 0 : i32
    return %c0_i32, %c0_i32_0, %c0_i32_1 : i32, i32, i32
  }
  func.func @transform_6(%arg0: i32) -> (i32, i32, i32) {
    %c0_i32 = arith.constant 0 : i32
    %c0_i32_0 = arith.constant 0 : i32
    %c0_i32_1 = arith.constant 0 : i32
    %c0_i32_2 = arith.constant 0 : i32
    return %c0_i32, %c0_i32_0, %c0_i32_1 : i32, i32, i32
  }
  func.func @transform_7(%arg0: i32) -> (i32, i32, i32) {
    %c0_i32 = arith.constant 0 : i32
    %c0_i32_0 = arith.constant 0 : i32
    %c0_i32_1 = arith.constant 0 : i32
    %c0_i32_2 = arith.constant 0 : i32
    return %c0_i32, %c0_i32_0, %c0_i32_1 : i32, i32, i32
  }
  func.func @transform_8(%arg0: i32) -> (i32, i32) {
    %c0_i32 = arith.constant 0 : i32
    %c0_i32_0 = arith.constant 0 : i32
    %c0_i32_1 = arith.constant 0 : i32
    return %c0_i32, %c0_i32_0 : i32, i32
  }
  func.func @transform_9(%arg0: i32) -> (i32, i32) {
    %c0_i32 = arith.constant 0 : i32
    %c0_i32_0 = arith.constant 0 : i32
    %c0_i32_1 = arith.constant 0 : i32
    return %c0_i32, %c0_i32_0 : i32, i32
  }
}

</mosaic_0001>

<bundles_post_ra>
// kernel: tile.8
= control target key start
LH: loop header
LB: loop body
LE: loop exit
PB: predicated region body
PF: predicated region fallthrough
CT: control target
= control target key end

     0   :  { %s46_s0 = inlined_call_operand.vmem [shape: f32[324], index: 0, kind: input, shape index: {}]   ;;  %s47_s1 = inlined_call_operand.vmem [shape: f32[2,324], index: 1, kind: output, shape index: {}]  }
   0x1   :  { %v4_v0 = vld [vmem:[%s46_s0] ss:$0 sm:$0xff]  ;;  %v14_v1 = vld [vmem:[%s46_s0 + $0x1] ss:$0 sm:$0xff]  ;;  %v16_v2 = vld [vmem:[%s46_s0 + $0x2] ss:$0 sm:$0xff] }
   0x2   :  { %5 = vst [vmem:[%s47_s1] sm:$0x3] %v4_v0  ;;  %15 = vst [vmem:[%s47_s1 + $0x2] sm:$0x3] %v14_v1 }
   0x3   :  { %17 = vst [vmem:[%s47_s1 + $0x4] sm:$0x3] %v16_v2 }

// kernel: tile.9
= control target key start
LH: loop header
LB: loop body
LE: loop exit
PB: predicated region body
PF: predicated region fallthrough
CT: control target
= control target key end

     0   :  { %vm30_vm0 = vcmask 1042434   ;;  %s20_s12 = smov 3  ;;  %vm32_vm1 = vcmask 490496   ;;  %vm17_vm2 = vcmask 556032   ;;  %s45_s13 = smov 3  ;;  %vm36_vm3 = vcmask 64512   ;;  %s140_s0 = inlined_call_operand.vmem [shape: f32[2,324], index: 0, kind: input, shape index: {}]   ;;  %s141_s1 = inlined_call_operand.vmem [shape: f32[1,648], index: 1, kind: output, shape index: {}]  }
   0x1   :  { %v92_v0 = vld [vmem:[%s140_s0 + $0x4] sm:$0x3]  ;;  %v93_v1 = vld [vmem:[%s140_s0 + $0x2] sm:$0x3]  ;;  %v13_v2 = vld [vmem:[%s140_s0] sm:$0x3] }
   0x2   :  { %8 = vst [vmem:[#allocation1 + $0x10] sm:$0x3] %v92_v0  ;;  %12 = vst [vmem:[#allocation1 + $0x8] sm:$0x3] %v93_v1  ;;  %s26_s0 = smov 3  ;;  %s100_s14 = smov 68  }
   0x3   :  { %14 = vst [vmem:[#allocation1] sm:$0x3] %v13_v2  ;;  %vm39_vm4 = vcmask 1048096  }
   0x9   :  { %v24_v3 = vld [vmem:[#allocation1 + $0x11] sm:$0x1]   ;;  %v29_v5 = vld [vmem:[#allocation1 + $0x7] sm:$0x4]   ;;  %v16_v8 = vld [vmem:[#allocation1 + $0x10] sm:$0x1]  }
   0xa   :  { %v27_v4 = vld [vmem:[#allocation1 + $0x11] ss:$-16 sm:%s26_s0]   ;;  %v21_v7 = vld [vmem:[#allocation1] ss:$8 sm:%s20_s12]   ;;  %19 = vst.msk [vmem:[#allocation0 + $0x10] sm:$0x1] %vm17_vm2, %v16_v8  }
   0xb   :  { %v31_v6 = vsel %vm30_vm0, %v29_v5, %v27_v4  ;;  %22 = vst [vmem:[#allocation0] ss:$8 sm:$0x3] %v21_v7   ;;  %v46_v10 = vld [vmem:[#allocation1 + $0x9] ss:$-8 sm:%s45_s13]  }
   0xc   :  { %v33_v9 = vsel %vm32_vm1, %v31_v6, %v24_v3 }
   0xd   :  { %34 = vrot.lane.b32.xlu0 %v33_v9, %s100_s14 }
  0x11   :  { %47 = vrot.lane.b32.xlu0 %v46_v10, %s100_s14 }
  0x12   :  { %v55_v11 = vld [vmem:[#allocation0] sm:$0x1]  ;;  %v59_v12 = vld [vmem:[#allocation0 + $0x8] sm:$0x1] }
  0x13   :  { %57 = vst [vmem:[%s141_s1] sm:$0x1] %v55_v11  ;;  %94 = vst [vmem:[%s141_s1 + $0x1] sm:$0x1] %v59_v12 }
  0x7f   :  { %v35_v13 = vpop.permute.xlu0 %34  }
  0x80   :  { %38 = vst.msk [vmem:[#allocation0 + $0x28] sm:$0x1] %vm36_vm3, %v35_v13  }
  0x81   :  { %41 = vst.msk [vmem:[#allocation0 + $0x20] ss:$-16 sm:$0x3] %vm39_vm4, %v35_v13   ;;  %43 = vst.msk [vmem:[#allocation0 + $0x16] sm:$0x4] %vm39_vm4, %v35_v13  }
  0x83   :  { %v48_v14 = vpop.permute.xlu0 %47  }
  0x84   :  { %51 = vst.msk [vmem:[#allocation0 + $0x20] ss:$-8 sm:$0x3] %vm17_vm2, %v48_v14  }
  0x87   :  { %v82_v16 = vld [vmem:[#allocation0 + $0x28] sm:$0x1] }
  0x88   :  { %v64_v15 = vld [vmem:[#allocation0 + $0x10] sm:$0x1]  ;;  %98 = vst [vmem:[%s141_s1 + $0x5] sm:$0x1] %v82_v16 }
  0x89   :  { %95 = vst [vmem:[%s141_s1 + $0x2] sm:$0x1] %v64_v15 }
  0x8b   :  { %v70_v17 = vld [vmem:[#allocation0 + $0x18] sm:$0x1]  ;;  %v76_v18 = vld [vmem:[#allocation0 + $0x20] sm:$0x1] }
  0x8c   :  { %96 = vst [vmem:[%s141_s1 + $0x3] sm:$0x1] %v70_v17  ;;  %97 = vst [vmem:[%s141_s1 + $0x4] sm:$0x1] %v76_v18 }

// kernel: residual_upsampling_forward.1
= control target key start
LH: loop header
LB: loop body
LE: loop exit
PB: predicated region body
PF: predicated region fallthrough
CT: control target
= control target key end

     0   :  { %v9787_v0 = vmov 0.0   ;;  %vm78_vm0 = vcmask 64512   ;;  %vm9788_vm1 = vmmov 0   ;;  %v9789_v9 = vmov 0   ;;  %s9790_s12 = smov 19   ;;  %s9792_s15 = smov 126   ;;  %s11899_s0 = inlined_call_operand.vmem [shape: f32[8,128], index: 0, kind: input, shape index: {}]   ;;  %s11900_s2 = inlined_call_operand.vmem [shape: f32[4,4,8], index: 2, kind: input, shape index: {}]   ;;  %s11901_s3 = inlined_call_operand.vmem [shape: f32[4,1], index: 3, kind: input, shape index: {}]   ;;  %s11902_s4 = inlined_call_operand.vmem [shape: bf16[4,128,648], index: 4, kind: input, shape index: {}]   ;;  %s11903_s1 = inlined_call_operand.vmem [shape: f32[4,648], index: 1, kind: input, shape index: {}]   ;;  %s11904_s7 = inlined_call_operand.vmem [shape: f32[4,8,1], index: 7, kind: input, shape index: {}]   ;;  %s11905_s5 = inlined_call_operand.vmem [shape: bf16[36,8,8], index: 5, kind: input, shape index: {}]   ;;  %s11906_s6 = inlined_call_operand.vmem [shape: f32[4,8,1], index: 6, kind: input, shape index: {}]   ;;  %s11907_s8 = inlined_call_operand.vmem [shape: f32[1,648], index: 8, kind: input, shape index: {}]   ;;  %s11908_s9 = inlined_call_operand.vmem [shape: f32[8,648], index: 9, kind: output, shape index: {}]  }
   0x1   :  { %9046 = vmatprep.subr.mxu0 %v9787_v0  ;;  %9051 = vmatprep.subr.mxu1 %v9787_v0  ;;  %v9854_v1 = vld [vmem:[%s11899_s0] sm:$0xff]  ;;  %v9502_v10 = vld [vmem:[%s11902_s4 + $0x1b0] ss:$24 sps:$4 sm:$0xff]   ;;  %v9504_v11 = vld [vmem:[%s11902_s4 + $0x1b4] ss:$24 sps:$4 sm:$0xff]   ;;  %vm66_vm2 = vcmask 154624  }
   0x2   :  { %v71_v2 = vld [vmem:[%s11900_s2] sm:$0xf]  ;;  %v8439_v3 = vld [vmem:[%s11900_s2 + $0x4] sm:$0xf]  ;;  %9047 = vmatpush3.msra.mxu0 %v9854_v1  ;;  %9048 = vmatprep.mubr.msk.f32.mxu0 %vm9788_vm1, %v9787_v0  ;;  %v9505_v12 = vld [vmem:[%s11902_s4 + $0x30] ss:$24 sps:$4 sm:$0xff]  }
   0x3   :  { %v72_v4 = vld [vmem:[%s11901_s3] sm:$0xf]  ;;  %9052 = vmatpush3.msra.mxu1 %v9854_v1  ;;  %9053 = vmatprep.mubr.msk.f32.mxu1 %vm9788_vm1, %v9787_v0  ;;  %v9498_v6 = vld [vmem:[%s11902_s4 + $0x184] ss:$24 sps:$4 sm:$0xff]   ;;  %v9507_v13 = vld [vmem:[%s11902_s4 + $0x34] ss:$24 sps:$4 sm:$0xff]  }
   0x4   :  { %v9496_v5 = vld [vmem:[%s11902_s4 + $0x180] ss:$24 sps:$4 sm:$0xff]   ;;  %9049 = vmatmul.mubr.msk.f32.vlgmr.msra.gmra.mrb[0].mxu0 %vm78_vm0, %v71_v2  ;;  %9054 = vmatmul.mubr.msk.f32.vlgmr.msra.gmra.mrb[0].mxu1 %vm78_vm0, %v8439_v3  ;;  %v9501_v8 = vld [vmem:[%s11902_s4 + $0x4] ss:$24 sps:$4 sm:$0xff]   ;;  %v9516_v18 = vld [vmem:[%s11902_s4 + $0x214] ss:$24 sps:$4 sm:$0xff]  }
   0x5   :  { %v9499_v7 = vld [vmem:[%s11902_s4] ss:$24 sps:$4 sm:$0xff]   ;;  %9494 = vset.pattern.permute.xlu0 %v9789_v9  ;;  %566 = vmatprep.subr.bf16.mxu1 %v9498_v6  ;;  %v9510_v14 = vld [vmem:[%s11902_s4 + $0x1e4] ss:$24 sps:$4 sm:$0xff]   ;;  %v9519_v19 = vld [vmem:[%s11902_s4 + $0x94] ss:$24 sps:$4 sm:$0xff]  }
   0x6   :  { %75 = vperm.xlu0 %9494, %v72_v4   ;;  %929 = vmatprep.subr.bf16.mxu0 %v9501_v8  ;;  %v9513_v15 = vld [vmem:[%s11902_s4 + $0x64] ss:$24 sps:$4 sm:$0xff]   ;;  %v9508_v16 = vld [vmem:[%s11902_s4 + $0x1e0] ss:$24 sps:$4 sm:$0xff]   ;;  %v9514_v20 = vld [vmem:[%s11902_s4 + $0x210] ss:$24 sps:$4 sm:$0xff]  }
   0x7   :  { %567 = vmatpush1.bf16.msra.mxu1 %v9496_v5  ;;  %930 = vmatpush1.bf16.msra.mxu0 %v9499_v7  ;;  %v9511_v17 = vld [vmem:[%s11902_s4 + $0x60] ss:$24 sps:$4 sm:$0xff]   ;;  %v9517_v21 = vld [vmem:[%s11902_s4 + $0x90] ss:$24 sps:$4 sm:$0xff]   ;;  %v9522_v22 = vld [vmem:[%s11902_s4 + $0x244] ss:$24 sps:$4 sm:$0xff]  }
   0x8   :  { %568 = vmatprep.subr.bf16.mxu1 %v9504_v11  ;;  %598 = vmatprep.mubr.bf16.mxu1 %v9789_v9  ;;  %v9525_v23 = vld [vmem:[%s11902_s4 + $0xc4] ss:$24 sps:$4 sm:$0xff]   ;;  %v9520_v24 = vld [vmem:[%s11902_s4 + $0x240] ss:$24 sps:$4 sm:$0xff]   ;;  %v9528_v26 = vld [vmem:[%s11902_s4 + $0x274] ss:$24 sps:$4 sm:$0xff]  }
   0x9   :  { %931 = vmatprep.subr.bf16.mxu0 %v9507_v13  ;;  %961 = vmatprep.mubr.bf16.mxu0 %v9789_v9  ;;  %v9523_v25 = vld [vmem:[%s11902_s4 + $0xc0] ss:$24 sps:$4 sm:$0xff]   ;;  %v9531_v27 = vld [vmem:[%s11902_s4 + $0xf4] ss:$24 sps:$4 sm:$0xff]   ;;  %v9526_v28 = vld [vmem:[%s11902_s4 + $0x270] ss:$24 sps:$4 sm:$0xff]  }
   0xa   :  { %9495 = vset.pattern.permute.xlu1 %v9789_v9  ;;  %v9529_v29 = vld [vmem:[%s11902_s4 + $0xf0] ss:$24 sps:$4 sm:$0xff]   ;;  %v9534_v30 = vld [vmem:[%s11902_s4 + $0x2a4] ss:$24 sps:$4 sm:$0xff]   ;;  %v9532_v32 = vld [vmem:[%s11902_s4 + $0x2a0] ss:$24 sps:$4 sm:$0xff]  }
   0xb   :  { %569 = vmatpush1.bf16.msra.mxu1 %v9502_v10  ;;  %932 = vmatpush1.bf16.msra.mxu0 %v9505_v12  ;;  %v9537_v31 = vld [vmem:[%s11902_s4 + $0x124] ss:$24 sps:$4 sm:$0xff]   ;;  %v9535_v33 = vld [vmem:[%s11902_s4 + $0x120] ss:$24 sps:$4 sm:$0xff]   ;;  %v9540_v34 = vld [vmem:[%s11902_s4 + $0x2d4] ss:$24 sps:$4 sm:$0xff]  }
   0xc   :  { %570 = vmatprep.subr.bf16.mxu1 %v9510_v14  ;;  %933 = vmatprep.subr.bf16.mxu0 %v9513_v15  ;;  %v9543_v35 = vld [vmem:[%s11902_s4 + $0x154] ss:$24 sps:$4 sm:$0xff]   ;;  %v9538_v36 = vld [vmem:[%s11902_s4 + $0x2d0] ss:$24 sps:$4 sm:$0xff]   ;;  %v9555_v52 = vld [vmem:[%s11902_s4 + $0x44] ss:$24 sps:$4 sm:$0xff]  }
   0xd   :  { %v9541_v37 = vld [vmem:[%s11902_s4 + $0x150] ss:$24 sps:$4 sm:$0xff]   ;;  %v9546_v38 = vld [vmem:[%s11902_s4 + $0x18c] ss:$24 sps:$4 sm:$0xff]   ;;  %v9552_v51 = vld [vmem:[%s11902_s4 + $0x1bc] ss:$24 sps:$4 sm:$0xff]  }
   0xe   :  { %v9549_v39 = vld [vmem:[%s11902_s4 + $0x14] ss:$24 sps:$4 sm:$0xff]   ;;  %v9544_v47 = vld [vmem:[%s11902_s4 + $0x188] ss:$24 sps:$4 sm:$0xff]   ;;  %v9550_v53 = vld [vmem:[%s11902_s4 + $0x1b8] ss:$24 sps:$4 sm:$0xff]  }
   0xf   :  { %571 = vmatpush1.bf16.msra.mxu1 %v9508_v16  ;;  %934 = vmatpush1.bf16.msra.mxu0 %v9511_v17  ;;  %v9547_v48 = vld [vmem:[%s11902_s4 + $0x10] ss:$24 sps:$4 sm:$0xff]   ;;  %v9553_v54 = vld [vmem:[%s11902_s4 + $0x40] ss:$24 sps:$4 sm:$0xff]   ;;  %v9558_v55 = vld [vmem:[%s11902_s4 + $0x1ec] ss:$24 sps:$4 sm:$0xff]  }
  0x10   :  { %572 = vmatprep.subr.bf16.mxu1 %v9516_v18  ;;  %935 = vmatprep.subr.bf16.mxu0 %v9519_v19  ;;  %v9561_v56 = vld [vmem:[%s11902_s4 + $0x74] ss:$24 sps:$4 sm:$0xff]   ;;  %v9556_v57 = vld [vmem:[%s11902_s4 + $0x1e8] ss:$24 sps:$4 sm:$0xff]   ;;  %v9567_v60 = vld [vmem:[%s11902_s4 + $0xa4] ss:$24 sps:$4 sm:$0xff]  }
  0x11   :  { %v9559_v58 = vld [vmem:[%s11902_s4 + $0x70] ss:$24 sps:$4 sm:$0xff]   ;;  %v9564_v59 = vld [vmem:[%s11902_s4 + $0x21c] ss:$24 sps:$4 sm:$0xff]   ;;  %v9565_v62 = vld [vmem:[%s11902_s4 + $0xa0] ss:$24 sps:$4 sm:$0xff]  }
  0x12   :  { %v9562_v61 = vld [vmem:[%s11902_s4 + $0x218] ss:$24 sps:$4 sm:$0xff]   ;;  %v9570_v63 = vld [vmem:[%s11902_s4 + $0x24c] ss:$24 sps:$4 sm:$0xff]   ;;  %v9568_v3 = vld [vmem:[%s11902_s4 + $0x248] ss:$24 sps:$4 sm:$0xff]  }
  0x13   :  { %573 = vmatpush1.bf16.msra.mxu1 %v9514_v20  ;;  %936 = vmatpush1.bf16.msra.mxu0 %v9517_v21  ;;  %v9573_v2 = vld [vmem:[%s11902_s4 + $0xd4] ss:$24 sps:$4 sm:$0xff]   ;;  %v9571_v4 = vld [vmem:[%s11902_s4 + $0xd0] ss:$24 sps:$4 sm:$0xff]   ;;  %v9579_v6 = vld [vmem:[%s11902_s4 + $0x104] ss:$24 sps:$4 sm:$0xff]  }
  0x14   :  { %574 = vmatprep.subr.bf16.mxu1 %v9522_v22  ;;  %937 = vmatprep.subr.bf16.mxu0 %v9525_v23  ;;  %v9576_v5 = vld [vmem:[%s11902_s4 + $0x27c] ss:$24 sps:$4 sm:$0xff]   ;;  %v9574_v7 = vld [vmem:[%s11902_s4 + $0x278] ss:$24 sps:$4 sm:$0xff]   ;;  %v9582_v10 = vld [vmem:[%s11902_s4 + $0x2ac] ss:$24 sps:$4 sm:$0xff]  }
  0x15   :  { %v9577_v8 = vld [vmem:[%s11902_s4 + $0x100] ss:$24 sps:$4 sm:$0xff]   ;;  %v9585_v11 = vld [vmem:[%s11902_s4 + $0x134] ss:$24 sps:$4 sm:$0xff]   ;;  %v9583_v13 = vld [vmem:[%s11902_s4 + $0x130] ss:$24 sps:$4 sm:$0xff]  }
  0x16   :  { %v9580_v12 = vld [vmem:[%s11902_s4 + $0x2a8] ss:$24 sps:$4 sm:$0xff]   ;;  %v9588_v14 = vld [vmem:[%s11902_s4 + $0x2dc] ss:$24 sps:$4 sm:$0xff]   ;;  %v9586_v16 = vld [vmem:[%s11902_s4 + $0x2d8] ss:$24 sps:$4 sm:$0xff]  }
  0x17   :  { %575 = vmatpush1.bf16.msra.mxu1 %v9520_v24  ;;  %938 = vmatpush1.bf16.msra.mxu0 %v9523_v25  ;;  %v9591_v15 = vld [vmem:[%s11902_s4 + $0x164] ss:$24 sps:$4 sm:$0xff]   ;;  %v9589_v17 = vld [vmem:[%s11902_s4 + $0x160] ss:$24 sps:$4 sm:$0xff]   ;;  %v9594_v18 = vld [vmem:[%s11902_s4 + $0x194] ss:$24 sps:$4 sm:$0xff]  }
  0x18   :  { %576 = vmatprep.subr.bf16.mxu1 %v9528_v26  ;;  %939 = vmatprep.subr.bf16.mxu0 %v9531_v27  ;;  %v9592_v19 = vld [vmem:[%s11902_s4 + $0x190] ss:$24 sps:$4 sm:$0xff]   ;;  %v9597_v20 = vld [vmem:[%s11902_s4 + $0x1c4] ss:$24 sps:$4 sm:$0xff]   ;;  %v9595_v21 = vld [vmem:[%s11902_s4 + $0x1c0] ss:$24 sps:$4 sm:$0xff]  }
  0x19   :  { %v9600_v22 = vld [vmem:[%s11902_s4 + $0x1f4] ss:$24 sps:$4 sm:$0xff]   ;;  %v9598_v23 = vld [vmem:[%s11902_s4 + $0x1f0] ss:$24 sps:$4 sm:$0xff]   ;;  %v9603_v25 = vld [vmem:[%s11902_s4 + $0x224] ss:$24 sps:$4 sm:$0xff]  }
  0x1a   :  { %v8585_v24 = vld [vmem:[%s11900_s2 + $0x8] sm:$0xf]  ;;  %v9601_v26 = vld [vmem:[%s11902_s4 + $0x220] ss:$24 sps:$4 sm:$0xff]   ;;  %v9606_v27 = vld [vmem:[%s11902_s4 + $0x254] ss:$24 sps:$4 sm:$0xff]  }
  0x1b   :  { %577 = vmatpush1.bf16.msra.mxu1 %v9526_v28  ;;  %940 = vmatpush1.bf16.msra.mxu0 %v9529_v29  ;;  %v9604_v28 = vld [vmem:[%s11902_s4 + $0x250] ss:$24 sps:$4 sm:$0xff]   ;;  %v9609_v29 = vld [vmem:[%s11902_s4 + $0x284] ss:$24 sps:$4 sm:$0xff]   ;;  %67 = vst.msk [vmem:[#allocation2] sm:$0xff] %vm66_vm2, %v9787_v0  ;;  %vm2070_vm3 = vcmask 1043456  }
  0x1c   :  { %578 = vmatprep.subr.bf16.mxu1 %v9534_v30  ;;  %941 = vmatprep.subr.bf16.mxu0 %v9537_v31  ;;  %v9607_v30 = vld [vmem:[%s11902_s4 + $0x280] ss:$24 sps:$4 sm:$0xff]   ;;  %v9612_v31 = vld [vmem:[%s11902_s4 + $0x2b4] ss:$24 sps:$4 sm:$0xff]   ;;  %vm68_vm4 = vcmask 376024   ;;  %vm2106_vm5 = vcmask 1047704  }
  0x1d   :  { %69 = vst.msk [vmem:[#allocation2 + $0x28] sm:$0xff] %vm68_vm4, %v9787_v0  ;;  %vm2112_vm6 = vcmask 220160   ;;  %s9793_s16 = smov 110   ;;  %s9794_s0 = smov 109   ;;  %vm2147_vm7 = vcmask 1039360   ;;  %vm2455_vm8 = vcmask 1031168  }
  0x1e   :  { %s9795_s17 = smov 108   ;;  %s9796_s18 = smov 92   ;;  %vm2625_vm9 = vcmask 900096   ;;  %vm2795_vm10 = vcmask 891904   ;;  %vm2965_vm11 = vcmask 883712   ;;  %vm11914_vm12 = vcmask 752640  }
  0x1f   :  { %579 = vmatpush1.bf16.msra.mxu1 %v9532_v32  ;;  %942 = vmatpush1.bf16.msra.mxu0 %v9535_v33  ;;  %v9610_v32 = vld [vmem:[%s11902_s4 + $0x2b0] ss:$24 sps:$4 sm:$0xff]   ;;  %v9615_v33 = vld [vmem:[%s11902_s4 + $0x2e4] ss:$24 sps:$4 sm:$0xff]   ;;  %s9797_s19 = smov 91   ;;  %s9798_s20 = smov 90  }
  0x20   :  { %580 = vmatprep.subr.bf16.mxu1 %v9540_v34  ;;  %943 = vmatprep.subr.bf16.mxu0 %v9543_v35  ;;  %v9613_v34 = vld [vmem:[%s11902_s4 + $0x2e0] ss:$24 sps:$4 sm:$0xff]   ;;  %v9618_v35 = vld [vmem:[%s11902_s4 + $0xc] ss:$24 sps:$4 sm:$0xff]   ;;  %vm11913_vm13 = vcmask 744448   ;;  %vm11912_vm14 = vcmask 736256  }
  0x23   :  { %581 = vmatpush1.bf16.msra.mxu1 %v9538_v36  ;;  %944 = vmatpush1.bf16.msra.mxu0 %v9541_v37  ;;  %v9616_v36 = vld [vmem:[%s11902_s4 + $0x8] ss:$24 sps:$4 sm:$0xff]   ;;  %v9621_v37 = vld [vmem:[%s11902_s4 + $0x3c] ss:$24 sps:$4 sm:$0xff]  }
  0x24   :  { %607 = vmatprep.subr.bf16.mxu1 %v9546_v38  ;;  %1011 = vmatprep.subr.bf16.mxu0 %v9549_v39  ;;  %v9619_v38 = vld [vmem:[%s11902_s4 + $0x38] ss:$24 sps:$4 sm:$0xff]   ;;  %v9624_v39 = vld [vmem:[%s11902_s4 + $0x6c] ss:$24 sps:$4 sm:$0xff]  }
  0x85   :  { %v9979_v40 = vpop.permute.xlu0 %75 }
  0xd7   :  { %v148_v41 = vpop.f32.mrb[0].mxu0  ;;  %v272_v42 = vpop.f32.mrb[0].mxu1 }
  0xd8   :  { %v149_v43 = vadd.f32 %v148_v41, %v9979_v40  ;;  %v273_v44 = vadd.f32 %v272_v42, %v9979_v40  ;;  %v9050_v45 = vpop.f32.mrb[1].mxu0  ;;  %v9055_v46 = vpop.f32.mrb[1].mxu1  ;;  %v9622_v41 = vld [vmem:[%s11902_s4 + $0x68] ss:$24 sps:$4 sm:$0xff]   ;;  %v9627_v42 = vld [vmem:[%s11902_s4 + $0x9c] ss:$24 sps:$4 sm:$0xff]  }
  0xd9   :  { %v9628_v45 = vld [vmem:[%s11902_s4 + $0xc8] ss:$24 sps:$4 sm:$0xff]   ;;  %v9633_v46 = vld [vmem:[%s11902_s4 + $0xfc] ss:$24 sps:$4 sm:$0xff]  }
  0xda   :  { %v9989_v49 = vpack.c.bf16 %v149_v43, %v149_v43  ;;  %v9991_v50 = vpack.c.bf16 %v273_v44, %v273_v44  ;;  %v9625_v43 = vld [vmem:[%s11902_s4 + $0x98] ss:$24 sps:$4 sm:$0xff]   ;;  %v9630_v44 = vld [vmem:[%s11902_s4 + $0xcc] ss:$24 sps:$4 sm:$0xff]  }
  0xdc   :  { %599 = vmatmul.mubr.bf16.vlgmr.msra.gmra.mrb[4].mxu1 %v9991_v50  ;;  %962 = vmatmul.mubr.bf16.vlgmr.msra.gmra.mrb[4].mxu0 %v9989_v49 }
  0xdd   :  { %608 = vmatpush1.bf16.msra.mxu1 %v9544_v47  ;;  %1012 = vmatpush1.bf16.msra.mxu0 %v9547_v48  ;;  %v9631_v47 = vld [vmem:[%s11902_s4 + $0xf8] ss:$24 sps:$4 sm:$0xff]   ;;  %v9636_v48 = vld [vmem:[%s11902_s4 + $0x12c] ss:$24 sps:$4 sm:$0xff]  }
  0xde   :  { %609 = vmatprep.subr.bf16.mxu1 %v9552_v51  ;;  %1013 = vmatprep.subr.bf16.mxu0 %v9555_v52  ;;  %v9639_v51 = vld [vmem:[%s11902_s4 + $0x15c] ss:$24 sps:$4 sm:$0xff]   ;;  %v9640_v52 = vld [vmem:[%s11902_s4 + $0x300] ss:$24 sps:$4 sm:$0xff]  }
  0xdf   :  { %639 = vmatprep.mubr.bf16.mxu1 %v9789_v9  ;;  %1043 = vmatprep.mubr.bf16.mxu0 %v9789_v9 }
  0xe1   :  { %610 = vmatpush1.bf16.msra.mxu1 %v9550_v53  ;;  %1014 = vmatpush1.bf16.msra.mxu0 %v9553_v54  ;;  %v9642_v53 = vld [vmem:[%s11902_s4 + $0x304] ss:$24 sps:$4 sm:$0xff]   ;;  %v9648_v54 = vld [vmem:[%s11902_s4 + $0x334] ss:$24 sps:$4 sm:$0xff]  }
  0xe2   :  { %611 = vmatprep.subr.bf16.mxu1 %v9558_v55  ;;  %1015 = vmatprep.subr.bf16.mxu0 %v9561_v56  ;;  %v9637_v55 = vld [vmem:[%s11902_s4 + $0x158] ss:$24 sps:$4 sm:$0xff]  }
  0xe3   :  { %v9646_v56 = vld [vmem:[%s11902_s4 + $0x330] ss:$24 sps:$4 sm:$0xff]  }
  0xe5   :  { %612 = vmatpush1.bf16.msra.mxu1 %v9556_v57  ;;  %1016 = vmatpush1.bf16.msra.mxu0 %v9559_v58  ;;  %v9645_v57 = vld [vmem:[%s11902_s4 + $0x30c] ss:$24 sps:$4 sm:$0xff]  }
  0xe6   :  { %613 = vmatprep.subr.bf16.mxu1 %v9564_v59  ;;  %1017 = vmatprep.subr.bf16.mxu0 %v9567_v60  ;;  %v9654_v58 = vld [vmem:[%s11902_s4 + $0x364] ss:$24 sps:$4 sm:$0xff]   ;;  %v9643_v59 = vld [vmem:[%s11902_s4 + $0x308] ss:$24 sps:$4 sm:$0xff]  }
  0xe7   :  { %v9652_v60 = vld [vmem:[%s11902_s4 + $0x360] ss:$24 sps:$4 sm:$0xff]  }
  0xe9   :  { %614 = vmatpush1.bf16.msra.mxu1 %v9562_v61  ;;  %1018 = vmatpush1.bf16.msra.mxu0 %v9565_v62  ;;  %v9651_v61 = vld [vmem:[%s11902_s4 + $0x33c] ss:$24 sps:$4 sm:$0xff]  }
  0xea   :  { %615 = vmatprep.subr.bf16.mxu1 %v9570_v63  ;;  %1019 = vmatprep.subr.bf16.mxu0 %v9573_v2  ;;  %v9660_v62 = vld [vmem:[%s11902_s4 + $0x394] ss:$24 sps:$4 sm:$0xff]   ;;  %v9649_v63 = vld [vmem:[%s11902_s4 + $0x338] ss:$24 sps:$4 sm:$0xff]  }
  0xeb   :  { %v9658_v2 = vld [vmem:[%s11902_s4 + $0x390] ss:$24 sps:$4 sm:$0xff]  }
  0xed   :  { %616 = vmatpush1.bf16.msra.mxu1 %v9568_v3  ;;  %1020 = vmatpush1.bf16.msra.mxu0 %v9571_v4  ;;  %v9657_v3 = vld [vmem:[%s11902_s4 + $0x36c] ss:$24 sps:$4 sm:$0xff]   ;;  %v9655_v4 = vld [vmem:[%s11902_s4 + $0x368] ss:$24 sps:$4 sm:$0xff]  }
  0xee   :  { %617 = vmatprep.subr.bf16.mxu1 %v9576_v5  ;;  %1021 = vmatprep.subr.bf16.mxu0 %v9579_v6  ;;  %v9664_v5 = vld [vmem:[%s11902_s4 + $0x3c0] ss:$24 sps:$4 sm:$0xff]   ;;  %v9663_v6 = vld [vmem:[%s11902_s4 + $0x39c] ss:$24 sps:$4 sm:$0xff]  }
  0xf1   :  { %618 = vmatpush1.bf16.msra.mxu1 %v9574_v7  ;;  %1022 = vmatpush1.bf16.msra.mxu0 %v9577_v8  ;;  %v9672_v7 = vld [vmem:[%s11902_s4 + $0x3f4] ss:$24 sps:$4 sm:$0xff]   ;;  %v9661_v8 = vld [vmem:[%s11902_s4 + $0x398] ss:$24 sps:$4 sm:$0xff]  }
  0xf2   :  { %619 = vmatprep.subr.bf16.mxu1 %v9582_v10  ;;  %1023 = vmatprep.subr.bf16.mxu0 %v9585_v11  ;;  %v9670_v10 = vld [vmem:[%s11902_s4 + $0x3f0] ss:$24 sps:$4 sm:$0xff]   ;;  %v9669_v11 = vld [vmem:[%s11902_s4 + $0x3cc] ss:$24 sps:$4 sm:$0xff]  }
  0xf5   :  { %620 = vmatpush1.bf16.msra.mxu1 %v9580_v12  ;;  %1024 = vmatpush1.bf16.msra.mxu0 %v9583_v13  ;;  %v9678_v12 = vld [vmem:[%s11902_s4 + $0x424] ss:$24 sps:$4 sm:$0xff]   ;;  %v9667_v13 = vld [vmem:[%s11902_s4 + $0x3c8] ss:$24 sps:$4 sm:$0xff]  }
  0xf6   :  { %621 = vmatprep.subr.bf16.mxu1 %v9588_v14  ;;  %1025 = vmatprep.subr.bf16.mxu0 %v9591_v15  ;;  %v9676_v14 = vld [vmem:[%s11902_s4 + $0x420] ss:$24 sps:$4 sm:$0xff]   ;;  %v9675_v15 = vld [vmem:[%s11902_s4 + $0x3fc] ss:$24 sps:$4 sm:$0xff]  }
  0xf9   :  { %622 = vmatpush1.bf16.msra.mxu1 %v9586_v16  ;;  %1026 = vmatpush1.bf16.msra.mxu0 %v9589_v17  ;;  %v9673_v16 = vld [vmem:[%s11902_s4 + $0x3f8] ss:$24 sps:$4 sm:$0xff]   ;;  %v9681_v17 = vld [vmem:[%s11902_s4 + $0x42c] ss:$24 sps:$4 sm:$0xff]  }
  0xfa   :  { %648 = vmatprep.subr.bf16.mxu1 %v9594_v18  ;;  %9056 = vmatprep.subr.mxu0 %v9787_v0  ;;  %v9679_v18 = vld [vmem:[%s11902_s4 + $0x428] ss:$24 sps:$4 sm:$0xff]  }
  0xfc   :  { %640 = vmatmul.mubr.bf16.vlgmr.msra.gmra.mrb[8].mxu1 %v9991_v50  ;;  %1044 = vmatmul.mubr.bf16.vlgmr.msra.gmra.mrb[8].mxu0 %v9989_v49 }
  0xfd   :  { %649 = vmatpush1.bf16.msra.mxu1 %v9592_v19  ;;  %9057 = vmatpush3.msra.mxu0 %v9854_v1  ;;  %v9684_v19 = vld [vmem:[%s11902_s4 + $0x454] ss:$24 sps:$4 sm:$0xff]  }
  0xfe   :  { %650 = vmatprep.subr.bf16.mxu1 %v9597_v20  ;;  %9058 = vmatprep.mubr.msk.f32.mxu0 %vm9788_vm1, %v9787_v0  ;;  %v9682_v20 = vld [vmem:[%s11902_s4 + $0x450] ss:$24 sps:$4 sm:$0xff]  }
  0xff   :  { %680 = vmatprep.mubr.bf16.mxu1 %v9789_v9  ;;  %1417 = vmatprep.subr.bf16.mxu0 %v9642_v53  ;;  %v9708_v53 = vld [vmem:[%s11902_s4 + $0x434] ss:$24 sps:$4 sm:$0xff]  }
 0x101   :  { %651 = vmatpush1.bf16.msra.mxu1 %v9595_v21  ;;  %v9687_v21 = vld [vmem:[%s11902_s4 + $0x45c] ss:$24 sps:$4 sm:$0xff]  }
 0x102   :  { %652 = vmatprep.subr.bf16.mxu1 %v9600_v22  ;;  %v9685_v22 = vld [vmem:[%s11902_s4 + $0x458] ss:$24 sps:$4 sm:$0xff]  }
 0x104   :  { %9059 = vmatmul.mubr.msk.f32.vlgmr.msra.gmra.mrb[2].mxu0 %vm78_vm0, %v8585_v24 }
 0x105   :  { %653 = vmatpush1.bf16.msra.mxu1 %v9598_v23  ;;  %1449 = vmatprep.mubr.bf16.mxu0 %v9789_v9  ;;  %v9690_v23 = vld [vmem:[%s11902_s4 + $0x314] ss:$24 sps:$4 sm:$0xff]  }
 0x106   :  { %654 = vmatprep.subr.bf16.mxu1 %v9603_v25  ;;  %1418 = vmatpush1.bf16.msra.mxu0 %v9640_v52  ;;  %v9733_v52 = vld [vmem:[%s11902_s4 + $0x518] ss:$24 sps:$4 sm:$0xff]  }
 0x107   :  { %1419 = vmatprep.subr.bf16.mxu0 %v9648_v54  ;;  %v9741_v54 = vld [vmem:[%s11902_s4 + $0x54c] ss:$24 sps:$4 sm:$0xff]  }
 0x109   :  { %655 = vmatpush1.bf16.msra.mxu1 %v9601_v26 }
 0x10a   :  { %656 = vmatprep.subr.bf16.mxu1 %v9606_v27  ;;  %1420 = vmatpush1.bf16.msra.mxu0 %v9646_v56 }
 0x10b   :  { %1421 = vmatprep.subr.bf16.mxu0 %v9654_v58  ;;  %v9706_v58 = vld [vmem:[%s11902_s4 + $0x430] ss:$24 sps:$4 sm:$0xff]  }
 0x10d   :  { %657 = vmatpush1.bf16.msra.mxu1 %v9604_v28 }
 0x10e   :  { %658 = vmatprep.subr.bf16.mxu1 %v9609_v29  ;;  %1422 = vmatpush1.bf16.msra.mxu0 %v9652_v60 }
 0x10f   :  { %1423 = vmatprep.subr.bf16.mxu0 %v9660_v62  ;;  %v9747_v62 = vld [vmem:[%s11902_s4 + $0x57c] ss:$24 sps:$4 sm:$0xff]  }
 0x111   :  { %659 = vmatpush1.bf16.msra.mxu1 %v9607_v30 }
 0x112   :  { %660 = vmatprep.subr.bf16.mxu1 %v9612_v31  ;;  %1424 = vmatpush1.bf16.msra.mxu0 %v9658_v2  ;;  %v9688_v31 = vld [vmem:[%s11902_s4 + $0x310] ss:$24 sps:$4 sm:$0xff]  }
 0x113   :  { %v9745_v2 = vld [vmem:[%s11902_s4 + $0x578] ss:$24 sps:$4 sm:$0xff]  }
 0x115   :  { %661 = vmatpush1.bf16.msra.mxu1 %v9610_v32 }
 0x116   :  { %662 = vmatprep.subr.bf16.mxu1 %v9615_v33  ;;  %v9693_v33 = vld [vmem:[%s11902_s4 + $0x344] ss:$24 sps:$4 sm:$0xff]  }
 0x119   :  { %663 = vmatpush1.bf16.msra.mxu1 %v9613_v34  ;;  %v9717_v34 = vld [vmem:[%s11902_s4 + $0x48c] ss:$24 sps:$4 sm:$0xff]  }
 0x11a   :  { %970 = vmatprep.subr.bf16.mxu1 %v9618_v35  ;;  %v9691_v35 = vld [vmem:[%s11902_s4 + $0x340] ss:$24 sps:$4 sm:$0xff]  }
 0x11c   :  { %681 = vmatmul.mubr.bf16.vlgmr.msra.gmra.mrb[12].mxu1 %v9991_v50  ;;  %v9634_v50 = vld [vmem:[%s11902_s4 + $0x128] ss:$24 sps:$4 sm:$0xff]  }
 0x11d   :  { %971 = vmatpush1.bf16.msra.mxu1 %v9616_v36  ;;  %1002 = vmatprep.mubr.bf16.mxu1 %v9789_v9  ;;  %v9696_v36 = vld [vmem:[%s11902_s4 + $0x374] ss:$24 sps:$4 sm:$0xff]  }
 0x11e   :  { %972 = vmatprep.subr.bf16.mxu1 %v9621_v37  ;;  %v9694_v37 = vld [vmem:[%s11902_s4 + $0x370] ss:$24 sps:$4 sm:$0xff]  }
 0x121   :  { %973 = vmatpush1.bf16.msra.mxu1 %v9619_v38  ;;  %v9715_v38 = vld [vmem:[%s11902_s4 + $0x488] ss:$24 sps:$4 sm:$0xff]  }
 0x122   :  { %974 = vmatprep.subr.bf16.mxu1 %v9624_v39  ;;  %v9699_v39 = vld [vmem:[%s11902_s4 + $0x3a4] ss:$24 sps:$4 sm:$0xff]  }
 0x125   :  { %975 = vmatpush1.bf16.msra.mxu1 %v9622_v41  ;;  %v9723_v41 = vld [vmem:[%s11902_s4 + $0x4bc] ss:$24 sps:$4 sm:$0xff]  }
 0x126   :  { %976 = vmatprep.subr.bf16.mxu1 %v9627_v42  ;;  %v9697_v42 = vld [vmem:[%s11902_s4 + $0x3a0] ss:$24 sps:$4 sm:$0xff]  }
 0x129   :  { %977 = vmatpush1.bf16.msra.mxu1 %v9625_v43  ;;  %v9721_v43 = vld [vmem:[%s11902_s4 + $0x4b8] ss:$24 sps:$4 sm:$0xff]  }
 0x12a   :  { %978 = vmatprep.subr.bf16.mxu1 %v9630_v44  ;;  %v9702_v44 = vld [vmem:[%s11902_s4 + $0x3d4] ss:$24 sps:$4 sm:$0xff]  }
 0x12d   :  { %979 = vmatpush1.bf16.msra.mxu1 %v9628_v45  ;;  %v9729_v45 = vld [vmem:[%s11902_s4 + $0x4ec] ss:$24 sps:$4 sm:$0xff]  }
 0x12e   :  { %980 = vmatprep.subr.bf16.mxu1 %v9633_v46  ;;  %v9700_v46 = vld [vmem:[%s11902_s4 + $0x3d0] ss:$24 sps:$4 sm:$0xff]  }
 0x131   :  { %981 = vmatpush1.bf16.msra.mxu1 %v9631_v47  ;;  %v9727_v47 = vld [vmem:[%s11902_s4 + $0x4e8] ss:$24 sps:$4 sm:$0xff]  }
 0x132   :  { %982 = vmatprep.subr.bf16.mxu1 %v9636_v48  ;;  %v9705_v48 = vld [vmem:[%s11902_s4 + $0x404] ss:$24 sps:$4 sm:$0xff]  }
 0x135   :  { %983 = vmatpush1.bf16.msra.mxu1 %v9634_v50  ;;  %v9735_v50 = vld [vmem:[%s11902_s4 + $0x51c] ss:$24 sps:$4 sm:$0xff]  }
 0x136   :  { %984 = vmatprep.subr.bf16.mxu1 %v9639_v51  ;;  %v9703_v51 = vld [vmem:[%s11902_s4 + $0x400] ss:$24 sps:$4 sm:$0xff]  }
 0x139   :  { %985 = vmatpush1.bf16.msra.mxu1 %v9637_v55 }
 0x13a   :  { %1458 = vmatprep.subr.bf16.mxu1 %v9645_v57 }
 0x13c   :  { %1003 = vmatmul.mubr.bf16.vlgmr.msra.gmra.mrb[8].mxu1 %v9989_v49  ;;  %v9666_v49 = vld [vmem:[%s11902_s4 + $0x3c4] ss:$24 sps:$4 sm:$0xff]  }
 0x13d   :  { %1459 = vmatpush1.bf16.msra.mxu1 %v9643_v59  ;;  %1490 = vmatprep.mubr.bf16.mxu1 %v9789_v9  ;;  %v9739_v59 = vld [vmem:[%s11902_s4 + $0x548] ss:$24 sps:$4 sm:$0xff]  }
 0x13e   :  { %1460 = vmatprep.subr.bf16.mxu1 %v9651_v61  ;;  %1425 = vmatprep.subr.bf16.mxu0 %v9666_v49  ;;  %v9711_v61 = vld [vmem:[%s11902_s4 + $0x464] ss:$24 sps:$4 sm:$0xff]  }
 0x13f   :  { %1426 = vmatpush1.bf16.msra.mxu0 %v9664_v5  ;;  %v9753_v49 = vld [vmem:[%s11902_s4 + $0x5ac] ss:$24 sps:$4 sm:$0xff]   ;;  %v9751_v5 = vld [vmem:[%s11902_s4 + $0x5a8] ss:$24 sps:$4 sm:$0xff]  }
 0x140   :  { %1427 = vmatprep.subr.bf16.mxu0 %v9672_v7  ;;  %v9718_v7 = vld [vmem:[%s11902_s4 + $0x4b0] ss:$24 sps:$4 sm:$0xff]  }
 0x141   :  { %1461 = vmatpush1.bf16.msra.mxu1 %v9649_v63  ;;  %v9709_v63 = vld [vmem:[%s11902_s4 + $0x460] ss:$24 sps:$4 sm:$0xff]  }
 0x142   :  { %1462 = vmatprep.subr.bf16.mxu1 %v9657_v3  ;;  %v9714_v3 = vld [vmem:[%s11902_s4 + $0x484] ss:$24 sps:$4 sm:$0xff]  }
 0x143   :  { %1428 = vmatpush1.bf16.msra.mxu0 %v9670_v10  ;;  %v9724_v10 = vld [vmem:[%s11902_s4 + $0x4e0] ss:$24 sps:$4 sm:$0xff]  }
 0x144   :  { %1429 = vmatprep.subr.bf16.mxu0 %v9678_v12  ;;  %v9730_v12 = vld [vmem:[%s11902_s4 + $0x510] ss:$24 sps:$4 sm:$0xff]  }
 0x145   :  { %1463 = vmatpush1.bf16.msra.mxu1 %v9655_v4  ;;  %v9712_v4 = vld [vmem:[%s11902_s4 + $0x480] ss:$24 sps:$4 sm:$0xff]  }
 0x146   :  { %1464 = vmatprep.subr.bf16.mxu1 %v9663_v6  ;;  %v9720_v6 = vld [vmem:[%s11902_s4 + $0x4b4] ss:$24 sps:$4 sm:$0xff]  }
 0x147   :  { %1430 = vmatpush1.bf16.msra.mxu0 %v9676_v14  ;;  %v9736_v14 = vld [vmem:[%s11902_s4 + $0x540] ss:$24 sps:$4 sm:$0xff]  }
 0x148   :  { %1431 = vmatprep.subr.bf16.mxu0 %v9684_v19  ;;  %v9756_v19 = vld [vmem:[%s11902_s4 + $0x5d4] ss:$24 sps:$4 sm:$0xff]  }
 0x149   :  { %1465 = vmatpush1.bf16.msra.mxu1 %v9661_v8  ;;  %v9726_v8 = vld [vmem:[%s11902_s4 + $0x4e4] ss:$24 sps:$4 sm:$0xff]  }
 0x14a   :  { %1466 = vmatprep.subr.bf16.mxu1 %v9669_v11  ;;  %v9732_v11 = vld [vmem:[%s11902_s4 + $0x514] ss:$24 sps:$4 sm:$0xff]  }
 0x14b   :  { %1432 = vmatpush1.bf16.msra.mxu0 %v9682_v20  ;;  %v9754_v20 = vld [vmem:[%s11902_s4 + $0x5d0] ss:$24 sps:$4 sm:$0xff]  }
 0x14c   :  { %1499 = vmatprep.subr.bf16.mxu0 %v9690_v23  ;;  %v9762_v23 = vld [vmem:[%s11902_s4 + $0x494] ss:$24 sps:$4 sm:$0xff]  }
 0x14d   :  { %1467 = vmatpush1.bf16.msra.mxu1 %v9667_v13  ;;  %v9738_v13 = vld [vmem:[%s11902_s4 + $0x544] ss:$24 sps:$4 sm:$0xff]  }
 0x14e   :  { %1468 = vmatprep.subr.bf16.mxu1 %v9675_v15  ;;  %v9744_v15 = vld [vmem:[%s11902_s4 + $0x574] ss:$24 sps:$4 sm:$0xff]  }
 0x151   :  { %1469 = vmatpush1.bf16.msra.mxu1 %v9673_v16  ;;  %v9742_v16 = vld [vmem:[%s11902_s4 + $0x570] ss:$24 sps:$4 sm:$0xff]  }
 0x152   :  { %1470 = vmatprep.subr.bf16.mxu1 %v9681_v17  ;;  %v9750_v17 = vld [vmem:[%s11902_s4 + $0x5a4] ss:$24 sps:$4 sm:$0xff]  }
 0x155   :  { %1471 = vmatpush1.bf16.msra.mxu1 %v9679_v18  ;;  %v9748_v18 = vld [vmem:[%s11902_s4 + $0x5a0] ss:$24 sps:$4 sm:$0xff]  }
 0x156   :  { %1472 = vmatprep.subr.bf16.mxu1 %v9687_v21  ;;  %v9759_v21 = vld [vmem:[%s11902_s4 + $0x5dc] ss:$24 sps:$4 sm:$0xff]  }
 0x159   :  { %1473 = vmatpush1.bf16.msra.mxu1 %v9685_v22  ;;  %v9757_v22 = vld [vmem:[%s11902_s4 + $0x5d8] ss:$24 sps:$4 sm:$0xff]  }
 0x15a   :  { %9061 = vmatprep.subr.mxu1 %v9787_v0 }
 0x1af   :  { %v10293_v24 = vpop.f32.mrb[4].mxu1 }
 0x1b0   :  { %v10295_v25 = vpop.f32.mrb[5].mxu1 }
 0x1b1   :  { %v604_v26 = vpop.f32.mrb[6].mxu1 }
 0x1b2   :  { %v605_v27 = vpop.f32.mrb[7].mxu1 }
 0x1d7   :  { %v1123_v28 = vpop.f32.mrb[2].mxu0 }
 0x1d8   :  { %v1124_v29 = vadd.f32 %v1123_v28, %v9979_v40  ;;  %v9060_v30 = vpop.f32.mrb[3].mxu0 }
 0x1da   :  { %v10301_v32 = vpack.c.bf16 %v1124_v29, %v1124_v29  ;;  %v9760_v29 = vld [vmem:[%s11902_s4 + $0x490] ss:$24 sps:$4 sm:$0xff]  }
 0x1dc   :  { %1450 = vmatmul.mubr.bf16.vlgmr.msra.gmra.mrb[4].mxu0 %v10301_v32  ;;  %1491 = vmatmul.mubr.bf16.vlgmr.msra.gmra.mrb[8].mxu1 %v10301_v32 }
 0x1dd   :  { %1500 = vmatpush1.bf16.msra.mxu0 %v9688_v31  ;;  %9062 = vmatpush3.msra.mxu1 %v9854_v1  ;;  %v8683_v1 = vld [vmem:[%s11900_s2 + $0xc] sm:$0xf]  ;;  %v9765_v31 = vld [vmem:[%s11902_s4 + $0x4c4] ss:$24 sps:$4 sm:$0xff]  }
 0x1de   :  { %1501 = vmatprep.subr.bf16.mxu0 %v9693_v33  ;;  %9063 = vmatprep.mubr.msk.f32.mxu1 %vm9788_vm1, %v9787_v0  ;;  %v9766_v33 = vld [vmem:[%s11902_s4 + $0x4f0] ss:$24 sps:$4 sm:$0xff]  }
 0x1df   :  { %1531 = vmatprep.mubr.bf16.mxu0 %v9789_v9  ;;  %1952 = vmatprep.subr.bf16.mxu1 %v9717_v34  ;;  %v9771_v34 = vld [vmem:[%s11902_s4 + $0x524] ss:$24 sps:$4 sm:$0xff]  }
 0x1e1   :  { %1502 = vmatpush1.bf16.msra.mxu0 %v9691_v35  ;;  %v9769_v35 = vld [vmem:[%s11902_s4 + $0x520] ss:$24 sps:$4 sm:$0xff]  }
 0x1e2   :  { %1503 = vmatprep.subr.bf16.mxu0 %v9696_v36  ;;  %v9774_v36 = vld [vmem:[%s11902_s4 + $0x554] ss:$24 sps:$4 sm:$0xff]  }
 0x1e4   :  { %9064 = vmatmul.mubr.msk.f32.vlgmr.msra.gmra.mrb[2].mxu1 %vm78_vm0, %v8683_v1  ;;  %v9777_v1 = vld [vmem:[%s11902_s4 + $0x584] ss:$24 sps:$4 sm:$0xff]  }
 0x1e5   :  { %1504 = vmatpush1.bf16.msra.mxu0 %v9694_v37  ;;  %1953 = vmatpush1.bf16.msra.mxu1 %v9715_v38  ;;  %v9772_v37 = vld [vmem:[%s11902_s4 + $0x550] ss:$24 sps:$4 sm:$0xff]   ;;  %v9775_v38 = vld [vmem:[%s11902_s4 + $0x580] ss:$24 sps:$4 sm:$0xff]  }
 0x1e6   :  { %1505 = vmatprep.subr.bf16.mxu0 %v9699_v39  ;;  %1954 = vmatprep.subr.bf16.mxu1 %v9723_v41  ;;  %v9780_v39 = vld [vmem:[%s11902_s4 + $0x5b4] ss:$24 sps:$4 sm:$0xff]   ;;  %v9778_v41 = vld [vmem:[%s11902_s4 + $0x5b0] ss:$24 sps:$4 sm:$0xff]  }
 0x1e7   :  { %1984 = vmatprep.mubr.bf16.mxu1 %v9789_v9 }
 0x1e9   :  { %1506 = vmatpush1.bf16.msra.mxu0 %v9697_v42  ;;  %1955 = vmatpush1.bf16.msra.mxu1 %v9721_v43  ;;  %v9783_v42 = vld [vmem:[%s11902_s4 + $0x5e4] ss:$24 sps:$4 sm:$0xff]   ;;  %v9781_v43 = vld [vmem:[%s11902_s4 + $0x5e0] ss:$24 sps:$4 sm:$0xff]  }
 0x1ea   :  { %1507 = vmatprep.subr.bf16.mxu0 %v9702_v44  ;;  %1956 = vmatprep.subr.bf16.mxu1 %v9729_v45  ;;  %v2040_v44 = vld [vmem:[%s11903_s1] sm:$0xff] }
 0x1ed   :  { %1508 = vmatpush1.bf16.msra.mxu0 %v9700_v46  ;;  %1957 = vmatpush1.bf16.msra.mxu1 %v9727_v47 }
 0x1ee   :  { %1509 = vmatprep.subr.bf16.mxu0 %v9705_v48  ;;  %1958 = vmatprep.subr.bf16.mxu1 %v9735_v50 }
 0x1ef   :  { %v10374_v55 = vpop.f32.mrb[12].mxu1 }
 0x1f0   :  { %v10376_v56 = vpop.f32.mrb[13].mxu1 }
 0x1f1   :  { %1510 = vmatpush1.bf16.msra.mxu0 %v9703_v51  ;;  %v686_v57 = vpop.f32.mrb[14].mxu1  ;;  %1959 = vmatpush1.bf16.msra.mxu1 %v9733_v52 }
 0x1f2   :  { %v687_v60 = vpop.f32.mrb[15].mxu1  ;;  %1511 = vmatprep.subr.bf16.mxu0 %v9708_v53  ;;  %1960 = vmatprep.subr.bf16.mxu1 %v9741_v54  ;;  %v2046_v54 = vcombine.high %v2040_v44, %v2040_v44  ;;  %v2041_v57 = vld [vmem:[%s11903_s1 + $0x8] sm:$0xff] }
 0x1f5   :  { %1512 = vmatpush1.bf16.msra.mxu0 %v9706_v58  ;;  %1961 = vmatpush1.bf16.msra.mxu1 %v9739_v59 }
 0x1f6   :  { %1513 = vmatprep.subr.bf16.mxu0 %v9711_v61  ;;  %1962 = vmatprep.subr.bf16.mxu1 %v9747_v62 }
 0x1f9   :  { %1514 = vmatpush1.bf16.msra.mxu0 %v9709_v63  ;;  %1963 = vmatpush1.bf16.msra.mxu1 %v9745_v2 }
 0x1fa   :  { %1911 = vmatprep.subr.bf16.mxu0 %v9714_v3  ;;  %1964 = vmatprep.subr.bf16.mxu1 %v9753_v49 }
 0x1fc   :  { %1532 = vmatmul.mubr.bf16.vlgmr.msra.gmra.mrb[8].mxu0 %v10301_v32  ;;  %v9763_v32 = vld [vmem:[%s11902_s4 + $0x4c0] ss:$24 sps:$4 sm:$0xff]  }
 0x1fd   :  { %1912 = vmatpush1.bf16.msra.mxu0 %v9712_v4  ;;  %1965 = vmatpush1.bf16.msra.mxu1 %v9751_v5  ;;  %v2042_v4 = vld [vmem:[%s11903_s1 + $0x10] sm:$0xff]  ;;  %s9791_s1 = smov 127  }
 0x1fe   :  { %1913 = vmatprep.subr.bf16.mxu0 %v9720_v6  ;;  %1943 = vmatprep.mubr.bf16.mxu0 %v9789_v9 }
 0x1ff   :  { %1966 = vmatprep.subr.bf16.mxu1 %v9759_v21 }
 0x201   :  { %1914 = vmatpush1.bf16.msra.mxu0 %v9718_v7  ;;  %1967 = vmatpush1.bf16.msra.mxu1 %v9757_v22 }
 0x202   :  { %1915 = vmatprep.subr.bf16.mxu0 %v9726_v8 }
 0x205   :  { %1916 = vmatpush1.bf16.msra.mxu0 %v9724_v10 }
 0x206   :  { %1917 = vmatprep.subr.bf16.mxu0 %v9732_v11  ;;  %v2048_v11 = vcombine.high %v2042_v4, %v2042_v4 }
 0x209   :  { %1918 = vmatpush1.bf16.msra.mxu0 %v9730_v12 }
 0x20a   :  { %1919 = vmatprep.subr.bf16.mxu0 %v9738_v13 }
 0x20d   :  { %1920 = vmatpush1.bf16.msra.mxu0 %v9736_v14 }
 0x20e   :  { %1921 = vmatprep.subr.bf16.mxu0 %v9744_v15 }
 0x211   :  { %1922 = vmatpush1.bf16.msra.mxu0 %v9742_v16 }
 0x212   :  { %1923 = vmatprep.subr.bf16.mxu0 %v9750_v17 }
 0x215   :  { %1924 = vmatpush1.bf16.msra.mxu0 %v9748_v18 }
 0x216   :  { %1925 = vmatprep.subr.bf16.mxu0 %v9756_v19 }
 0x219   :  { %1926 = vmatpush1.bf16.msra.mxu0 %v9754_v20 }
 0x21a   :  { %1993 = vmatprep.subr.bf16.mxu0 %v9762_v23 }
 0x2b7   :  { %v1617_v26 = vpop.f32.mrb[2].mxu1 }
 0x2b8   :  { %v1618_v27 = vadd.f32 %v1617_v26, %v9979_v40  ;;  %v9065_v28 = vpop.f32.mrb[3].mxu1  ;;  %v9768_v40 = vld [vmem:[%s11902_s4 + $0x4f4] ss:$24 sps:$4 sm:$0xff]  }
 0x2ba   :  { %v1621_v30 = vpack.c.bf16 %v1618_v27, %v1618_v27 }
 0x2bc   :  { %1944 = vmatmul.mubr.bf16.vlgmr.msra.gmra.mrb[4].mxu0 %v1621_v30  ;;  %1985 = vmatmul.mubr.bf16.vlgmr.msra.gmra.mrb[8].mxu1 %v1621_v30 }
 0x2bd   :  { %1994 = vmatpush1.bf16.msra.mxu0 %v9760_v29  ;;  %2025 = vmatprep.mubr.bf16.mxu0 %v9789_v9 }
 0x2be   :  { %1995 = vmatprep.subr.bf16.mxu0 %v9765_v31  ;;  %2206 = vmatprep.mubr.bf16.mxu1 %v9789_v9 }
 0x2c1   :  { %1996 = vmatpush1.bf16.msra.mxu0 %v9763_v32 }
 0x2c2   :  { %1997 = vmatprep.subr.bf16.mxu0 %v9768_v40 }
 0x2c5   :  { %1998 = vmatpush1.bf16.msra.mxu0 %v9766_v33 }
 0x2c6   :  { %1999 = vmatprep.subr.bf16.mxu0 %v9771_v34 }
 0x2c9   :  { %2000 = vmatpush1.bf16.msra.mxu0 %v9769_v35 }
 0x2ca   :  { %2001 = vmatprep.subr.bf16.mxu0 %v9774_v36 }
 0x2cd   :  { %2002 = vmatpush1.bf16.msra.mxu0 %v9772_v37 }
 0x2ce   :  { %2003 = vmatprep.subr.bf16.mxu0 %v9777_v1  ;;  %v3643_v1 = vld [vmem:[%s11904_s7] sm:$0xff] }
 0x2d1   :  { %2004 = vmatpush1.bf16.msra.mxu0 %v9775_v38 }
 0x2d2   :  { %2005 = vmatprep.subr.bf16.mxu0 %v9780_v39 }
 0x2d5   :  { %2006 = vmatpush1.bf16.msra.mxu0 %v9778_v41  ;;  %v8781_v41 = vld [vmem:[%s11905_s5 + $0x4] sm:$0xf] }
 0x2d6   :  { %2007 = vmatprep.subr.bf16.mxu0 %v9783_v42 }
 0x2d9   :  { %2008 = vmatpush1.bf16.msra.mxu0 %v9781_v43 }
 0x2dc   :  { %2026 = vmatmul.mubr.bf16.vlgmr.msra.gmra.mrb[8].mxu0 %v1621_v30 }
 0x2dd   :  { %3794 = vmatprep.mubr.bf16.mxu0 %v9789_v9 }
 0x38f   :  { %v1945_v45 = vpop.f32.mrb[4].mxu0  ;;  %v1986_v46 = vpop.f32.mrb[8].mxu1 }
 0x390   :  { %v9066_v47 = vadd.f32 %v1945_v45, %v10293_v24  ;;  %v1947_v48 = vpop.f32.mrb[5].mxu0  ;;  %v1988_v50 = vpop.f32.mrb[9].mxu1  ;;  %v2047_v24 = vcombine.high %v2041_v57, %v2041_v57  ;;  %v2060_v2 = vrot.slane %v1986_v46, 4 }
 0x391   :  { %v9067_v51 = vadd.f32 %v1947_v48, %v10295_v25  ;;  %v1949_v52 = vpop.f32.mrb[6].mxu0  ;;  %v1990_v53 = vpop.f32.mrb[10].mxu1  ;;  %v2061_v62 = vrot.slane %v1988_v50, 4 }
 0x392   :  { %v2058_v58 = vrot.slane %v9066_v47, 4  ;;  %v1950_v59 = vpop.f32.mrb[7].mxu0  ;;  %v1991_v60 = vpop.f32.mrb[11].mxu1  ;;  %v10536_v49 = vsel %vm2070_vm3, %v2041_v57, %v2060_v2  ;;  %v2126_v52 = vld [vmem:[%s11905_s5] sm:$0xf] }
 0x393   :  { %v2059_v61 = vrot.slane %v9067_v51, 4  ;;  %v10531_v3 = vsel %vm2070_vm3, %v2047_v24, %v2061_v62 }
 0x394   :  { %v10521_v63 = vsel %vm2070_vm3, %v2040_v44, %v2058_v58 }
 0x395   :  { %2083 = vrot.lane.b32.xlu0 %v10521_v63, %s9790_s12  ;;  %v10526_v25 = vsel %vm2070_vm3, %v2046_v54, %v2059_v61 }
 0x396   :  { %2085 = vrot.lane.b32.xlu1 %v10526_v25, %s9790_s12 }
 0x399   :  { %2089 = vrot.lane.b32.xlu0 %v10531_v3, %s9790_s12 }
 0x39a   :  { %2087 = vrot.lane.b32.xlu1 %v10536_v49, %s9790_s12 }
 0x3af   :  { %v2027_v5 = vpop.f32.mrb[8].mxu0 }
 0x3b0   :  { %v9068_v6 = vadd.f32 %v2027_v5, %v10374_v55  ;;  %v2029_v7 = vpop.f32.mrb[9].mxu0 }
 0x3b1   :  { %v9069_v8 = vadd.f32 %v2029_v7, %v10376_v56  ;;  %v2031_v10 = vpop.f32.mrb[10].mxu0 }
 0x3b2   :  { %v2062_v12 = vrot.slane %v9068_v6, 4  ;;  %v2032_v13 = vpop.f32.mrb[11].mxu0  ;;  %v8794_v6 = vld [vmem:[%s11905_s5 + $0x8] sm:$0xf] }
 0x3b3   :  { %v2063_v14 = vrot.slane %v9069_v8, 4 }
 0x3b4   :  { %v10547_v15 = vsel %vm2070_vm3, %v2042_v4, %v2062_v12 }
 0x3b5   :  { %2091 = vrot.lane.b32.xlu1 %v10547_v15, %s9790_s12  ;;  %v10552_v0 = vsel %vm2070_vm3, %v2048_v11, %v2063_v14 }
 0x3b6   :  { %2093 = vrot.lane.b32.xlu0 %v10552_v0, %s9790_s12 }
 0x407   :  { %v2084_v55 = vpop.permute.xlu0 %2083 }
 0x408   :  { %2107 = vst.msk [vmem:[#allocation2] sm:$0xff] %vm2106_vm5, %v2084_v55  ;;  %v2086_v56 = vpop.permute.xlu1 %2085 }
 0x409   :  { %v2095_v16 = vsel %vm66_vm2, %v2084_v55, %v2086_v56 }
 0x40a   :  { %v10558_v17 = vpack.c.bf16 %v2095_v16, %v2095_v16 }
 0x40b   :  { %v2090_v18 = vpop.permute.xlu0 %2089 }
 0x40c   :  { %v2088_v19 = vpop.permute.xlu1 %2087  ;;  %2137 = vrot.lane.b32.xlu0 %v10558_v17, %s9791_s1 }
 0x40d   :  { %v2097_v20 = vsel %vm66_vm2, %v2088_v19, %v2090_v18  ;;  %v2096_v26 = vsel %vm66_vm2, %v2086_v56, %v2088_v19 }
 0x40e   :  { %v10563_v21 = vpack.c.bf16 %v2097_v20, %v2097_v20  ;;  %v10572_v27 = vpack.c.bf16 %v2096_v26, %v2096_v26 }
 0x40f   :  { %v2114_v22 = vld [vmem:[#allocation2] sm:$0xff] }
 0x410   :  { %v10565_v23 = vpack.c.bf16 %v2114_v22, %v2114_v22  ;;  %2141 = vrot.lane.b32.xlu0 %v10563_v21, %s9791_s1  ;;  %v2307_v53 = vsel %vm2070_vm3, %v10572_v27, 0 }
 0x412   :  { %2135 = vrot.lane.b32.xlu1 %v10565_v23, %s9791_s1  ;;  %v2301_v51 = vsel %vm2070_vm3, %v10565_v23, 0 }
 0x416   :  { %2139 = vrot.lane.b32.xlu1 %v10572_v27, %s9791_s1 }
 0x427   :  { %v2092_v28 = vpop.permute.xlu1 %2091 }
 0x428   :  { %v2098_v29 = vsel %vm66_vm2, %v2090_v18, %v2092_v28  ;;  %v2094_v30 = vpop.permute.xlu0 %2093 }
 0x429   :  { %v10577_v31 = vpack.c.bf16 %v2098_v29, %v2098_v29  ;;  %v2099_v32 = vsel %vm66_vm2, %v2092_v28, %v2094_v30 }
 0x42a   :  { %2113 = vst.msk [vmem:[#allocation2 + $0x28] sm:$0xff] %vm2112_vm6, %v2099_v32  ;;  %v3631_v32 = vld [vmem:[%s11906_s6] sm:$0xff] }
 0x42b   :  { %2143 = vrot.lane.b32.xlu1 %v10577_v31, %s9791_s1  ;;  %v2313_v59 = vsel %vm2070_vm3, %v10577_v31, 0 }
 0x42f   :  { %2443 = vrot.lane.b32.xlu1 %v10565_v23, %s9792_s15 }
 0x431   :  { %v2119_v40 = vld [vmem:[#allocation2 + $0x28] sm:$0xff] }
 0x432   :  { %v10585_v33 = vpack.c.bf16 %v2119_v40, %v2119_v40 }
 0x433   :  { %2447 = vrot.lane.b32.xlu1 %v10572_v27, %s9792_s15 }
 0x434   :  { %2145 = vrot.lane.b32.xlu0 %v10585_v33, %s9791_s1 }
 0x437   :  { %2451 = vrot.lane.b32.xlu1 %v10577_v31, %s9792_s15 }
 0x438   :  { %2445 = vrot.lane.b32.xlu0 %v10558_v17, %s9792_s15 }
 0x43b   :  { %2613 = vrot.lane.b32.xlu1 %v10565_v23, %s9793_s16 }
 0x43c   :  { %2449 = vrot.lane.b32.xlu0 %v10563_v21, %s9792_s15 }
 0x43f   :  { %2617 = vrot.lane.b32.xlu1 %v10572_v27, %s9793_s16 }
 0x440   :  { %2453 = vrot.lane.b32.xlu0 %v10585_v33, %s9792_s15 }
 0x443   :  { %2621 = vrot.lane.b32.xlu1 %v10577_v31, %s9793_s16 }
 0x444   :  { %2615 = vrot.lane.b32.xlu0 %v10558_v17, %s9793_s16 }
 0x447   :  { %2783 = vrot.lane.b32.xlu1 %v10565_v23, %s9794_s0 }
 0x448   :  { %2619 = vrot.lane.b32.xlu0 %v10563_v21, %s9793_s16 }
 0x44b   :  { %2787 = vrot.lane.b32.xlu1 %v10572_v27, %s9794_s0 }
 0x44c   :  { %2623 = vrot.lane.b32.xlu0 %v10585_v33, %s9793_s16 }
 0x44f   :  { %2791 = vrot.lane.b32.xlu1 %v10577_v31, %s9794_s0 }
 0x450   :  { %2785 = vrot.lane.b32.xlu0 %v10558_v17, %s9794_s0 }
 0x453   :  { %2953 = vrot.lane.b32.xlu1 %v10565_v23, %s9795_s17 }
 0x454   :  { %2789 = vrot.lane.b32.xlu0 %v10563_v21, %s9794_s0 }
 0x457   :  { %2957 = vrot.lane.b32.xlu1 %v10572_v27, %s9795_s17 }
 0x458   :  { %2793 = vrot.lane.b32.xlu0 %v10585_v33, %s9794_s0 }
 0x45b   :  { %2961 = vrot.lane.b32.xlu1 %v10577_v31, %s9795_s17 }
 0x45c   :  { %2955 = vrot.lane.b32.xlu0 %v10558_v17, %s9795_s17 }
 0x45f   :  { %3123 = vrot.lane.b32.xlu1 %v10565_v23, %s9796_s18 }
 0x460   :  { %2959 = vrot.lane.b32.xlu0 %v10563_v21, %s9795_s17 }
 0x463   :  { %3127 = vrot.lane.b32.xlu1 %v10572_v27, %s9796_s18 }
 0x464   :  { %2963 = vrot.lane.b32.xlu0 %v10585_v33, %s9795_s17 }
 0x467   :  { %3131 = vrot.lane.b32.xlu1 %v10577_v31, %s9796_s18 }
 0x468   :  { %3125 = vrot.lane.b32.xlu0 %v10558_v17, %s9796_s18 }
 0x46b   :  { %3293 = vrot.lane.b32.xlu1 %v10565_v23, %s9797_s19 }
 0x46c   :  { %3129 = vrot.lane.b32.xlu0 %v10563_v21, %s9796_s18 }
 0x46f   :  { %3297 = vrot.lane.b32.xlu1 %v10572_v27, %s9797_s19 }
 0x470   :  { %3133 = vrot.lane.b32.xlu0 %v10585_v33, %s9796_s18 }
 0x473   :  { %3301 = vrot.lane.b32.xlu1 %v10577_v31, %s9797_s19 }
 0x474   :  { %3295 = vrot.lane.b32.xlu0 %v10558_v17, %s9797_s19 }
 0x477   :  { %3463 = vrot.lane.b32.xlu1 %v10565_v23, %s9798_s20 }
 0x478   :  { %3299 = vrot.lane.b32.xlu0 %v10563_v21, %s9797_s19 }
 0x47b   :  { %3467 = vrot.lane.b32.xlu1 %v10572_v27, %s9798_s20 }
 0x47c   :  { %3303 = vrot.lane.b32.xlu0 %v10585_v33, %s9797_s19 }
 0x47e   :  { %v2138_v35 = vpop.permute.xlu0 %2137 }
 0x47f   :  { %3471 = vrot.lane.b32.xlu1 %v10577_v31, %s9798_s20 }
 0x480   :  { %3465 = vrot.lane.b32.xlu0 %v10558_v17, %s9798_s20 }
 0x482   :  { %v2142_v42 = vpop.permute.xlu0 %2141 }
 0x483   :  { %3634 = vperm.xlu1 %9495, %v3631_v32  }
 0x484   :  { %3469 = vrot.lane.b32.xlu0 %v10563_v21, %s9798_s20  ;;  %v2136_v34 = vpop.permute.xlu1 %2135 }
 0x485   :  { %v2148_v36 = vsel %vm2147_vm7, %v2136_v34, %v2138_v35 }
 0x486   :  { %v2157_v39 = vsel %vm2070_vm3, %v2148_v36, 0 }
 0x488   :  { %3473 = vrot.lane.b32.xlu0 %v10585_v33, %s9798_s20  ;;  %v2140_v37 = vpop.permute.xlu1 %2139 }
 0x489   :  { %v2149_v38 = vsel %vm2147_vm7, %v2138_v35, %v2140_v37  ;;  %v2150_v43 = vsel %vm2147_vm7, %v2140_v37, %v2142_v42 }
 0x48a   :  { %8782 = vmatprep.subr.msk.bf16.mxu1 %vm2070_vm3, %v2149_v38  ;;  %v2163_v46 = vsel %vm2070_vm3, %v2150_v43, 0 }
 0x48b   :  { %2175 = vmatpush1.bf16.msra.mxu1 %v2157_v39 }
 0x48c   :  { %3646 = vperm.xlu0 %9494, %v3643_v1   ;;  %v8808_v1 = vld [vmem:[%s11905_s5 + $0x10] sm:$0xf] }
 0x48e   :  { %8783 = vmatmul.mubr.msk.bf16.vlgmr.msra.gmra.mrb[16].mxu1 %vm78_vm0, %v8781_v41 }
 0x48f   :  { %2247 = vmatprep.mubr.bf16.mxu1 %v9789_v9 }
 0x49d   :  { %v2144_v44 = vpop.permute.xlu1 %2143 }
 0x49e   :  { %v2151_v45 = vsel %vm2147_vm7, %v2142_v42, %v2144_v44 }
 0x49f   :  { %8784 = vmatprep.subr.msk.bf16.mxu1 %vm2070_vm3, %v2151_v45 }
 0x4a0   :  { %2216 = vmatpush1.bf16.msra.mxu1 %v2163_v46 }
 0x4a1   :  { %v2444_v54 = vpop.permute.xlu1 %2443 }
 0x4a3   :  { %8785 = vmatmul.mubr.msk.bf16.vlgmr.msra.gmra.mrb[20].mxu1 %vm78_vm0, %v8781_v41 }
 0x4a4   :  { %2288 = vmatprep.mubr.bf16.mxu1 %v9789_v9 }
 0x4a5   :  { %v2448_v58 = vpop.permute.xlu1 %2447 }
 0x4a6   :  { %v2146_v47 = vpop.permute.xlu0 %2145 }
 0x4a7   :  { %v2152_v48 = vsel %vm2147_vm7, %v2144_v44, %v2146_v47  ;;  %8786 = vmatprep.subr.msk.bf16.mxu1 %vm2070_vm3, %v2146_v47 }
 0x4a8   :  { %v2169_v50 = vsel %vm2070_vm3, %v2152_v48, 0 }
 0x4a9   :  { %2257 = vmatpush1.bf16.msra.mxu1 %v2169_v50  ;;  %v2452_v24 = vpop.permute.xlu1 %2451 }
 0x4aa   :  { %8788 = vmatprep.subr.msk.bf16.mxu1 %vm2070_vm3, %v10558_v17  ;;  %v2446_v57 = vpop.permute.xlu0 %2445 }
 0x4ab   :  { %v2457_v60 = vsel %vm2455_vm8, %v2446_v57, %v2448_v58  ;;  %v2456_v61 = vsel %vm2455_vm8, %v2444_v54, %v2446_v57  ;;  %v8815_v54 = vld [vmem:[%s11905_s5 + $0x14] sm:$0xf] }
 0x4ac   :  { %8787 = vmatmul.mubr.msk.bf16.vlgmr.msra.gmra.mrb[24].mxu1 %vm78_vm0, %v8781_v41  ;;  %v2465_v2 = vsel %vm2070_vm3, %v2456_v61, 0 }
 0x4ad   :  { %2319 = vmatpush1.bf16.msra.mxu1 %v2301_v51  ;;  %2350 = vmatprep.mubr.bf16.mxu1 %v9789_v9  ;;  %v2614_v10 = vpop.permute.xlu1 %2613 }
 0x4ae   :  { %8790 = vmatprep.subr.msk.bf16.mxu1 %vm2070_vm3, %v10563_v21  ;;  %v2450_v62 = vpop.permute.xlu0 %2449  ;;  %v8801_v21 = vld [vmem:[%s11905_s5 + $0xc] sm:$0xf] }
 0x4af   :  { %v2459_v4 = vsel %vm2455_vm8, %v2450_v62, %v2452_v24  ;;  %v2458_v5 = vsel %vm2455_vm8, %v2448_v58, %v2450_v62 }
 0x4b0   :  { %v2471_v8 = vsel %vm2070_vm3, %v2458_v5, 0 }
 0x4b1   :  { %v2618_v13 = vpop.permute.xlu1 %2617 }
 0x4b2   :  { %v2454_v7 = vpop.permute.xlu0 %2453 }
 0x4b3   :  { %v2460_v11 = vsel %vm2455_vm8, %v2452_v24, %v2454_v7 }
 0x4b4   :  { %8789 = vmatmul.mubr.msk.bf16.vlgmr.msra.gmra.mrb[16].mxu1 %vm78_vm0, %v2126_v52  ;;  %v2477_v14 = vsel %vm2070_vm3, %v2460_v11, 0  ;;  %v8822_v11 = vld [vmem:[%s11905_s5 + $0x18] sm:$0xf] }
 0x4b5   :  { %2360 = vmatpush1.bf16.msra.mxu1 %v2307_v53  ;;  %2391 = vmatprep.mubr.bf16.mxu1 %v9789_v9  ;;  %v2622_v17 = vpop.permute.xlu1 %2621 }
 0x4b6   :  { %8792 = vmatprep.subr.msk.bf16.mxu1 %vm2070_vm3, %v10585_v33  ;;  %v2616_v12 = vpop.permute.xlu0 %2615 }
 0x4b7   :  { %v2627_v55 = vsel %vm2625_vm9, %v2616_v12, %v2618_v13  ;;  %v2626_v56 = vsel %vm2625_vm9, %v2614_v10, %v2616_v12 }
 0x4b8   :  { %v2635_v18 = vsel %vm2070_vm3, %v2626_v56, 0 }
 0x4b9   :  { %v2784_v26 = vpop.permute.xlu1 %2783 }
 0x4ba   :  { %v2620_v16 = vpop.permute.xlu0 %2619 }
 0x4bb   :  { %v2629_v19 = vsel %vm2625_vm9, %v2620_v16, %v2622_v17  ;;  %v2628_v20 = vsel %vm2625_vm9, %v2618_v13, %v2620_v16 }
 0x4bc   :  { %8791 = vmatmul.mubr.msk.bf16.vlgmr.msra.gmra.mrb[20].mxu1 %vm78_vm0, %v2126_v52  ;;  %v2641_v23 = vsel %vm2070_vm3, %v2628_v20, 0 }
 0x4bd   :  { %2401 = vmatpush1.bf16.msra.mxu1 %v2313_v59  ;;  %2432 = vmatprep.mubr.bf16.mxu1 %v9789_v9  ;;  %v2788_v29 = vpop.permute.xlu1 %2787 }
 0x4be   :  { %8795 = vmatprep.subr.msk.bf16.mxu1 %vm2070_vm3, %v2457_v60  ;;  %v2624_v22 = vpop.permute.xlu0 %2623 }
 0x4bf   :  { %v2630_v27 = vsel %vm2625_vm9, %v2622_v17, %v2624_v22 }
 0x4c0   :  { %v2647_v30 = vsel %vm2070_vm3, %v2630_v27, 0  ;;  %v8829_v27 = vld [vmem:[%s11905_s5 + $0x1c] sm:$0xf] }
 0x4c1   :  { %v2792_v34 = vpop.permute.xlu1 %2791 }
 0x4c2   :  { %v2786_v28 = vpop.permute.xlu0 %2785 }
 0x4c3   :  { %v2797_v31 = vsel %vm2795_vm10, %v2786_v28, %v2788_v29  ;;  %v2796_v40 = vsel %vm2795_vm10, %v2784_v26, %v2786_v28 }
 0x4c4   :  { %8793 = vmatmul.mubr.msk.bf16.vlgmr.msra.gmra.mrb[24].mxu1 %vm78_vm0, %v2126_v52  ;;  %v2805_v35 = vsel %vm2070_vm3, %v2796_v40, 0 }
 0x4c5   :  { %2483 = vmatpush1.bf16.msra.mxu1 %v2465_v2  ;;  %2514 = vmatprep.mubr.bf16.mxu1 %v9789_v9  ;;  %v2954_v41 = vpop.permute.xlu1 %2953 }
 0x4c6   :  { %8797 = vmatprep.subr.msk.bf16.mxu1 %vm2070_vm3, %v2459_v4  ;;  %v2790_v33 = vpop.permute.xlu0 %2789 }
 0x4c7   :  { %v2799_v36 = vsel %vm2795_vm10, %v2790_v33, %v2792_v34  ;;  %v2798_v37 = vsel %vm2795_vm10, %v2788_v29, %v2790_v33 }
 0x4c8   :  { %v2811_v39 = vsel %vm2070_vm3, %v2798_v37, 0 }
 0x4c9   :  { %v2958_v44 = vpop.permute.xlu1 %2957 }
 0x4ca   :  { %v2794_v38 = vpop.permute.xlu0 %2793 }
 0x4cb   :  { %v2800_v42 = vsel %vm2795_vm10, %v2792_v34, %v2794_v38 }
 0x4cc   :  { %8796 = vmatmul.mubr.msk.bf16.vlgmr.msra.gmra.mrb[16].mxu1 %vm78_vm0, %v8794_v6  ;;  %v2817_v45 = vsel %vm2070_vm3, %v2800_v42, 0 }
 0x4cd   :  { %2524 = vmatpush1.bf16.msra.mxu1 %v2471_v8  ;;  %2555 = vmatprep.mubr.bf16.mxu1 %v9789_v9  ;;  %v2962_v50 = vpop.permute.xlu1 %2961 }
 0x4ce   :  { %8799 = vmatprep.subr.msk.bf16.mxu1 %vm2070_vm3, %v2454_v7  ;;  %v2956_v43 = vpop.permute.xlu0 %2955 }
 0x4cf   :  { %v2967_v46 = vsel %vm2965_vm11, %v2956_v43, %v2958_v44  ;;  %v2966_v47 = vsel %vm2965_vm11, %v2954_v41, %v2956_v43  ;;  %v8836_v41 = vld [vmem:[%s11905_s5 + $0x20] sm:$0xf] }
 0x4d0   :  { %v2975_v51 = vsel %vm2070_vm3, %v2966_v47, 0  ;;  %v33_v47 = vld [vmem:[%s11907_s8] sm:$0x3f] }
 0x4d1   :  { %v3124_v59 = vpop.permute.xlu1 %3123  ;;  %vm34_vm15 = vcmp.gt.f32.partialorder %v33_v47, 0.5 }
 0x4d2   :  { %v2960_v48 = vpop.permute.xlu0 %2959 }
 0x4d3   :  { %v2969_v52 = vsel %vm2965_vm11, %v2960_v48, %v2962_v50  ;;  %v2968_v53 = vsel %vm2965_vm11, %v2958_v44, %v2960_v48 }
 0x4d4   :  { %8798 = vmatmul.mubr.msk.bf16.vlgmr.msra.gmra.mrb[20].mxu1 %vm78_vm0, %v8794_v6  ;;  %v2981_v58 = vsel %vm2070_vm3, %v2968_v53, 0 }
 0x4d5   :  { %2565 = vmatpush1.bf16.msra.mxu1 %v2477_v14  ;;  %2596 = vmatprep.mubr.bf16.mxu1 %v9789_v9  ;;  %v3128_v62 = vpop.permute.xlu1 %3127 }
 0x4d6   :  { %8802 = vmatprep.subr.msk.bf16.mxu1 %vm2070_vm3, %v2627_v55  ;;  %v2964_v57 = vpop.permute.xlu0 %2963 }
 0x4d7   :  { %v2970_v60 = vsel %vm2965_vm11, %v2962_v50, %v2964_v57 }
 0x4d8   :  { %v2987_v24 = vsel %vm2070_vm3, %v2970_v60, 0 }
 0x4da   :  { %v3126_v61 = vpop.permute.xlu0 %3125 }
 0x4db   :  { %v3137_v2 = vsel %vm11914_vm12, %v3126_v61, %v3128_v62  ;;  %v3136_v4 = vsel %vm11914_vm12, %v3124_v59, %v3126_v61 }
 0x4dc   :  { %8800 = vmatmul.mubr.msk.bf16.vlgmr.msra.gmra.mrb[24].mxu1 %vm78_vm0, %v8794_v6  ;;  %v3132_v6 = vpop.permute.xlu1 %3131  ;;  %v3145_v7 = vsel %vm2070_vm3, %v3136_v4, 0 }
 0x4dd   :  { %2653 = vmatpush1.bf16.msra.mxu1 %v2635_v18  ;;  %2684 = vmatprep.mubr.bf16.mxu1 %v9789_v9 }
 0x4de   :  { %8804 = vmatprep.subr.msk.bf16.mxu1 %vm2070_vm3, %v2629_v19  ;;  %v3130_v5 = vpop.permute.xlu0 %3129 }
 0x4df   :  { %v3139_v8 = vsel %vm11914_vm12, %v3130_v5, %v3132_v6  ;;  %v3138_v10 = vsel %vm11914_vm12, %v3128_v62, %v3130_v5 }
 0x4e0   :  { %v3151_v13 = vsel %vm2070_vm3, %v3138_v10, 0  ;;  %v3294_v14 = vpop.permute.xlu1 %3293 }
 0x4e2   :  { %v3134_v12 = vpop.permute.xlu0 %3133 }
 0x4e3   :  { %v3140_v55 = vsel %vm11914_vm12, %v3132_v6, %v3134_v12 }
 0x4e4   :  { %8803 = vmatmul.mubr.msk.bf16.vlgmr.msra.gmra.mrb[16].mxu1 %vm78_vm0, %v8801_v21  ;;  %v3298_v16 = vpop.permute.xlu1 %3297  ;;  %v3157_v17 = vsel %vm2070_vm3, %v3140_v55, 0 }
 0x4e5   :  { %2694 = vmatpush1.bf16.msra.mxu1 %v2641_v23  ;;  %2725 = vmatprep.mubr.bf16.mxu1 %v9789_v9 }
 0x4e6   :  { %8806 = vmatprep.subr.msk.bf16.mxu1 %vm2070_vm3, %v2624_v22  ;;  %v3296_v56 = vpop.permute.xlu0 %3295 }
 0x4e7   :  { %v3307_v18 = vsel %vm11913_vm13, %v3296_v56, %v3298_v16  ;;  %v3306_v19 = vsel %vm11913_vm13, %v3294_v14, %v3296_v56 }
 0x4e8   :  { %v3315_v22 = vsel %vm2070_vm3, %v3306_v19, 0 }
 0x4ea   :  { %v3300_v20 = vpop.permute.xlu0 %3299 }
 0x4eb   :  { %v3308_v26 = vsel %vm11913_vm13, %v3298_v16, %v3300_v20 }
 0x4ec   :  { %8805 = vmatmul.mubr.msk.bf16.vlgmr.msra.gmra.mrb[20].mxu1 %vm78_vm0, %v8801_v21  ;;  %v3321_v29 = vsel %vm2070_vm3, %v3308_v26, 0 }
 0x4ed   :  { %2735 = vmatpush1.bf16.msra.mxu1 %v2647_v30  ;;  %2766 = vmatprep.mubr.bf16.mxu1 %v9789_v9 }
 0x4ee   :  { %8809 = vmatprep.subr.msk.bf16.mxu1 %vm2070_vm3, %v2797_v31  ;;  %v3304_v28 = vpop.permute.xlu0 %3303 }
 0x4f2   :  { %v3466_v32 = vpop.permute.xlu0 %3465 }
 0x4f4   :  { %8807 = vmatmul.mubr.msk.bf16.vlgmr.msra.gmra.mrb[24].mxu1 %vm78_vm0, %v8801_v21  ;;  %v3302_v21 = vpop.permute.xlu1 %3301 }
 0x4f5   :  { %2823 = vmatpush1.bf16.msra.mxu1 %v2805_v35  ;;  %2854 = vmatprep.mubr.bf16.mxu1 %v9789_v9  ;;  %v3309_v23 = vsel %vm11913_vm13, %v3300_v20, %v3302_v21  ;;  %v3310_v31 = vsel %vm11913_vm13, %v3302_v21, %v3304_v28 }
 0x4f6   :  { %8811 = vmatprep.subr.msk.bf16.mxu1 %vm2070_vm3, %v2799_v36  ;;  %v3327_v33 = vsel %vm2070_vm3, %v3310_v31, 0  ;;  %v3470_v36 = vpop.permute.xlu0 %3469 }
 0x4f8   :  { %v3464_v30 = vpop.permute.xlu1 %3463 }
 0x4f9   :  { %v3476_v35 = vsel %vm11912_vm14, %v3464_v30, %v3466_v32 }
 0x4fa   :  { %v3474_v43 = vpop.permute.xlu0 %3473 }
 0x4fc   :  { %8810 = vmatmul.mubr.msk.bf16.vlgmr.msra.gmra.mrb[16].mxu1 %vm78_vm0, %v8808_v1  ;;  %v3468_v40 = vpop.permute.xlu1 %3467 }
 0x4fd   :  { %2864 = vmatpush1.bf16.msra.mxu1 %v2811_v39  ;;  %2895 = vmatprep.mubr.bf16.mxu1 %v9789_v9  ;;  %v3477_v34 = vsel %vm11912_vm14, %v3466_v32, %v3468_v40  ;;  %v3478_v39 = vsel %vm11912_vm14, %v3468_v40, %v3470_v36 }
 0x4fe   :  { %8813 = vmatprep.subr.msk.bf16.mxu1 %vm2070_vm3, %v2794_v38  ;;  %v3491_v42 = vsel %vm2070_vm3, %v3478_v39, 0 }
 0x500   :  { %v3472_v37 = vpop.permute.xlu1 %3471 }
 0x501   :  { %v3479_v38 = vsel %vm11912_vm14, %v3470_v36, %v3472_v37  ;;  %v3480_v44 = vsel %vm11912_vm14, %v3472_v37, %v3474_v43 }
 0x504   :  { %8812 = vmatmul.mubr.msk.bf16.vlgmr.msra.gmra.mrb[20].mxu1 %vm78_vm0, %v8808_v1  ;;  %v3635_v53 = vpop.permute.xlu1 %3634 }
 0x505   :  { %2905 = vmatpush1.bf16.msra.mxu1 %v2817_v45  ;;  %2936 = vmatprep.mubr.bf16.mxu1 %v9789_v9  ;;  %v3497_v45 = vsel %vm2070_vm3, %v3480_v44, 0 }
 0x506   :  { %8816 = vmatprep.subr.msk.bf16.mxu1 %vm2070_vm3, %v2967_v46  ;;  %v36_v46 = vlaneseq }
 0x508   :  { %v37_v48 = vshrl.u32 %v36_v46, 7 }
 0x50a   :  { %v38_v50 = vsub.s32 0, %v37_v48  ;;  %v46_v6 = vsub.s32 2, %v37_v48  ;;  %v58_v26 = vsub.s32 5, %v37_v48 }
 0x50b   :  { %v3647_v61 = vpop.permute.xlu0 %3646 }
 0x50c   :  { %8814 = vmatmul.mubr.msk.bf16.vlgmr.msra.gmra.mrb[24].mxu1 %vm78_vm0, %v8808_v1  ;;  %v3485_v1 = vsel %vm2070_vm3, %v3476_v35, 0 }
 0x50d   :  { %2993 = vmatpush1.bf16.msra.mxu1 %v2975_v51  ;;  %3024 = vmatprep.mubr.bf16.mxu1 %v9789_v9  ;;  %v35_v51 = vsel %vm34_vm15, 1, %v9789_v9 }
 0x50e   :  { %8818 = vmatprep.subr.msk.bf16.mxu1 %vm2070_vm3, %v2969_v52  ;;  %v42_v52 = vsub.s32 1, %v37_v48  ;;  %v10873_v14 = vrot.slane %v35_v51, %v46_v6  ;;  %v8906_v6 = vld [vmem:[%s11906_s6 + $0x8] sm:$0xff] }
 0x510   :  { %v10864_v60 = vrot.slane %v35_v51, %v42_v52  ;;  %vm11910_vm15 = vcmp.eq.s32.totalorder %v10873_v14, 1 }
 0x512   :  { %vm11911_vm4 = vcmp.eq.s32.totalorder %v10864_v60, 1 }
 0x514   :  { %8817 = vmatmul.mubr.msk.bf16.vlgmr.msra.gmra.mrb[16].mxu1 %vm78_vm0, %v8815_v54 }
 0x515   :  { %3034 = vmatpush1.bf16.msra.mxu1 %v2981_v58  ;;  %3065 = vmatprep.mubr.bf16.mxu1 %v9789_v9 }
 0x516   :  { %8820 = vmatprep.subr.msk.bf16.mxu1 %vm2070_vm3, %v2964_v57  ;;  %v10862_v57 = vrot.slane %v35_v51, %v38_v50 }
 0x518   :  { %vm11909_vm1 = vcmp.eq.s32.totalorder %v10862_v57, 1 }
 0x51c   :  { %8819 = vmatmul.mubr.msk.bf16.vlgmr.msra.gmra.mrb[20].mxu1 %vm78_vm0, %v8815_v54 }
 0x51d   :  { %3075 = vmatpush1.bf16.msra.mxu1 %v2987_v24  ;;  %3106 = vmatprep.mubr.bf16.mxu1 %v9789_v9 }
 0x51e   :  { %8823 = vmatprep.subr.msk.bf16.mxu1 %vm2070_vm3, %v3137_v2 }
 0x524   :  { %8821 = vmatmul.mubr.msk.bf16.vlgmr.msra.gmra.mrb[24].mxu1 %vm78_vm0, %v8815_v54 }
 0x525   :  { %3163 = vmatpush1.bf16.msra.mxu1 %v3145_v7  ;;  %3194 = vmatprep.mubr.bf16.mxu1 %v9789_v9 }
 0x526   :  { %8825 = vmatprep.subr.msk.bf16.mxu1 %vm2070_vm3, %v3139_v8  ;;  %v50_v8 = vsub.s32 3, %v37_v48 }
 0x528   :  { %v10876_v16 = vrot.slane %v35_v51, %v50_v8 }
 0x52c   :  { %8824 = vmatmul.mubr.msk.bf16.vlgmr.msra.gmra.mrb[16].mxu1 %vm78_vm0, %v8822_v11 }
 0x52d   :  { %3204 = vmatpush1.bf16.msra.mxu1 %v3151_v13  ;;  %3235 = vmatprep.mubr.bf16.mxu1 %v9789_v9 }
 0x52e   :  { %8827 = vmatprep.subr.msk.bf16.mxu1 %vm2070_vm3, %v3134_v12 }
 0x534   :  { %8826 = vmatmul.mubr.msk.bf16.vlgmr.msra.gmra.mrb[20].mxu1 %vm78_vm0, %v8822_v11 }
 0x535   :  { %3245 = vmatpush1.bf16.msra.mxu1 %v3157_v17  ;;  %3276 = vmatprep.mubr.bf16.mxu1 %v9789_v9 }
 0x536   :  { %8830 = vmatprep.subr.msk.bf16.mxu1 %vm2070_vm3, %v3307_v18 }
 0x53c   :  { %8828 = vmatmul.mubr.msk.bf16.vlgmr.msra.gmra.mrb[24].mxu1 %vm78_vm0, %v8822_v11 }
 0x53d   :  { %3333 = vmatpush1.bf16.msra.mxu1 %v3315_v22  ;;  %3364 = vmatprep.mubr.bf16.mxu1 %v9789_v9  ;;  %v54_v22 = vsub.s32 4, %v37_v48 }
 0x53e   :  { %8832 = vmatprep.subr.msk.bf16.mxu1 %vm2070_vm3, %v3309_v23 }
 0x53f   :  { %v10885_v31 = vrot.slane %v35_v51, %v54_v22 }
 0x544   :  { %8831 = vmatmul.mubr.msk.bf16.vlgmr.msra.gmra.mrb[16].mxu1 %vm78_vm0, %v8829_v27 }
 0x545   :  { %3374 = vmatpush1.bf16.msra.mxu1 %v3321_v29  ;;  %3405 = vmatprep.mubr.bf16.mxu1 %v9789_v9 }
 0x546   :  { %8834 = vmatprep.subr.msk.bf16.mxu1 %vm2070_vm3, %v3304_v28 }
 0x54c   :  { %8833 = vmatmul.mubr.msk.bf16.vlgmr.msra.gmra.mrb[20].mxu1 %vm78_vm0, %v8829_v27 }
 0x54d   :  { %3415 = vmatpush1.bf16.msra.mxu1 %v3327_v33  ;;  %3446 = vmatprep.mubr.bf16.mxu1 %v9789_v9  ;;  %v10888_v33 = vrot.slane %v35_v51, %v58_v26 }
 0x54e   :  { %8837 = vmatprep.subr.msk.bf16.mxu1 %vm2070_vm3, %v3477_v34 }
 0x554   :  { %8835 = vmatmul.mubr.msk.bf16.vlgmr.msra.gmra.mrb[24].mxu1 %vm78_vm0, %v8829_v27 }
 0x555   :  { %3503 = vmatpush1.bf16.msra.mxu1 %v3485_v1  ;;  %3534 = vmatprep.mubr.bf16.mxu1 %v9789_v9 }
 0x556   :  { %8839 = vmatprep.subr.msk.bf16.mxu1 %vm2070_vm3, %v3479_v38 }
 0x55c   :  { %8838 = vmatmul.mubr.msk.bf16.vlgmr.msra.gmra.mrb[16].mxu1 %vm78_vm0, %v8836_v41 }
 0x55d   :  { %3544 = vmatpush1.bf16.msra.mxu1 %v3491_v42  ;;  %3575 = vmatprep.mubr.bf16.mxu1 %v9789_v9 }
 0x55e   :  { %8841 = vmatprep.subr.msk.bf16.mxu1 %vm2070_vm3, %v3474_v43 }
 0x564   :  { %8840 = vmatmul.mubr.msk.bf16.vlgmr.msra.gmra.mrb[20].mxu1 %vm78_vm0, %v8836_v41 }
 0x565   :  { %3585 = vmatpush1.bf16.msra.mxu1 %v3497_v45  ;;  %3616 = vmatprep.mubr.bf16.mxu1 %v9789_v9 }
 0x56c   :  { %8842 = vmatmul.mubr.msk.bf16.vlgmr.msra.gmra.mrb[24].mxu1 %vm78_vm0, %v8836_v41 }
 0x56d   :  { %5383 = vmatprep.mubr.bf16.mxu1 %v9789_v9 }
 0x62f   :  { %v3536_v54 = vpop.f32.mrb[16].mxu1 }
 0x630   :  { %v3637_v58 = vmul.f32 %v3635_v53, %v3536_v54  ;;  %v3538_v59 = vpop.f32.mrb[17].mxu1 }
 0x631   :  { %v3638_v62 = vmul.f32 %v3635_v53, %v3538_v59  ;;  %v3540_v24 = vpop.f32.mrb[18].mxu1 }
 0x632   :  { %v3649_v2 = vadd.f32 %v3647_v61, %v3637_v58  ;;  %v3541_v4 = vpop.f32.mrb[19].mxu1 }
 0x633   :  { %v3650_v5 = vadd.f32 %v3647_v61, %v3638_v62 }
 0x634   :  { %v3655_v7 = vmax.f32 %v3649_v2, 0.0 }
 0x635   :  { %v3656_v10 = vmax.f32 %v3650_v5, 0.0 }
 0x636   :  { %v3661_v11 = vsel %vm11909_vm1, %v3655_v7, 0.0  ;;  %vm63_vm1 = vcmp.eq.s32.totalorder %v10876_v16, 1  ;;  %v8907_v7 = vld [vmem:[%s11904_s7 + $0x8] sm:$0xff] }
 0x637   :  { %v3577_v12 = vpop.f32.mrb[20].mxu1  ;;  %3673 = vrot.lane.b32.xlu1 %v3661_v11, %s9790_s12  ;;  %v3662_v13 = vsel %vm11911_vm4, %v3656_v10, 0.0  ;;  %vm65_vm4 = vcmp.eq.s32.totalorder %v10888_v33, 1 }
 0x638   :  { %v3639_v55 = vmul.f32 %v3635_v53, %v3577_v12  ;;  %v3579_v56 = vpop.f32.mrb[21].mxu1  ;;  %3675 = vrot.lane.b32.xlu0 %v3662_v13, %s9790_s12 }
 0x639   :  { %v3640_v17 = vmul.f32 %v3635_v53, %v3579_v56  ;;  %v3581_v18 = vpop.f32.mrb[22].mxu1 }
 0x63a   :  { %v3651_v19 = vadd.f32 %v3647_v61, %v3639_v55  ;;  %v3582_v20 = vpop.f32.mrb[23].mxu1 }
 0x63b   :  { %v3652_v21 = vadd.f32 %v3647_v61, %v3640_v17  ;;  %v8844_v17 = vld [vmem:[%s11905_s5 + $0x28] sm:$0xf] }
 0x63c   :  { %v3657_v23 = vmax.f32 %v3651_v19, 0.0 }
 0x63d   :  { %v3658_v27 = vmax.f32 %v3652_v21, 0.0 }
 0x63e   :  { %v3663_v28 = vsel %vm11910_vm15, %v3657_v23, 0.0  ;;  %vm64_vm15 = vcmp.eq.s32.totalorder %v10885_v31, 1 }
 0x63f   :  { %v3618_v29 = vpop.f32.mrb[24].mxu1  ;;  %3677 = vrot.lane.b32.xlu1 %v3663_v28, %s9790_s12  ;;  %v3664_v30 = vsel %vm63_vm1, %v3658_v27, 0.0  ;;  %v8843_v28 = vld [vmem:[%s11905_s5 + $0x24] sm:$0xf] }
 0x640   :  { %v3641_v32 = vmul.f32 %v3635_v53, %v3618_v29  ;;  %v3620_v40 = vpop.f32.mrb[25].mxu1  ;;  %3679 = vrot.lane.b32.xlu0 %v3664_v30, %s9790_s12 }
 0x641   :  { %v3642_v34 = vmul.f32 %v3635_v53, %v3620_v40  ;;  %v3622_v35 = vpop.f32.mrb[26].mxu1 }
 0x642   :  { %v3653_v36 = vadd.f32 %v3647_v61, %v3641_v32  ;;  %v3623_v37 = vpop.f32.mrb[27].mxu1 }
 0x643   :  { %v3654_v1 = vadd.f32 %v3647_v61, %v3642_v34 }
 0x644   :  { %v3659_v38 = vmax.f32 %v3653_v36, 0.0 }
 0x645   :  { %v3660_v39 = vmax.f32 %v3654_v1, 0.0 }
 0x646   :  { %v3665_v41 = vsel %vm64_vm15, %v3659_v38, 0.0 }
 0x647   :  { %3681 = vrot.lane.b32.xlu1 %v3665_v41, %s9790_s12  ;;  %v3666_v42 = vsel %vm65_vm4, %v3660_v39, 0.0 }
 0x648   :  { %3683 = vrot.lane.b32.xlu0 %v3666_v42, %s9790_s12  ;;  %v8857_v42 = vld [vmem:[%s11905_s5 + $0x2c] sm:$0xf] }
 0x6a9   :  { %v3674_v43 = vpop.permute.xlu1 %3673 }
 0x6aa   :  { %3696 = vst.msk [vmem:[#allocation2] sm:$0xff] %vm2106_vm5, %v3674_v43  ;;  %v3676_v44 = vpop.permute.xlu0 %3675 }
 0x6ab   :  { %v3685_v45 = vsel %vm66_vm2, %v3674_v43, %v3676_v44 }
 0x6ac   :  { %v10900_v46 = vpack.c.bf16 %v3685_v45, %v3685_v45 }
 0x6ae   :  { %3726 = vrot.lane.b32.xlu0 %v10900_v46, %s9791_s1 }
 0x6b1   :  { %v3702_v47 = vld [vmem:[#allocation2] sm:$0xff]  ;;  %v3678_v48 = vpop.permute.xlu1 %3677 }
 0x6b2   :  { %v10904_v50 = vpack.c.bf16 %v3702_v47, %v3702_v47  ;;  %v3680_v51 = vpop.permute.xlu0 %3679  ;;  %v3686_v52 = vsel %vm66_vm2, %v3676_v44, %v3678_v48 }
 0x6b3   :  { %v3687_v53 = vsel %vm66_vm2, %v3678_v48, %v3680_v51  ;;  %v10912_v58 = vpack.c.bf16 %v3686_v52, %v3686_v52 }
 0x6b4   :  { %v10908_v54 = vpack.c.bf16 %v3687_v53, %v3687_v53  ;;  %3724 = vrot.lane.b32.xlu1 %v10904_v50, %s9791_s1  ;;  %v3889_v27 = vsel %vm2070_vm3, %v10904_v50, 0 }
 0x6b5   :  { %v3895_v29 = vsel %vm2070_vm3, %v10912_v58, 0 }
 0x6b6   :  { %3730 = vrot.lane.b32.xlu0 %v10908_v54, %s9791_s1 }
 0x6b8   :  { %3728 = vrot.lane.b32.xlu1 %v10912_v58, %s9791_s1 }
 0x6b9   :  { %v3682_v59 = vpop.permute.xlu1 %3681 }
 0x6ba   :  { %v3688_v61 = vsel %vm66_vm2, %v3680_v51, %v3682_v59  ;;  %v3684_v62 = vpop.permute.xlu0 %3683 }
 0x6bb   :  { %v10919_v24 = vpack.c.bf16 %v3688_v61, %v3688_v61  ;;  %v3689_v2 = vsel %vm66_vm2, %v3682_v59, %v3684_v62  ;;  %v8864_v62 = vld [vmem:[%s11905_s5 + $0x30] sm:$0xf] }
 0x6bc   :  { %3701 = vst.msk [vmem:[#allocation2 + $0x28] sm:$0xff] %vm2112_vm6, %v3689_v2 }
 0x6bd   :  { %3732 = vrot.lane.b32.xlu1 %v10919_v24, %s9791_s1  ;;  %v3901_v34 = vsel %vm2070_vm3, %v10919_v24, 0 }
 0x6c1   :  { %4031 = vrot.lane.b32.xlu1 %v10904_v50, %s9792_s15 }
 0x6c3   :  { %v3707_v4 = vld [vmem:[#allocation2 + $0x28] sm:$0xff] }
 0x6c4   :  { %v10927_v5 = vpack.c.bf16 %v3707_v4, %v3707_v4 }
 0x6c5   :  { %4035 = vrot.lane.b32.xlu1 %v10912_v58, %s9792_s15 }
 0x6c6   :  { %3734 = vrot.lane.b32.xlu0 %v10927_v5, %s9791_s1 }
 0x6c9   :  { %4039 = vrot.lane.b32.xlu1 %v10919_v24, %s9792_s15 }
 0x6ca   :  { %4033 = vrot.lane.b32.xlu0 %v10900_v46, %s9792_s15 }
 0x6cd   :  { %4200 = vrot.lane.b32.xlu1 %v10904_v50, %s9793_s16 }
 0x6ce   :  { %4037 = vrot.lane.b32.xlu0 %v10908_v54, %s9792_s15 }
 0x6d1   :  { %4204 = vrot.lane.b32.xlu1 %v10912_v58, %s9793_s16 }
 0x6d2   :  { %4041 = vrot.lane.b32.xlu0 %v10927_v5, %s9792_s15 }
 0x6d5   :  { %4208 = vrot.lane.b32.xlu1 %v10919_v24, %s9793_s16 }
 0x6d6   :  { %4202 = vrot.lane.b32.xlu0 %v10900_v46, %s9793_s16 }
 0x6d9   :  { %4369 = vrot.lane.b32.xlu1 %v10904_v50, %s9794_s0 }
 0x6da   :  { %4206 = vrot.lane.b32.xlu0 %v10908_v54, %s9793_s16 }
 0x6dd   :  { %4373 = vrot.lane.b32.xlu1 %v10912_v58, %s9794_s0 }
 0x6de   :  { %4210 = vrot.lane.b32.xlu0 %v10927_v5, %s9793_s16 }
 0x6e1   :  { %4377 = vrot.lane.b32.xlu1 %v10919_v24, %s9794_s0 }
 0x6e2   :  { %4371 = vrot.lane.b32.xlu0 %v10900_v46, %s9794_s0 }
 0x6e5   :  { %4538 = vrot.lane.b32.xlu1 %v10904_v50, %s9795_s17 }
 0x6e6   :  { %4375 = vrot.lane.b32.xlu0 %v10908_v54, %s9794_s0 }
 0x6e9   :  { %4542 = vrot.lane.b32.xlu1 %v10912_v58, %s9795_s17 }
 0x6ea   :  { %4379 = vrot.lane.b32.xlu0 %v10927_v5, %s9794_s0 }
 0x6ed   :  { %4546 = vrot.lane.b32.xlu1 %v10919_v24, %s9795_s17 }
 0x6ee   :  { %4540 = vrot.lane.b32.xlu0 %v10900_v46, %s9795_s17 }
 0x6f1   :  { %4707 = vrot.lane.b32.xlu1 %v10904_v50, %s9796_s18 }
 0x6f2   :  { %4544 = vrot.lane.b32.xlu0 %v10908_v54, %s9795_s17 }
 0x6f5   :  { %4711 = vrot.lane.b32.xlu1 %v10912_v58, %s9796_s18 }
 0x6f6   :  { %4548 = vrot.lane.b32.xlu0 %v10927_v5, %s9795_s17 }
 0x6f9   :  { %4715 = vrot.lane.b32.xlu1 %v10919_v24, %s9796_s18 }
 0x6fa   :  { %4709 = vrot.lane.b32.xlu0 %v10900_v46, %s9796_s18 }
 0x6fd   :  { %4876 = vrot.lane.b32.xlu1 %v10904_v50, %s9797_s19 }
 0x6fe   :  { %4713 = vrot.lane.b32.xlu0 %v10908_v54, %s9796_s18 }
 0x701   :  { %4880 = vrot.lane.b32.xlu1 %v10912_v58, %s9797_s19 }
 0x702   :  { %4717 = vrot.lane.b32.xlu0 %v10927_v5, %s9796_s18 }
 0x705   :  { %4884 = vrot.lane.b32.xlu1 %v10919_v24, %s9797_s19 }
 0x706   :  { %4878 = vrot.lane.b32.xlu0 %v10900_v46, %s9797_s19 }
 0x709   :  { %5045 = vrot.lane.b32.xlu1 %v10904_v50, %s9798_s20 }
 0x70a   :  { %4882 = vrot.lane.b32.xlu0 %v10908_v54, %s9797_s19 }
 0x70d   :  { %5049 = vrot.lane.b32.xlu1 %v10912_v58, %s9798_s20 }
 0x70e   :  { %4886 = vrot.lane.b32.xlu0 %v10927_v5, %s9797_s19 }
 0x711   :  { %5053 = vrot.lane.b32.xlu1 %v10919_v24, %s9798_s20 }
 0x712   :  { %5047 = vrot.lane.b32.xlu0 %v10900_v46, %s9798_s20 }
 0x715   :  { %5216 = vperm.xlu1 %9495, %v8906_v6  }
 0x716   :  { %5051 = vrot.lane.b32.xlu0 %v10908_v54, %s9798_s20 }
 0x71a   :  { %5055 = vrot.lane.b32.xlu0 %v10927_v5, %s9798_s20 }
 0x71e   :  { %5229 = vperm.xlu0 %9494, %v8907_v7  }
 0x720   :  { %v3727_v10 = vpop.permute.xlu0 %3726 }
 0x726   :  { %v3725_v8 = vpop.permute.xlu1 %3724 }
 0x727   :  { %v3736_v11 = vsel %vm2147_vm7, %v3725_v8, %v3727_v10 }
 0x728   :  { %v3745_v55 = vsel %vm2070_vm3, %v3736_v11, 0  ;;  %v3731_v56 = vpop.permute.xlu0 %3730 }
 0x72a   :  { %v3729_v12 = vpop.permute.xlu1 %3728 }
 0x72b   :  { %v3737_v13 = vsel %vm2147_vm7, %v3727_v10, %v3729_v12  ;;  %v3738_v18 = vsel %vm2147_vm7, %v3729_v12, %v3731_v56 }
 0x72c   :  { %8845 = vmatprep.subr.msk.bf16.mxu0 %vm2070_vm3, %v3737_v13  ;;  %v3751_v21 = vsel %vm2070_vm3, %v3738_v18, 0  ;;  %v8871_v18 = vld [vmem:[%s11905_s5 + $0x34] sm:$0xf] }
 0x72d   :  { %3763 = vmatpush1.bf16.msra.mxu0 %v3745_v55 }
 0x72f   :  { %v3733_v19 = vpop.permute.xlu1 %3732 }
 0x730   :  { %8846 = vmatmul.mubr.msk.bf16.vlgmr.msra.gmra.mrb[12].mxu0 %vm78_vm0, %v8844_v17  ;;  %v3739_v20 = vsel %vm2147_vm7, %v3731_v56, %v3733_v19 }
 0x731   :  { %8847 = vmatprep.subr.msk.bf16.mxu0 %vm2070_vm3, %v3739_v20  ;;  %3835 = vmatprep.mubr.bf16.mxu0 %v9789_v9 }
 0x732   :  { %3804 = vmatpush1.bf16.msra.mxu0 %v3751_v21 }
 0x733   :  { %v4032_v30 = vpop.permute.xlu1 %4031 }
 0x737   :  { %v4036_v40 = vpop.permute.xlu1 %4035 }
 0x738   :  { %v3735_v22 = vpop.permute.xlu0 %3734  ;;  %8848 = vmatmul.mubr.msk.bf16.vlgmr.msra.gmra.mrb[16].mxu0 %vm78_vm0, %v8844_v17 }
 0x739   :  { %v3740_v23 = vsel %vm2147_vm7, %v3733_v19, %v3735_v22  ;;  %8849 = vmatprep.subr.msk.bf16.mxu0 %vm2070_vm3, %v3735_v22  ;;  %3876 = vmatprep.mubr.bf16.mxu0 %v9789_v9 }
 0x73a   :  { %v3757_v26 = vsel %vm2070_vm3, %v3740_v23, 0 }
 0x73b   :  { %3845 = vmatpush1.bf16.msra.mxu0 %v3757_v26  ;;  %v4040_v1 = vpop.permute.xlu1 %4039 }
 0x73c   :  { %8851 = vmatprep.subr.msk.bf16.mxu0 %vm2070_vm3, %v10900_v46  ;;  %v4034_v32 = vpop.permute.xlu0 %4033 }
 0x73d   :  { %v4044_v35 = vsel %vm2455_vm8, %v4034_v32, %v4036_v40  ;;  %v4043_v36 = vsel %vm2455_vm8, %v4032_v30, %v4034_v32 }
 0x73e   :  { %v4052_v38 = vsel %vm2070_vm3, %v4043_v36, 0  ;;  %v8878_v36 = vld [vmem:[%s11905_s5 + $0x38] sm:$0xf] }
 0x73f   :  { %v4201_v45 = vpop.permute.xlu1 %4200 }
 0x740   :  { %8850 = vmatmul.mubr.msk.bf16.vlgmr.msra.gmra.mrb[20].mxu0 %vm78_vm0, %v8844_v17  ;;  %v4038_v37 = vpop.permute.xlu0 %4037 }
 0x741   :  { %3907 = vmatpush1.bf16.msra.mxu0 %v3889_v27  ;;  %3938 = vmatprep.mubr.bf16.mxu0 %v9789_v9  ;;  %v4046_v39 = vsel %vm2455_vm8, %v4038_v37, %v4040_v1  ;;  %v4045_v41 = vsel %vm2455_vm8, %v4036_v40, %v4038_v37 }
 0x742   :  { %8853 = vmatprep.subr.msk.bf16.mxu0 %vm2070_vm3, %v10908_v54  ;;  %v4058_v44 = vsel %vm2070_vm3, %v4045_v41, 0 }
 0x743   :  { %v4205_v48 = vpop.permute.xlu1 %4204 }
 0x744   :  { %v4042_v43 = vpop.permute.xlu0 %4041 }
 0x745   :  { %v4047_v46 = vsel %vm2455_vm8, %v4040_v1, %v4042_v43 }
 0x746   :  { %v4064_v50 = vsel %vm2070_vm3, %v4047_v46, 0 }
 0x747   :  { %v4209_v54 = vpop.permute.xlu1 %4208 }
 0x748   :  { %8852 = vmatmul.mubr.msk.bf16.vlgmr.msra.gmra.mrb[12].mxu0 %vm78_vm0, %v8843_v28  ;;  %v4203_v47 = vpop.permute.xlu0 %4202 }
 0x749   :  { %3948 = vmatpush1.bf16.msra.mxu0 %v3895_v29  ;;  %3979 = vmatprep.mubr.bf16.mxu0 %v9789_v9  ;;  %v4213_v51 = vsel %vm2625_vm9, %v4203_v47, %v4205_v48  ;;  %v4212_v52 = vsel %vm2625_vm9, %v4201_v45, %v4203_v47 }
 0x74a   :  { %8855 = vmatprep.subr.msk.bf16.mxu0 %vm2070_vm3, %v10927_v5  ;;  %v4221_v58 = vsel %vm2070_vm3, %v4212_v52, 0  ;;  %v8885_v52 = vld [vmem:[%s11905_s5 + $0x3c] sm:$0xf] }
 0x74b   :  { %v4370_v4 = vpop.permute.xlu1 %4369 }
 0x74c   :  { %v4207_v53 = vpop.permute.xlu0 %4206 }
 0x74d   :  { %v4215_v59 = vsel %vm2625_vm9, %v4207_v53, %v4209_v54  ;;  %v4214_v61 = vsel %vm2625_vm9, %v4205_v48, %v4207_v53 }
 0x74e   :  { %v4227_v2 = vsel %vm2070_vm3, %v4214_v61, 0 }
 0x74f   :  { %v4374_v7 = vpop.permute.xlu1 %4373 }
 0x750   :  { %8854 = vmatmul.mubr.msk.bf16.vlgmr.msra.gmra.mrb[16].mxu0 %vm78_vm0, %v8843_v28  ;;  %v4211_v24 = vpop.permute.xlu0 %4210 }
 0x751   :  { %3989 = vmatpush1.bf16.msra.mxu0 %v3901_v34  ;;  %4020 = vmatprep.mubr.bf16.mxu0 %v9789_v9  ;;  %v4216_v5 = vsel %vm2625_vm9, %v4209_v54, %v4211_v24 }
 0x752   :  { %8858 = vmatprep.subr.msk.bf16.mxu0 %vm2070_vm3, %v4044_v35  ;;  %v4233_v8 = vsel %vm2070_vm3, %v4216_v5, 0 }
 0x753   :  { %v4378_v13 = vpop.permute.xlu1 %4377 }
 0x754   :  { %v4372_v6 = vpop.permute.xlu0 %4371 }
 0x755   :  { %v4382_v10 = vsel %vm2795_vm10, %v4372_v6, %v4374_v7  ;;  %v4381_v11 = vsel %vm2795_vm10, %v4370_v4, %v4372_v6 }
 0x756   :  { %v4390_v55 = vsel %vm2070_vm3, %v4381_v11, 0  ;;  %v8892_v11 = vld [vmem:[%s11905_s5 + $0x40] sm:$0xf] }
 0x757   :  { %v4539_v21 = vpop.permute.xlu1 %4538 }
 0x758   :  { %8856 = vmatmul.mubr.msk.bf16.vlgmr.msra.gmra.mrb[20].mxu0 %vm78_vm0, %v8843_v28  ;;  %v4376_v12 = vpop.permute.xlu0 %4375 }
 0x759   :  { %4070 = vmatpush1.bf16.msra.mxu0 %v4052_v38  ;;  %4101 = vmatprep.mubr.bf16.mxu0 %v9789_v9  ;;  %v4384_v56 = vsel %vm2795_vm10, %v4376_v12, %v4378_v13  ;;  %v4383_v17 = vsel %vm2795_vm10, %v4374_v7, %v4376_v12 }
 0x75a   :  { %8860 = vmatprep.subr.msk.bf16.mxu0 %vm2070_vm3, %v4046_v39  ;;  %v4396_v20 = vsel %vm2070_vm3, %v4383_v17, 0 }
 0x75b   :  { %v4543_v26 = vpop.permute.xlu1 %4542 }
 0x75c   :  { %v4380_v19 = vpop.permute.xlu0 %4379 }
 0x75d   :  { %v4385_v22 = vsel %vm2795_vm10, %v4378_v13, %v4380_v19 }
 0x75e   :  { %v4402_v27 = vsel %vm2070_vm3, %v4385_v22, 0 }
 0x75f   :  { %v4547_v32 = vpop.permute.xlu1 %4546 }
 0x760   :  { %8859 = vmatmul.mubr.msk.bf16.vlgmr.msra.gmra.mrb[12].mxu0 %vm78_vm0, %v8857_v42  ;;  %v4541_v23 = vpop.permute.xlu0 %4540 }
 0x761   :  { %4111 = vmatpush1.bf16.msra.mxu0 %v4058_v44  ;;  %4142 = vmatprep.mubr.bf16.mxu0 %v9789_v9  ;;  %v4551_v28 = vsel %vm2965_vm11, %v4541_v23, %v4543_v26  ;;  %v4550_v29 = vsel %vm2965_vm11, %v4539_v21, %v4541_v23 }
 0x762   :  { %8862 = vmatprep.subr.msk.bf16.mxu0 %vm2070_vm3, %v4042_v43  ;;  %v4559_v40 = vsel %vm2070_vm3, %v4550_v29, 0  ;;  %v8899_v29 = vld [vmem:[%s11905_s5 + $0x44] sm:$0xf] }
 0x763   :  { %v4708_v38 = vpop.permute.xlu1 %4707 }
 0x764   :  { %v4545_v30 = vpop.permute.xlu0 %4544 }
 0x765   :  { %v4553_v34 = vsel %vm2965_vm11, %v4545_v30, %v4547_v32  ;;  %v4552_v35 = vsel %vm2965_vm11, %v4543_v26, %v4545_v30 }
 0x766   :  { %v4565_v1 = vsel %vm2070_vm3, %v4552_v35, 0 }
 0x768   :  { %8861 = vmatmul.mubr.msk.bf16.vlgmr.msra.gmra.mrb[16].mxu0 %vm78_vm0, %v8857_v42  ;;  %v4549_v37 = vpop.permute.xlu0 %4548 }
 0x769   :  { %4152 = vmatpush1.bf16.msra.mxu0 %v4064_v50  ;;  %4183 = vmatprep.mubr.bf16.mxu0 %v9789_v9  ;;  %v4554_v39 = vsel %vm2965_vm11, %v4547_v32, %v4549_v37 }
 0x76a   :  { %8865 = vmatprep.subr.msk.bf16.mxu0 %vm2070_vm3, %v4213_v51  ;;  %v4571_v43 = vsel %vm2070_vm3, %v4554_v39, 0 }
 0x76c   :  { %v4710_v41 = vpop.permute.xlu0 %4709 }
 0x76d   :  { %v4719_v45 = vsel %vm11914_vm12, %v4708_v38, %v4710_v41 }
 0x76e   :  { %v4728_v48 = vsel %vm2070_vm3, %v4719_v45, 0 }
 0x770   :  { %8863 = vmatmul.mubr.msk.bf16.vlgmr.msra.gmra.mrb[20].mxu0 %vm78_vm0, %v8857_v42  ;;  %v4712_v42 = vpop.permute.xlu1 %4711  ;;  %v4714_v46 = vpop.permute.xlu0 %4713 }
 0x771   :  { %4239 = vmatpush1.bf16.msra.mxu0 %v4221_v58  ;;  %4270 = vmatprep.mubr.bf16.mxu0 %v9789_v9  ;;  %v4720_v44 = vsel %vm11914_vm12, %v4710_v41, %v4712_v42  ;;  %v4721_v51 = vsel %vm11914_vm12, %v4712_v42, %v4714_v46 }
 0x772   :  { %8867 = vmatprep.subr.msk.bf16.mxu0 %vm2070_vm3, %v4215_v59  ;;  %v4734_v54 = vsel %vm2070_vm3, %v4721_v51, 0 }
 0x774   :  { %v4716_v47 = vpop.permute.xlu1 %4715  ;;  %v4718_v53 = vpop.permute.xlu0 %4717 }
 0x775   :  { %v4722_v50 = vsel %vm11914_vm12, %v4714_v46, %v4716_v47  ;;  %v4723_v59 = vsel %vm11914_vm12, %v4716_v47, %v4718_v53 }
 0x778   :  { %8866 = vmatmul.mubr.msk.bf16.vlgmr.msra.gmra.mrb[12].mxu0 %vm78_vm0, %v8864_v62  ;;  %v4877_v58 = vpop.permute.xlu1 %4876  ;;  %v4879_v61 = vpop.permute.xlu0 %4878 }
 0x779   :  { %4280 = vmatpush1.bf16.msra.mxu0 %v4227_v2  ;;  %4311 = vmatprep.mubr.bf16.mxu0 %v9789_v9  ;;  %v4888_v4 = vsel %vm11913_vm13, %v4877_v58, %v4879_v61 }
 0x77a   :  { %8869 = vmatprep.subr.msk.bf16.mxu0 %vm2070_vm3, %v4211_v24  ;;  %v4740_v24 = vsel %vm2070_vm3, %v4723_v59, 0  ;;  %v4897_v7 = vsel %vm2070_vm3, %v4888_v4, 0 }
 0x77c   :  { %v4883_v5 = vpop.permute.xlu0 %4882 }
 0x780   :  { %8868 = vmatmul.mubr.msk.bf16.vlgmr.msra.gmra.mrb[16].mxu0 %vm78_vm0, %v8864_v62  ;;  %v4887_v12 = vpop.permute.xlu0 %4886 }
 0x781   :  { %4321 = vmatpush1.bf16.msra.mxu0 %v4233_v8  ;;  %4352 = vmatprep.mubr.bf16.mxu0 %v9789_v9 }
 0x782   :  { %8872 = vmatprep.subr.msk.bf16.mxu0 %vm2070_vm3, %v4382_v10 }
 0x784   :  { %v5048_v17 = vpop.permute.xlu0 %5047 }
 0x788   :  { %8870 = vmatmul.mubr.msk.bf16.vlgmr.msra.gmra.mrb[20].mxu0 %vm78_vm0, %v8864_v62  ;;  %v4881_v62 = vpop.permute.xlu1 %4880  ;;  %v5052_v22 = vpop.permute.xlu0 %5051 }
 0x789   :  { %4408 = vmatpush1.bf16.msra.mxu0 %v4390_v55  ;;  %4439 = vmatprep.mubr.bf16.mxu0 %v9789_v9  ;;  %v4889_v2 = vsel %vm11913_vm13, %v4879_v61, %v4881_v62  ;;  %v4890_v10 = vsel %vm11913_vm13, %v4881_v62, %v4883_v5 }
 0x78a   :  { %8874 = vmatprep.subr.msk.bf16.mxu0 %vm2070_vm3, %v4384_v56  ;;  %v4903_v13 = vsel %vm2070_vm3, %v4890_v10, 0 }
 0x78c   :  { %v4885_v6 = vpop.permute.xlu1 %4884  ;;  %v5056_v32 = vpop.permute.xlu0 %5055 }
 0x78d   :  { %v4891_v8 = vsel %vm11913_vm13, %v4883_v5, %v4885_v6  ;;  %v4892_v56 = vsel %vm11913_vm13, %v4885_v6, %v4887_v12  ;;  %vm11916_vm13 = vcmp.eq.s32.totalorder %v10864_v60, 1 }
 0x790   :  { %8873 = vmatmul.mubr.msk.bf16.vlgmr.msra.gmra.mrb[12].mxu0 %vm78_vm0, %v8871_v18  ;;  %v5046_v55 = vpop.permute.xlu1 %5045 }
 0x791   :  { %4449 = vmatpush1.bf16.msra.mxu0 %v4396_v20  ;;  %4480 = vmatprep.mubr.bf16.mxu0 %v9789_v9  ;;  %v5057_v21 = vsel %vm11912_vm14, %v5046_v55, %v5048_v17 }
 0x792   :  { %8876 = vmatprep.subr.msk.bf16.mxu0 %vm2070_vm3, %v4380_v19  ;;  %v4909_v19 = vsel %vm2070_vm3, %v4892_v56, 0  ;;  %v5066_v26 = vsel %vm2070_vm3, %v5057_v21, 0 }
 0x798   :  { %8875 = vmatmul.mubr.msk.bf16.vlgmr.msra.gmra.mrb[16].mxu0 %vm78_vm0, %v8871_v18 }
 0x799   :  { %4490 = vmatpush1.bf16.msra.mxu0 %v4402_v27  ;;  %4521 = vmatprep.mubr.bf16.mxu0 %v9789_v9 }
 0x79a   :  { %8879 = vmatprep.subr.msk.bf16.mxu0 %vm2070_vm3, %v4551_v28 }
 0x79d   :  { %v5230_v38 = vpop.permute.xlu0 %5229 }
 0x7a0   :  { %8877 = vmatmul.mubr.msk.bf16.vlgmr.msra.gmra.mrb[20].mxu0 %vm78_vm0, %v8871_v18  ;;  %v5050_v18 = vpop.permute.xlu1 %5049 }
 0x7a1   :  { %4577 = vmatpush1.bf16.msra.mxu0 %v4559_v40  ;;  %4608 = vmatprep.mubr.bf16.mxu0 %v9789_v9  ;;  %v5058_v20 = vsel %vm11912_vm14, %v5048_v17, %v5050_v18  ;;  %v5059_v28 = vsel %vm11912_vm14, %v5050_v18, %v5052_v22 }
 0x7a2   :  { %8881 = vmatprep.subr.msk.bf16.mxu0 %vm2070_vm3, %v4553_v34  ;;  %v5072_v30 = vsel %vm2070_vm3, %v5059_v28, 0 }
 0x7a4   :  { %v5054_v23 = vpop.permute.xlu1 %5053 }
 0x7a5   :  { %v5060_v27 = vsel %vm11912_vm14, %v5052_v22, %v5054_v23  ;;  %v5061_v40 = vsel %vm11912_vm14, %v5054_v23, %v5056_v32  ;;  %vm11915_vm14 = vcmp.eq.s32.totalorder %v10862_v57, 1 }
 0x7a6   :  { %v5078_v34 = vsel %vm2070_vm3, %v5061_v40, 0 }
 0x7a8   :  { %8880 = vmatmul.mubr.msk.bf16.vlgmr.msra.gmra.mrb[12].mxu0 %vm78_vm0, %v8878_v36  ;;  %v5217_v35 = vpop.permute.xlu1 %5216 }
 0x7a9   :  { %4618 = vmatpush1.bf16.msra.mxu0 %v4565_v1  ;;  %4649 = vmatprep.mubr.bf16.mxu0 %v9789_v9 }
 0x7aa   :  { %8883 = vmatprep.subr.msk.bf16.mxu0 %vm2070_vm3, %v4549_v37 }
 0x7b0   :  { %8882 = vmatmul.mubr.msk.bf16.vlgmr.msra.gmra.mrb[16].mxu0 %vm78_vm0, %v8878_v36 }
 0x7b1   :  { %4659 = vmatpush1.bf16.msra.mxu0 %v4571_v43  ;;  %4690 = vmatprep.mubr.bf16.mxu0 %v9789_v9 }
 0x7b2   :  { %8886 = vmatprep.subr.msk.bf16.mxu0 %vm2070_vm3, %v4720_v44 }
 0x7b8   :  { %8884 = vmatmul.mubr.msk.bf16.vlgmr.msra.gmra.mrb[20].mxu0 %vm78_vm0, %v8878_v36 }
 0x7b9   :  { %4746 = vmatpush1.bf16.msra.mxu0 %v4728_v48  ;;  %4777 = vmatprep.mubr.bf16.mxu0 %v9789_v9 }
 0x7ba   :  { %8888 = vmatprep.subr.msk.bf16.mxu0 %vm2070_vm3, %v4722_v50 }
 0x7c0   :  { %8887 = vmatmul.mubr.msk.bf16.vlgmr.msra.gmra.mrb[12].mxu0 %vm78_vm0, %v8885_v52 }
 0x7c1   :  { %4787 = vmatpush1.bf16.msra.mxu0 %v4734_v54  ;;  %4818 = vmatprep.mubr.bf16.mxu0 %v9789_v9 }
 0x7c2   :  { %8890 = vmatprep.subr.msk.bf16.mxu0 %vm2070_vm3, %v4718_v53 }
 0x7c8   :  { %8889 = vmatmul.mubr.msk.bf16.vlgmr.msra.gmra.mrb[16].mxu0 %vm78_vm0, %v8885_v52 }
 0x7c9   :  { %4828 = vmatpush1.bf16.msra.mxu0 %v4740_v24  ;;  %4859 = vmatprep.mubr.bf16.mxu0 %v9789_v9 }
 0x7ca   :  { %8893 = vmatprep.subr.msk.bf16.mxu0 %vm2070_vm3, %v4889_v2 }
 0x7d0   :  { %8891 = vmatmul.mubr.msk.bf16.vlgmr.msra.gmra.mrb[20].mxu0 %vm78_vm0, %v8885_v52 }
 0x7d1   :  { %4915 = vmatpush1.bf16.msra.mxu0 %v4897_v7  ;;  %4946 = vmatprep.mubr.bf16.mxu0 %v9789_v9 }
 0x7d2   :  { %8895 = vmatprep.subr.msk.bf16.mxu0 %vm2070_vm3, %v4891_v8 }
 0x7d8   :  { %8894 = vmatmul.mubr.msk.bf16.vlgmr.msra.gmra.mrb[12].mxu0 %vm78_vm0, %v8892_v11 }
 0x7d9   :  { %4956 = vmatpush1.bf16.msra.mxu0 %v4903_v13  ;;  %4987 = vmatprep.mubr.bf16.mxu0 %v9789_v9 }
 0x7da   :  { %8897 = vmatprep.subr.msk.bf16.mxu0 %vm2070_vm3, %v4887_v12 }
 0x7e0   :  { %8896 = vmatmul.mubr.msk.bf16.vlgmr.msra.gmra.mrb[16].mxu0 %vm78_vm0, %v8892_v11 }
 0x7e1   :  { %4997 = vmatpush1.bf16.msra.mxu0 %v4909_v19  ;;  %5028 = vmatprep.mubr.bf16.mxu0 %v9789_v9 }
 0x7e2   :  { %8900 = vmatprep.subr.msk.bf16.mxu0 %vm2070_vm3, %v5058_v20 }
 0x7e8   :  { %8898 = vmatmul.mubr.msk.bf16.vlgmr.msra.gmra.mrb[20].mxu0 %vm78_vm0, %v8892_v11 }
 0x7e9   :  { %5084 = vmatpush1.bf16.msra.mxu0 %v5066_v26  ;;  %5115 = vmatprep.mubr.bf16.mxu0 %v9789_v9 }
 0x7ea   :  { %8902 = vmatprep.subr.msk.bf16.mxu0 %vm2070_vm3, %v5060_v27 }
 0x7f0   :  { %8901 = vmatmul.mubr.msk.bf16.vlgmr.msra.gmra.mrb[12].mxu0 %vm78_vm0, %v8899_v29 }
 0x7f1   :  { %5125 = vmatpush1.bf16.msra.mxu0 %v5072_v30  ;;  %5156 = vmatprep.mubr.bf16.mxu0 %v9789_v9 }
 0x7f2   :  { %8904 = vmatprep.subr.msk.bf16.mxu0 %vm2070_vm3, %v5056_v32 }
 0x7f8   :  { %8903 = vmatmul.mubr.msk.bf16.vlgmr.msra.gmra.mrb[16].mxu0 %vm78_vm0, %v8899_v29 }
 0x7f9   :  { %5166 = vmatpush1.bf16.msra.mxu0 %v5078_v34  ;;  %5197 = vmatprep.mubr.bf16.mxu0 %v9789_v9 }
 0x800   :  { %8905 = vmatmul.mubr.msk.bf16.vlgmr.msra.gmra.mrb[20].mxu0 %vm78_vm0, %v8899_v29 }
 0x801   :  { %6966 = vmatprep.mubr.bf16.mxu0 %v9789_v9 }
 0x8c3   :  { %v5117_v36 = vpop.f32.mrb[12].mxu0 }
 0x8c4   :  { %v5219_v37 = vmul.f32 %v5217_v35, %v5117_v36  ;;  %v5119_v1 = vpop.f32.mrb[13].mxu0 }
 0x8c5   :  { %v5220_v39 = vmul.f32 %v5217_v35, %v5119_v1  ;;  %v5121_v41 = vpop.f32.mrb[14].mxu0 }
 0x8c6   :  { %v5232_v42 = vadd.f32 %v5230_v38, %v5219_v37  ;;  %v5122_v43 = vpop.f32.mrb[15].mxu0  ;;  %v8971_v41 = vld [vmem:[%s11906_s6 + $0x10] sm:$0xff] }
 0x8c7   :  { %v5233_v44 = vadd.f32 %v5230_v38, %v5220_v39 }
 0x8c8   :  { %v5238_v45 = vmax.f32 %v5232_v42, 0.0  ;;  %v8972_v42 = vld [vmem:[%s11904_s7 + $0x10] sm:$0xff] }
 0x8c9   :  { %v5239_v46 = vmax.f32 %v5233_v44, 0.0 }
 0x8ca   :  { %v5244_v47 = vsel %vm11915_vm14, %v5238_v45, 0.0  ;;  %vm11918_vm14 = vcmask 744448  }
 0x8cb   :  { %v11203_v48 = vadd.f32 %v5244_v47, %v10521_v63  ;;  %v5245_v50 = vsel %vm11916_vm13, %v5239_v46, 0.0  ;;  %v5158_v51 = vpop.f32.mrb[16].mxu0  ;;  %vm11917_vm13 = vcmp.eq.s32.totalorder %v10873_v14, 1 }
 0x8cc   :  { %v11208_v52 = vadd.f32 %v5245_v50, %v10526_v25  ;;  %v5221_v53 = vmul.f32 %v5217_v35, %v5158_v51  ;;  %v5160_v54 = vpop.f32.mrb[17].mxu0 }
 0x8cd   :  { %v5222_v58 = vmul.f32 %v5217_v35, %v5160_v54  ;;  %5262 = vrot.lane.b32.xlu1 %v11203_v48, %s9790_s12  ;;  %v5162_v59 = vpop.f32.mrb[18].mxu0 }
 0x8ce   :  { %v5234_v61 = vadd.f32 %v5230_v38, %v5221_v53  ;;  %5264 = vrot.lane.b32.xlu0 %v11208_v52, %s9790_s12  ;;  %v5163_v63 = vpop.f32.mrb[19].mxu0  ;;  %v8909_v53 = vld [vmem:[%s11905_s5 + $0x4c] sm:$0xf] }
 0x8cf   :  { %v5235_v62 = vadd.f32 %v5230_v38, %v5222_v58 }
 0x8d0   :  { %v5240_v24 = vmax.f32 %v5234_v61, 0.0 }
 0x8d1   :  { %v5241_v2 = vmax.f32 %v5235_v62, 0.0 }
 0x8d2   :  { %v5246_v4 = vsel %vm11917_vm13, %v5240_v24, 0.0  ;;  %vm11919_vm13 = vmmov %vm11918_vm14 }
 0x8d3   :  { %v11217_v25 = vadd.f32 %v5246_v4, %v10536_v49  ;;  %v5247_v5 = vsel %vm63_vm1, %v5241_v2, 0.0  ;;  %v5199_v6 = vpop.f32.mrb[20].mxu0  ;;  %v8908_v4 = vld [vmem:[%s11905_s5 + $0x48] sm:$0xf] }
 0x8d4   :  { %v11222_v7 = vadd.f32 %v5247_v5, %v10531_v3  ;;  %v5223_v8 = vmul.f32 %v5217_v35, %v5199_v6  ;;  %v5201_v10 = vpop.f32.mrb[21].mxu0 }
 0x8d5   :  { %v5224_v11 = vmul.f32 %v5217_v35, %v5201_v10  ;;  %5266 = vrot.lane.b32.xlu1 %v11217_v25, %s9790_s12  ;;  %v5203_v12 = vpop.f32.mrb[22].mxu0 }
 0x8d6   :  { %v5236_v13 = vadd.f32 %v5230_v38, %v5223_v8  ;;  %5268 = vrot.lane.b32.xlu0 %v11222_v7, %s9790_s12  ;;  %v5204_v49 = vpop.f32.mrb[23].mxu0 }
 0x8d7   :  { %v5237_v55 = vadd.f32 %v5230_v38, %v5224_v11 }
 0x8d8   :  { %v5242_v56 = vmax.f32 %v5236_v13, 0.0 }
 0x8d9   :  { %v5243_v17 = vmax.f32 %v5237_v55, 0.0 }
 0x8da   :  { %v5248_v18 = vsel %vm64_vm15, %v5242_v56, 0.0 }
 0x8db   :  { %v11231_v3 = vadd.f32 %v5248_v18, %v10547_v15  ;;  %v5249_v19 = vsel %vm65_vm4, %v5243_v17, 0.0 }
 0x8dc   :  { %v11236_v20 = vadd.f32 %v5249_v19, %v10552_v0  ;;  %v8922_v19 = vld [vmem:[%s11905_s5 + $0x50] sm:$0xf] }
 0x8dd   :  { %5270 = vrot.lane.b32.xlu1 %v11231_v3, %s9790_s12 }
 0x8de   :  { %5272 = vrot.lane.b32.xlu0 %v11236_v20, %s9790_s12 }
 0x93f   :  { %v5263_v21 = vpop.permute.xlu1 %5262 }
 0x940   :  { %5285 = vst.msk [vmem:[#allocation2] sm:$0xff] %vm2106_vm5, %v5263_v21  ;;  %v5265_v22 = vpop.permute.xlu0 %5264 }
 0x941   :  { %v5274_v23 = vsel %vm66_vm2, %v5263_v21, %v5265_v22 }
 0x942   :  { %v11244_v15 = vpack.c.bf16 %v5274_v23, %v5274_v23 }
 0x944   :  { %5315 = vrot.lane.b32.xlu0 %v11244_v15, %s9791_s1 }
 0x947   :  { %v5291_v26 = vld [vmem:[#allocation2] sm:$0xff]  ;;  %v5267_v0 = vpop.permute.xlu1 %5266 }
 0x948   :  { %v11248_v27 = vpack.c.bf16 %v5291_v26, %v5291_v26  ;;  %v5269_v28 = vpop.permute.xlu0 %5268  ;;  %v5275_v29 = vsel %vm66_vm2, %v5265_v22, %v5267_v0 }
 0x949   :  { %v5276_v30 = vsel %vm66_vm2, %v5267_v0, %v5269_v28  ;;  %v11256_v40 = vpack.c.bf16 %v5275_v29, %v5275_v29 }
 0x94a   :  { %v11252_v32 = vpack.c.bf16 %v5276_v30, %v5276_v30  ;;  %5313 = vrot.lane.b32.xlu1 %v11248_v27, %s9791_s1  ;;  %v5478_v2 = vsel %vm2070_vm3, %v11248_v27, 0 }
 0x94b   :  { %v5484_v5 = vsel %vm2070_vm3, %v11256_v40, 0 }
 0x94c   :  { %5319 = vrot.lane.b32.xlu0 %v11252_v32, %s9791_s1 }
 0x94e   :  { %5317 = vrot.lane.b32.xlu1 %v11256_v40, %s9791_s1 }
 0x94f   :  { %v5271_v34 = vpop.permute.xlu1 %5270 }
 0x950   :  { %v5277_v35 = vsel %vm66_vm2, %v5269_v28, %v5271_v34  ;;  %v5273_v36 = vpop.permute.xlu0 %5272 }
 0x951   :  { %v11263_v37 = vpack.c.bf16 %v5277_v35, %v5277_v35  ;;  %v5278_v1 = vsel %vm66_vm2, %v5271_v34, %v5273_v36  ;;  %v8929_v36 = vld [vmem:[%s11905_s5 + $0x54] sm:$0xf] }
 0x952   :  { %5290 = vst.msk [vmem:[#allocation2 + $0x28] sm:$0xff] %vm2112_vm6, %v5278_v1 }
 0x953   :  { %5321 = vrot.lane.b32.xlu1 %v11263_v37, %s9791_s1  ;;  %v5490_v11 = vsel %vm2070_vm3, %v11263_v37, 0 }
 0x957   :  { %5620 = vrot.lane.b32.xlu1 %v11248_v27, %s9792_s15 }
 0x959   :  { %v5296_v38 = vld [vmem:[#allocation2 + $0x28] sm:$0xff] }
 0x95a   :  { %v11271_v39 = vpack.c.bf16 %v5296_v38, %v5296_v38 }
 0x95b   :  { %5624 = vrot.lane.b32.xlu1 %v11256_v40, %s9792_s15 }
 0x95c   :  { %5323 = vrot.lane.b32.xlu0 %v11271_v39, %s9791_s1 }
 0x95f   :  { %5628 = vrot.lane.b32.xlu1 %v11263_v37, %s9792_s15 }
 0x960   :  { %5622 = vrot.lane.b32.xlu0 %v11244_v15, %s9792_s15 }
 0x963   :  { %5789 = vrot.lane.b32.xlu1 %v11248_v27, %s9793_s16 }
 0x964   :  { %5626 = vrot.lane.b32.xlu0 %v11252_v32, %s9792_s15 }
 0x967   :  { %5793 = vrot.lane.b32.xlu1 %v11256_v40, %s9793_s16 }
 0x968   :  { %5630 = vrot.lane.b32.xlu0 %v11271_v39, %s9792_s15 }
 0x96b   :  { %5797 = vrot.lane.b32.xlu1 %v11263_v37, %s9793_s16 }
 0x96c   :  { %5791 = vrot.lane.b32.xlu0 %v11244_v15, %s9793_s16 }
 0x96f   :  { %5958 = vrot.lane.b32.xlu1 %v11248_v27, %s9794_s0 }
 0x970   :  { %5795 = vrot.lane.b32.xlu0 %v11252_v32, %s9793_s16 }
 0x973   :  { %5962 = vrot.lane.b32.xlu1 %v11256_v40, %s9794_s0 }
 0x974   :  { %5799 = vrot.lane.b32.xlu0 %v11271_v39, %s9793_s16 }
 0x977   :  { %5966 = vrot.lane.b32.xlu1 %v11263_v37, %s9794_s0 }
 0x978   :  { %5960 = vrot.lane.b32.xlu0 %v11244_v15, %s9794_s0 }
 0x97b   :  { %6127 = vrot.lane.b32.xlu1 %v11248_v27, %s9795_s17 }
 0x97c   :  { %5964 = vrot.lane.b32.xlu0 %v11252_v32, %s9794_s0 }
 0x97f   :  { %6131 = vrot.lane.b32.xlu1 %v11256_v40, %s9795_s17 }
 0x980   :  { %5968 = vrot.lane.b32.xlu0 %v11271_v39, %s9794_s0 }
 0x983   :  { %6135 = vrot.lane.b32.xlu1 %v11263_v37, %s9795_s17 }
 0x984   :  { %6129 = vrot.lane.b32.xlu0 %v11244_v15, %s9795_s17 }
 0x987   :  { %6296 = vrot.lane.b32.xlu1 %v11248_v27, %s9796_s18 }
 0x988   :  { %6133 = vrot.lane.b32.xlu0 %v11252_v32, %s9795_s17 }
 0x98b   :  { %6300 = vrot.lane.b32.xlu1 %v11256_v40, %s9796_s18 }
 0x98c   :  { %6137 = vrot.lane.b32.xlu0 %v11271_v39, %s9795_s17 }
 0x98f   :  { %6304 = vrot.lane.b32.xlu1 %v11263_v37, %s9796_s18 }
 0x990   :  { %6298 = vrot.lane.b32.xlu0 %v11244_v15, %s9796_s18 }
 0x993   :  { %6465 = vrot.lane.b32.xlu1 %v11248_v27, %s9797_s19 }
 0x994   :  { %6302 = vrot.lane.b32.xlu0 %v11252_v32, %s9796_s18 }
 0x997   :  { %6469 = vrot.lane.b32.xlu1 %v11256_v40, %s9797_s19 }
 0x998   :  { %6306 = vrot.lane.b32.xlu0 %v11271_v39, %s9796_s18 }
 0x99b   :  { %6473 = vrot.lane.b32.xlu1 %v11263_v37, %s9797_s19 }
 0x99c   :  { %6467 = vrot.lane.b32.xlu0 %v11244_v15, %s9797_s19 }
 0x99f   :  { %6634 = vrot.lane.b32.xlu1 %v11248_v27, %s9798_s20 }
 0x9a0   :  { %6471 = vrot.lane.b32.xlu0 %v11252_v32, %s9797_s19 }
 0x9a3   :  { %6638 = vrot.lane.b32.xlu1 %v11256_v40, %s9798_s20 }
 0x9a4   :  { %6475 = vrot.lane.b32.xlu0 %v11271_v39, %s9797_s19 }
 0x9a7   :  { %6642 = vrot.lane.b32.xlu1 %v11263_v37, %s9798_s20 }
 0x9a8   :  { %6636 = vrot.lane.b32.xlu0 %v11244_v15, %s9798_s20 }
 0x9ab   :  { %6805 = vperm.xlu1 %9495, %v8971_v41  }
 0x9ac   :  { %6640 = vrot.lane.b32.xlu0 %v11252_v32, %s9798_s20 }
 0x9b0   :  { %6644 = vrot.lane.b32.xlu0 %v11271_v39, %s9798_s20 }
 0x9b4   :  { %6818 = vperm.xlu0 %9494, %v8972_v42  }
 0x9b6   :  { %v5316_v44 = vpop.permute.xlu0 %5315 }
 0x9bc   :  { %v5314_v43 = vpop.permute.xlu1 %5313 }
 0x9bd   :  { %v5325_v45 = vsel %vm2147_vm7, %v5314_v43, %v5316_v44 }
 0x9be   :  { %v5334_v50 = vsel %vm2070_vm3, %v5325_v45, 0  ;;  %v5320_v51 = vpop.permute.xlu0 %5319 }
 0x9c0   :  { %v5318_v46 = vpop.permute.xlu1 %5317 }
 0x9c1   :  { %v5326_v47 = vsel %vm2147_vm7, %v5316_v44, %v5318_v46  ;;  %v5327_v54 = vsel %vm2147_vm7, %v5318_v46, %v5320_v51 }
 0x9c2   :  { %8910 = vmatprep.subr.msk.bf16.mxu1 %vm2070_vm3, %v5326_v47  ;;  %v5340_v61 = vsel %vm2070_vm3, %v5327_v54, 0  ;;  %v8936_v54 = vld [vmem:[%s11905_s5 + $0x58] sm:$0xf] }
 0x9c3   :  { %5352 = vmatpush1.bf16.msra.mxu1 %v5334_v50 }
 0x9c5   :  { %v5322_v58 = vpop.permute.xlu1 %5321 }
 0x9c6   :  { %8911 = vmatmul.mubr.msk.bf16.vlgmr.msra.gmra.mrb[28].mxu1 %vm78_vm0, %v8909_v53  ;;  %v5328_v59 = vsel %vm2147_vm7, %v5320_v51, %v5322_v58 }
 0x9c7   :  { %8912 = vmatprep.subr.msk.bf16.mxu1 %vm2070_vm3, %v5328_v59  ;;  %5424 = vmatprep.mubr.bf16.mxu1 %v9789_v9 }
 0x9c8   :  { %5393 = vmatpush1.bf16.msra.mxu1 %v5340_v61 }
 0x9c9   :  { %v5621_v6 = vpop.permute.xlu1 %5620 }
 0x9cd   :  { %v5625_v10 = vpop.permute.xlu1 %5624 }
 0x9ce   :  { %v5324_v63 = vpop.permute.xlu0 %5323  ;;  %8913 = vmatmul.mubr.msk.bf16.vlgmr.msra.gmra.mrb[32].mxu1 %vm78_vm0, %v8909_v53 }
 0x9cf   :  { %v5329_v62 = vsel %vm2147_vm7, %v5322_v58, %v5324_v63  ;;  %8914 = vmatprep.subr.msk.bf16.mxu1 %vm2070_vm3, %v5324_v63  ;;  %5465 = vmatprep.mubr.bf16.mxu1 %v9789_v9 }
 0x9d0   :  { %v5346_v24 = vsel %vm2070_vm3, %v5329_v62, 0 }
 0x9d1   :  { %5434 = vmatpush1.bf16.msra.mxu1 %v5346_v24  ;;  %v5629_v55 = vpop.permute.xlu1 %5628 }
 0x9d2   :  { %8916 = vmatprep.subr.msk.bf16.mxu1 %vm2070_vm3, %v11244_v15  ;;  %v5623_v8 = vpop.permute.xlu0 %5622 }
 0x9d3   :  { %v5633_v12 = vsel %vm2455_vm8, %v5623_v8, %v5625_v10  ;;  %v5632_v13 = vsel %vm2455_vm8, %v5621_v6, %v5623_v8 }
 0x9d4   :  { %v5641_v56 = vsel %vm2070_vm3, %v5632_v13, 0  ;;  %v8943_v13 = vld [vmem:[%s11905_s5 + $0x5c] sm:$0xf] }
 0x9d5   :  { %v5790_v23 = vpop.permute.xlu1 %5789 }
 0x9d6   :  { %8915 = vmatmul.mubr.msk.bf16.vlgmr.msra.gmra.mrb[36].mxu1 %vm78_vm0, %v8909_v53  ;;  %v5627_v49 = vpop.permute.xlu0 %5626 }
 0x9d7   :  { %5496 = vmatpush1.bf16.msra.mxu1 %v5478_v2  ;;  %5527 = vmatprep.mubr.bf16.mxu1 %v9789_v9  ;;  %v5635_v17 = vsel %vm2455_vm8, %v5627_v49, %v5629_v55  ;;  %v5634_v18 = vsel %vm2455_vm8, %v5625_v10, %v5627_v49 }
 0x9d8   :  { %8918 = vmatprep.subr.msk.bf16.mxu1 %vm2070_vm3, %v11252_v32  ;;  %v5647_v21 = vsel %vm2070_vm3, %v5634_v18, 0 }
 0x9d9   :  { %v5794_v27 = vpop.permute.xlu1 %5793 }
 0x9da   :  { %v5631_v22 = vpop.permute.xlu0 %5630 }
 0x9db   :  { %v5636_v15 = vsel %vm2455_vm8, %v5629_v55, %v5631_v22 }
 0x9dc   :  { %v5653_v0 = vsel %vm2070_vm3, %v5636_v15, 0 }
 0x9dd   :  { %v5798_v40 = vpop.permute.xlu1 %5797 }
 0x9de   :  { %8917 = vmatmul.mubr.msk.bf16.vlgmr.msra.gmra.mrb[28].mxu1 %vm78_vm0, %v8908_v4  ;;  %v5792_v26 = vpop.permute.xlu0 %5791 }
 0x9df   :  { %5537 = vmatpush1.bf16.msra.mxu1 %v5484_v5  ;;  %5568 = vmatprep.mubr.bf16.mxu1 %v9789_v9  ;;  %v5802_v28 = vsel %vm2625_vm9, %v5792_v26, %v5794_v27  ;;  %v5801_v29 = vsel %vm2625_vm9, %v5790_v23, %v5792_v26 }
 0x9e0   :  { %8920 = vmatprep.subr.msk.bf16.mxu1 %vm2070_vm3, %v11271_v39  ;;  %v5810_v32 = vsel %vm2070_vm3, %v5801_v29, 0  ;;  %v8950_v29 = vld [vmem:[%s11905_s5 + $0x60] sm:$0xf] }
 0x9e1   :  { %v5959_v38 = vpop.permute.xlu1 %5958 }
 0x9e2   :  { %v5796_v30 = vpop.permute.xlu0 %5795 }
 0x9e3   :  { %v5804_v34 = vsel %vm2625_vm9, %v5796_v30, %v5798_v40  ;;  %v5803_v35 = vsel %vm2625_vm9, %v5794_v27, %v5796_v30 }
 0x9e4   :  { %v5816_v37 = vsel %vm2070_vm3, %v5803_v35, 0 }
 0x9e5   :  { %v5963_v43 = vpop.permute.xlu1 %5962 }
 0x9e6   :  { %8919 = vmatmul.mubr.msk.bf16.vlgmr.msra.gmra.mrb[32].mxu1 %vm78_vm0, %v8908_v4  ;;  %v5800_v1 = vpop.permute.xlu0 %5799 }
 0x9e7   :  { %5578 = vmatpush1.bf16.msra.mxu1 %v5490_v11  ;;  %5609 = vmatprep.mubr.bf16.mxu1 %v9789_v9  ;;  %v5805_v39 = vsel %vm2625_vm9, %v5798_v40, %v5800_v1 }
 0x9e8   :  { %8923 = vmatprep.subr.msk.bf16.mxu1 %vm2070_vm3, %v5633_v12  ;;  %v5822_v42 = vsel %vm2070_vm3, %v5805_v39, 0 }
 0x9e9   :  { %v5967_v50 = vpop.permute.xlu1 %5966 }
 0x9ea   :  { %v5961_v41 = vpop.permute.xlu0 %5960 }
 0x9eb   :  { %v5971_v44 = vsel %vm2795_vm10, %v5961_v41, %v5963_v43  ;;  %v5970_v45 = vsel %vm2795_vm10, %v5959_v38, %v5961_v41 }
 0x9ec   :  { %v5979_v47 = vsel %vm2070_vm3, %v5970_v45, 0  ;;  %v8957_v45 = vld [vmem:[%s11905_s5 + $0x64] sm:$0xf] }
 0x9ed   :  { %v6128_v61 = vpop.permute.xlu1 %6127 }
 0x9ee   :  { %8921 = vmatmul.mubr.msk.bf16.vlgmr.msra.gmra.mrb[36].mxu1 %vm78_vm0, %v8908_v4  ;;  %v5965_v46 = vpop.permute.xlu0 %5964 }
 0x9ef   :  { %5659 = vmatpush1.bf16.msra.mxu1 %v5641_v56  ;;  %5690 = vmatprep.mubr.bf16.mxu1 %v9789_v9  ;;  %v5973_v51 = vsel %vm2795_vm10, %v5965_v46, %v5967_v50  ;;  %v5972_v53 = vsel %vm2795_vm10, %v5963_v43, %v5965_v46 }
 0x9f0   :  { %8925 = vmatprep.subr.msk.bf16.mxu1 %vm2070_vm3, %v5635_v17  ;;  %v5985_v58 = vsel %vm2070_vm3, %v5972_v53, 0 }
 0x9f1   :  { %v6132_v2 = vpop.permute.xlu1 %6131 }
 0x9f2   :  { %v5969_v59 = vpop.permute.xlu0 %5968 }
 0x9f3   :  { %v5974_v63 = vsel %vm2795_vm10, %v5967_v50, %v5969_v59 }
 0x9f4   :  { %v5991_v24 = vsel %vm2070_vm3, %v5974_v63, 0 }
 0x9f5   :  { %v6136_v10 = vpop.permute.xlu1 %6135 }
 0x9f6   :  { %8924 = vmatmul.mubr.msk.bf16.vlgmr.msra.gmra.mrb[28].mxu1 %vm78_vm0, %v8922_v19  ;;  %v6130_v62 = vpop.permute.xlu0 %6129 }
 0x9f7   :  { %5700 = vmatpush1.bf16.msra.mxu1 %v5647_v21  ;;  %5731 = vmatprep.mubr.bf16.mxu1 %v9789_v9  ;;  %v6140_v4 = vsel %vm2965_vm11, %v6130_v62, %v6132_v2  ;;  %v6139_v5 = vsel %vm2965_vm11, %v6128_v61, %v6130_v62 }
 0x9f8   :  { %8927 = vmatprep.subr.msk.bf16.mxu1 %vm2070_vm3, %v5631_v22  ;;  %v6148_v8 = vsel %vm2070_vm3, %v6139_v5, 0  ;;  %v8964_v5 = vld [vmem:[%s11905_s5 + $0x68] sm:$0xf] }
 0x9f9   :  { %v6297_v56 = vpop.permute.xlu1 %6296 }
 0x9fa   :  { %v6134_v6 = vpop.permute.xlu0 %6133 }
 0x9fb   :  { %v6142_v11 = vsel %vm2965_vm11, %v6134_v6, %v6136_v10  ;;  %v6141_v12 = vsel %vm2965_vm11, %v6132_v2, %v6134_v6 }
 0x9fc   :  { %v6154_v49 = vsel %vm2070_vm3, %v6141_v12, 0 }
 0x9fd   :  { %v6301_v21 = vpop.permute.xlu1 %6300 }
 0x9fe   :  { %8926 = vmatmul.mubr.msk.bf16.vlgmr.msra.gmra.mrb[32].mxu1 %vm78_vm0, %v8922_v19  ;;  %v6138_v55 = vpop.permute.xlu0 %6137 }
 0x9ff   :  { %5741 = vmatpush1.bf16.msra.mxu1 %v5653_v0  ;;  %5772 = vmatprep.mubr.bf16.mxu1 %v9789_v9  ;;  %v6143_v17 = vsel %vm2965_vm11, %v6136_v10, %v6138_v55 }
 0xa00   :  { %8930 = vmatprep.subr.msk.bf16.mxu1 %vm2070_vm3, %v5802_v28 }
 0xa01   :  { %v6305_v0 = vpop.permute.xlu1 %6304 }
 0xa02   :  { %v6299_v18 = vpop.permute.xlu0 %6298 }
 0xa03   :  { %v6309_v22 = vsel %vm11914_vm12, %v6299_v18, %v6301_v21  ;;  %v6308_v23 = vsel %vm11914_vm12, %v6297_v56, %v6299_v18 }
 0xa04   :  { %v6317_v26 = vsel %vm2070_vm3, %v6308_v23, 0 }
 0xa05   :  { %v6466_v40 = vpop.permute.xlu1 %6465 }
 0xa06   :  { %8928 = vmatmul.mubr.msk.bf16.vlgmr.msra.gmra.mrb[36].mxu1 %vm78_vm0, %v8922_v19  ;;  %v6160_v19 = vsel %vm2070_vm3, %v6143_v17, 0  ;;  %v6303_v15 = vpop.permute.xlu0 %6302 }
 0xa07   :  { %5828 = vmatpush1.bf16.msra.mxu1 %v5810_v32  ;;  %5859 = vmatprep.mubr.bf16.mxu1 %v9789_v9  ;;  %v6311_v27 = vsel %vm11914_vm12, %v6303_v15, %v6305_v0  ;;  %v6310_v28 = vsel %vm11914_vm12, %v6301_v21, %v6303_v15 }
 0xa08   :  { %8932 = vmatprep.subr.msk.bf16.mxu1 %vm2070_vm3, %v5804_v34  ;;  %v6323_v30 = vsel %vm2070_vm3, %v6310_v28, 0 }
 0xa0a   :  { %v6307_v32 = vpop.permute.xlu0 %6306 }
 0xa0b   :  { %v6312_v34 = vsel %vm11914_vm12, %v6305_v0, %v6307_v32  ;;  %vm11920_vm12 = vmmov %vm11919_vm13 }
 0xa0e   :  { %8931 = vmatmul.mubr.msk.bf16.vlgmr.msra.gmra.mrb[28].mxu1 %vm78_vm0, %v8929_v36  ;;  %v6468_v35 = vpop.permute.xlu0 %6467 }
 0xa0f   :  { %5869 = vmatpush1.bf16.msra.mxu1 %v5816_v37  ;;  %5900 = vmatprep.mubr.bf16.mxu1 %v9789_v9  ;;  %v6470_v37 = vpop.permute.xlu1 %6469  ;;  %v6477_v38 = vsel %vm11919_vm13, %v6466_v40, %v6468_v35  ;;  %vm11922_vm13 = vcmask 736256  }
 0xa10   :  { %8934 = vmatprep.subr.msk.bf16.mxu1 %vm2070_vm3, %v5800_v1  ;;  %v6478_v1 = vsel %vm11918_vm14, %v6468_v35, %v6470_v37  ;;  %v6486_v41 = vsel %vm2070_vm3, %v6477_v38, 0  ;;  %vm11921_vm14 = vmmov %vm11920_vm12 }
 0xa12   :  { %v6472_v39 = vpop.permute.xlu0 %6471 }
 0xa16   :  { %8933 = vmatmul.mubr.msk.bf16.vlgmr.msra.gmra.mrb[32].mxu1 %vm78_vm0, %v8929_v36 }
 0xa17   :  { %5910 = vmatpush1.bf16.msra.mxu1 %v5822_v42  ;;  %5941 = vmatprep.mubr.bf16.mxu1 %v9789_v9  ;;  %v6474_v42 = vpop.permute.xlu1 %6473 }
 0xa18   :  { %8937 = vmatprep.subr.msk.bf16.mxu1 %vm2070_vm3, %v5971_v44  ;;  %v6480_v43 = vsel %vm11920_vm12, %v6472_v39, %v6474_v42  ;;  %v6479_v44 = vsel %vm11921_vm14, %v6470_v37, %v6472_v39  ;;  %vm11923_vm14 = vmmov %vm11922_vm13 }
 0xa19   :  { %v6492_v46 = vsel %vm2070_vm3, %v6479_v44, 0 }
 0xa1b   :  { %v6635_v50 = vpop.permute.xlu1 %6634 }
 0xa1e   :  { %8935 = vmatmul.mubr.msk.bf16.vlgmr.msra.gmra.mrb[36].mxu1 %vm78_vm0, %v8929_v36  ;;  %v6329_v36 = vsel %vm2070_vm3, %v6312_v34, 0 }
 0xa1f   :  { %5997 = vmatpush1.bf16.msra.mxu1 %v5979_v47  ;;  %6028 = vmatprep.mubr.bf16.mxu1 %v9789_v9  ;;  %v6476_v47 = vpop.permute.xlu0 %6475 }
 0xa20   :  { %8939 = vmatprep.subr.msk.bf16.mxu1 %vm2070_vm3, %v5973_v51  ;;  %v6481_v51 = vsel %vm11920_vm12, %v6474_v42, %v6476_v47  ;;  %vm11924_vm12 = vmmov %vm11922_vm13 }
 0xa23   :  { %v6637_v53 = vpop.permute.xlu0 %6636 }
 0xa24   :  { %v6646_v61 = vsel %vm11923_vm14, %v6635_v50, %v6637_v53  ;;  %vm11926_vm14 = vmmov %vm11924_vm12 }
 0xa25   :  { %v6655_v62 = vsel %vm2070_vm3, %v6646_v61, 0 }
 0xa26   :  { %8938 = vmatmul.mubr.msk.bf16.vlgmr.msra.gmra.mrb[28].mxu1 %vm78_vm0, %v8936_v54 }
 0xa27   :  { %6038 = vmatpush1.bf16.msra.mxu1 %v5985_v58  ;;  %6069 = vmatprep.mubr.bf16.mxu1 %v9789_v9  ;;  %v6639_v58 = vpop.permute.xlu1 %6638  ;;  %v6641_v63 = vpop.permute.xlu0 %6640 }
 0xa28   :  { %8941 = vmatprep.subr.msk.bf16.mxu1 %vm2070_vm3, %v5969_v59  ;;  %v6647_v59 = vsel %vm11922_vm13, %v6637_v53, %v6639_v58  ;;  %vm11925_vm13 = vmmov %vm11924_vm12 }
 0xa2e   :  { %8940 = vmatmul.mubr.msk.bf16.vlgmr.msra.gmra.mrb[32].mxu1 %vm78_vm0, %v8936_v54 }
 0xa2f   :  { %6079 = vmatpush1.bf16.msra.mxu1 %v5991_v24  ;;  %6110 = vmatprep.mubr.bf16.mxu1 %v9789_v9  ;;  %v6643_v24 = vpop.permute.xlu1 %6642 }
 0xa30   :  { %8944 = vmatprep.subr.msk.bf16.mxu1 %vm2070_vm3, %v6140_v4  ;;  %v6649_v2 = vsel %vm11924_vm12, %v6641_v63, %v6643_v24  ;;  %v6648_v4 = vsel %vm11925_vm13, %v6639_v58, %v6641_v63  ;;  %vm11927_vm12 = vcmp.eq.s32.totalorder %v10862_v57, 1  ;;  %vm11928_vm13 = vcmp.eq.s32.totalorder %v10864_v60, 1 }
 0xa31   :  { %v6661_v6 = vsel %vm2070_vm3, %v6648_v4, 0 }
 0xa33   :  { %v6806_v12 = vpop.permute.xlu1 %6805 }
 0xa36   :  { %8942 = vmatmul.mubr.msk.bf16.vlgmr.msra.gmra.mrb[36].mxu1 %vm78_vm0, %v8936_v54  ;;  %v6498_v54 = vsel %vm2070_vm3, %v6481_v51, 0 }
 0xa37   :  { %6166 = vmatpush1.bf16.msra.mxu1 %v6148_v8  ;;  %6197 = vmatprep.mubr.bf16.mxu1 %v9789_v9  ;;  %v6645_v8 = vpop.permute.xlu0 %6644 }
 0xa38   :  { %8946 = vmatprep.subr.msk.bf16.mxu1 %vm2070_vm3, %v6142_v11  ;;  %v6650_v10 = vsel %vm11926_vm14, %v6643_v24, %v6645_v8  ;;  %vm11929_vm14 = vcmp.eq.s32.totalorder %v10873_v14, 1 }
 0xa39   :  { %v6667_v11 = vsel %vm2070_vm3, %v6650_v10, 0 }
 0xa3b   :  { %v6819_v56 = vpop.permute.xlu0 %6818 }
 0xa3e   :  { %8945 = vmatmul.mubr.msk.bf16.vlgmr.msra.gmra.mrb[28].mxu1 %vm78_vm0, %v8943_v13 }
 0xa3f   :  { %6207 = vmatpush1.bf16.msra.mxu1 %v6154_v49  ;;  %6238 = vmatprep.mubr.bf16.mxu1 %v9789_v9 }
 0xa40   :  { %8948 = vmatprep.subr.msk.bf16.mxu1 %vm2070_vm3, %v6138_v55 }
 0xa46   :  { %8947 = vmatmul.mubr.msk.bf16.vlgmr.msra.gmra.mrb[32].mxu1 %vm78_vm0, %v8943_v13 }
 0xa47   :  { %6248 = vmatpush1.bf16.msra.mxu1 %v6160_v19  ;;  %6279 = vmatprep.mubr.bf16.mxu1 %v9789_v9 }
 0xa48   :  { %8951 = vmatprep.subr.msk.bf16.mxu1 %vm2070_vm3, %v6309_v22 }
 0xa4e   :  { %8949 = vmatmul.mubr.msk.bf16.vlgmr.msra.gmra.mrb[36].mxu1 %vm78_vm0, %v8943_v13 }
 0xa4f   :  { %6335 = vmatpush1.bf16.msra.mxu1 %v6317_v26  ;;  %6366 = vmatprep.mubr.bf16.mxu1 %v9789_v9 }
 0xa50   :  { %8953 = vmatprep.subr.msk.bf16.mxu1 %vm2070_vm3, %v6311_v27 }
 0xa56   :  { %8952 = vmatmul.mubr.msk.bf16.vlgmr.msra.gmra.mrb[28].mxu1 %vm78_vm0, %v8950_v29 }
 0xa57   :  { %6376 = vmatpush1.bf16.msra.mxu1 %v6323_v30  ;;  %6407 = vmatprep.mubr.bf16.mxu1 %v9789_v9 }
 0xa58   :  { %8955 = vmatprep.subr.msk.bf16.mxu1 %vm2070_vm3, %v6307_v32 }
 0xa5e   :  { %8954 = vmatmul.mubr.msk.bf16.vlgmr.msra.gmra.mrb[32].mxu1 %vm78_vm0, %v8950_v29 }
 0xa5f   :  { %6417 = vmatpush1.bf16.msra.mxu1 %v6329_v36  ;;  %6448 = vmatprep.mubr.bf16.mxu1 %v9789_v9 }
 0xa60   :  { %8958 = vmatprep.subr.msk.bf16.mxu1 %vm2070_vm3, %v6478_v1 }
 0xa66   :  { %8956 = vmatmul.mubr.msk.bf16.vlgmr.msra.gmra.mrb[36].mxu1 %vm78_vm0, %v8950_v29 }
 0xa67   :  { %6504 = vmatpush1.bf16.msra.mxu1 %v6486_v41  ;;  %6535 = vmatprep.mubr.bf16.mxu1 %v9789_v9 }
 0xa68   :  { %8960 = vmatprep.subr.msk.bf16.mxu1 %vm2070_vm3, %v6480_v43 }
 0xa6e   :  { %8959 = vmatmul.mubr.msk.bf16.vlgmr.msra.gmra.mrb[28].mxu1 %vm78_vm0, %v8957_v45 }
 0xa6f   :  { %6545 = vmatpush1.bf16.msra.mxu1 %v6492_v46  ;;  %6576 = vmatprep.mubr.bf16.mxu1 %v9789_v9 }
 0xa70   :  { %8962 = vmatprep.subr.msk.bf16.mxu1 %vm2070_vm3, %v6476_v47 }
 0xa76   :  { %8961 = vmatmul.mubr.msk.bf16.vlgmr.msra.gmra.mrb[32].mxu1 %vm78_vm0, %v8957_v45 }
 0xa77   :  { %6586 = vmatpush1.bf16.msra.mxu1 %v6498_v54  ;;  %6617 = vmatprep.mubr.bf16.mxu1 %v9789_v9 }
 0xa78   :  { %8965 = vmatprep.subr.msk.bf16.mxu1 %vm2070_vm3, %v6647_v59 }
 0xa7e   :  { %8963 = vmatmul.mubr.msk.bf16.vlgmr.msra.gmra.mrb[36].mxu1 %vm78_vm0, %v8957_v45 }
 0xa7f   :  { %6673 = vmatpush1.bf16.msra.mxu1 %v6655_v62  ;;  %6704 = vmatprep.mubr.bf16.mxu1 %v9789_v9 }
 0xa80   :  { %8967 = vmatprep.subr.msk.bf16.mxu1 %vm2070_vm3, %v6649_v2 }
 0xa86   :  { %8966 = vmatmul.mubr.msk.bf16.vlgmr.msra.gmra.mrb[28].mxu1 %vm78_vm0, %v8964_v5 }
 0xa87   :  { %6714 = vmatpush1.bf16.msra.mxu1 %v6661_v6  ;;  %6745 = vmatprep.mubr.bf16.mxu1 %v9789_v9 }
 0xa88   :  { %8969 = vmatprep.subr.msk.bf16.mxu1 %vm2070_vm3, %v6645_v8 }
 0xa8e   :  { %8968 = vmatmul.mubr.msk.bf16.vlgmr.msra.gmra.mrb[32].mxu1 %vm78_vm0, %v8964_v5 }
 0xa8f   :  { %6755 = vmatpush1.bf16.msra.mxu1 %v6667_v11  ;;  %6786 = vmatprep.mubr.bf16.mxu1 %v9789_v9 }
 0xa96   :  { %8970 = vmatmul.mubr.msk.bf16.vlgmr.msra.gmra.mrb[36].mxu1 %vm78_vm0, %v8964_v5 }
 0xb59   :  { %v6706_v13 = vpop.f32.mrb[28].mxu1 }
 0xb5a   :  { %v6808_v49 = vmul.f32 %v6806_v12, %v6706_v13  ;;  %v6708_v55 = vpop.f32.mrb[29].mxu1 }
 0xb5b   :  { %v6809_v17 = vmul.f32 %v6806_v12, %v6708_v55  ;;  %v6710_v18 = vpop.f32.mrb[30].mxu1 }
 0xb5c   :  { %v6821_v19 = vadd.f32 %v6819_v56, %v6808_v49  ;;  %v6711_v21 = vpop.f32.mrb[31].mxu1  ;;  %v9036_v18 = vld [vmem:[%s11906_s6 + $0x18] sm:$0xff] }
 0xb5d   :  { %v6822_v22 = vadd.f32 %v6819_v56, %v6809_v17 }
 0xb5e   :  { %v6827_v23 = vmax.f32 %v6821_v19, 0.0  ;;  %v9037_v19 = vld [vmem:[%s11904_s7 + $0x18] sm:$0xff] }
 0xb5f   :  { %v6828_v15 = vmax.f32 %v6822_v22, 0.0 }
 0xb60   :  { %v6833_v26 = vsel %vm11927_vm12, %v6827_v23, 0.0 }
 0xb61   :  { %v6747_v0 = vpop.f32.mrb[32].mxu1  ;;  %6845 = vrot.lane.b32.xlu1 %v6833_v26, %s9790_s12  ;;  %v6834_v27 = vsel %vm11928_vm13, %v6828_v15, 0.0 }
 0xb62   :  { %v6810_v28 = vmul.f32 %v6806_v12, %v6747_v0  ;;  %v6749_v29 = vpop.f32.mrb[33].mxu1  ;;  %6847 = vrot.lane.b32.xlu0 %v6834_v27, %s9790_s12 }
 0xb63   :  { %v6811_v30 = vmul.f32 %v6806_v12, %v6749_v29  ;;  %v6751_v32 = vpop.f32.mrb[34].mxu1 }
 0xb64   :  { %v6823_v40 = vadd.f32 %v6819_v56, %v6810_v28  ;;  %v6752_v34 = vpop.f32.mrb[35].mxu1  ;;  %v8974_v28 = vld [vmem:[%s11905_s5 + $0x70] sm:$0xf] }
 0xb65   :  { %v6824_v35 = vadd.f32 %v6819_v56, %v6811_v30 }
 0xb66   :  { %v6829_v36 = vmax.f32 %v6823_v40, 0.0 }
 0xb67   :  { %v6830_v37 = vmax.f32 %v6824_v35, 0.0 }
 0xb68   :  { %v6835_v1 = vsel %vm11929_vm14, %v6829_v36, 0.0  ;;  %vm11940_vm14 = vcmask 736256  }
 0xb69   :  { %v6788_v38 = vpop.f32.mrb[36].mxu1  ;;  %6849 = vrot.lane.b32.xlu1 %v6835_v1, %s9790_s12  ;;  %v6836_v39 = vsel %vm63_vm1, %v6830_v37, 0.0  ;;  %v8973_v1 = vld [vmem:[%s11905_s5 + $0x6c] sm:$0xf] }
 0xb6a   :  { %v6812_v41 = vmul.f32 %v6806_v12, %v6788_v38  ;;  %v6790_v42 = vpop.f32.mrb[37].mxu1  ;;  %6851 = vrot.lane.b32.xlu0 %v6836_v39, %s9790_s12 }
 0xb6b   :  { %v6813_v43 = vmul.f32 %v6806_v12, %v6790_v42  ;;  %v6792_v44 = vpop.f32.mrb[38].mxu1 }
 0xb6c   :  { %v6825_v45 = vadd.f32 %v6819_v56, %v6812_v41  ;;  %v6793_v46 = vpop.f32.mrb[39].mxu1 }
 0xb6d   :  { %v6826_v47 = vadd.f32 %v6819_v56, %v6813_v43 }
 0xb6e   :  { %v6831_v50 = vmax.f32 %v6825_v45, 0.0 }
 0xb6f   :  { %v6832_v51 = vmax.f32 %v6826_v47, 0.0 }
 0xb70   :  { %v6837_v53 = vsel %vm64_vm15, %v6831_v50, 0.0 }
 0xb71   :  { %6853 = vrot.lane.b32.xlu1 %v6837_v53, %s9790_s12  ;;  %v6838_v54 = vsel %vm65_vm4, %v6832_v51, 0.0 }
 0xb72   :  { %6855 = vrot.lane.b32.xlu0 %v6838_v54, %s9790_s12  ;;  %v8987_v54 = vld [vmem:[%s11905_s5 + $0x74] sm:$0xf] }
 0xbd3   :  { %v6846_v58 = vpop.permute.xlu1 %6845 }
 0xbd4   :  { %6868 = vst.msk [vmem:[#allocation2] sm:$0xff] %vm2106_vm5, %v6846_v58  ;;  %v6848_v59 = vpop.permute.xlu0 %6847 }
 0xbd5   :  { %v6857_v61 = vsel %vm66_vm2, %v6846_v58, %v6848_v59 }
 0xbd6   :  { %v11563_v63 = vpack.c.bf16 %v6857_v61, %v6857_v61 }
 0xbd8   :  { %6898 = vrot.lane.b32.xlu0 %v11563_v63, %s9791_s1 }
 0xbdb   :  { %v6874_v62 = vld [vmem:[#allocation2] sm:$0xff]  ;;  %v6850_v24 = vpop.permute.xlu1 %6849 }
 0xbdc   :  { %v11567_v2 = vpack.c.bf16 %v6874_v62, %v6874_v62  ;;  %v6858_v4 = vsel %vm66_vm2, %v6848_v59, %v6850_v24  ;;  %v6852_v5 = vpop.permute.xlu0 %6851 }
 0xbdd   :  { %v6859_v6 = vsel %vm66_vm2, %v6850_v24, %v6852_v5  ;;  %v11575_v10 = vpack.c.bf16 %v6858_v4, %v6858_v4 }
 0xbde   :  { %v11571_v8 = vpack.c.bf16 %v6859_v6, %v6859_v6  ;;  %6896 = vrot.lane.b32.xlu1 %v11567_v2, %s9791_s1  ;;  %v7061_v37 = vsel %vm2070_vm3, %v11567_v2, 0 }
 0xbdf   :  { %v7067_v38 = vsel %vm2070_vm3, %v11575_v10, 0 }
 0xbe0   :  { %6902 = vrot.lane.b32.xlu0 %v11571_v8, %s9791_s1 }
 0xbe2   :  { %6900 = vrot.lane.b32.xlu1 %v11575_v10, %s9791_s1 }
 0xbe3   :  { %v6854_v11 = vpop.permute.xlu1 %6853 }
 0xbe4   :  { %v6860_v12 = vsel %vm66_vm2, %v6852_v5, %v6854_v11  ;;  %v6856_v13 = vpop.permute.xlu0 %6855 }
 0xbe5   :  { %v11582_v49 = vpack.c.bf16 %v6860_v12, %v6860_v12  ;;  %v6861_v55 = vsel %vm66_vm2, %v6854_v11, %v6856_v13  ;;  %v8994_v13 = vld [vmem:[%s11905_s5 + $0x78] sm:$0xf]  ;;  %vm11930_vm2 = vcmask 752640  }
 0xbe6   :  { %6873 = vst.msk [vmem:[#allocation2 + $0x28] sm:$0xff] %vm2112_vm6, %v6861_v55  ;;  %vm11931_vm5 = vmmov %vm11930_vm2 }
 0xbe7   :  { %6904 = vrot.lane.b32.xlu1 %v11582_v49, %s9791_s1  ;;  %v7073_v43 = vsel %vm2070_vm3, %v11582_v49, 0  ;;  %vm11932_vm6 = vmmov %vm11930_vm2 }
 0xbeb   :  { %7203 = vrot.lane.b32.xlu1 %v11567_v2, %s9792_s15 }
 0xbed   :  { %v6879_v56 = vld [vmem:[#allocation2 + $0x28] sm:$0xff] }
 0xbee   :  { %v11590_v17 = vpack.c.bf16 %v6879_v56, %v6879_v56 }
 0xbef   :  { %7207 = vrot.lane.b32.xlu1 %v11575_v10, %s9792_s15 }
 0xbf0   :  { %6906 = vrot.lane.b32.xlu0 %v11590_v17, %s9791_s1 }
 0xbf3   :  { %7211 = vrot.lane.b32.xlu1 %v11582_v49, %s9792_s15 }
 0xbf4   :  { %7205 = vrot.lane.b32.xlu0 %v11563_v63, %s9792_s15 }
 0xbf7   :  { %7372 = vrot.lane.b32.xlu1 %v11567_v2, %s9793_s16 }
 0xbf8   :  { %7209 = vrot.lane.b32.xlu0 %v11571_v8, %s9792_s15 }
 0xbfb   :  { %7376 = vrot.lane.b32.xlu1 %v11575_v10, %s9793_s16 }
 0xbfc   :  { %7213 = vrot.lane.b32.xlu0 %v11590_v17, %s9792_s15 }
 0xbff   :  { %7380 = vrot.lane.b32.xlu1 %v11582_v49, %s9793_s16 }
 0xc00   :  { %7374 = vrot.lane.b32.xlu0 %v11563_v63, %s9793_s16 }
 0xc03   :  { %7541 = vrot.lane.b32.xlu1 %v11567_v2, %s9794_s0 }
 0xc04   :  { %7378 = vrot.lane.b32.xlu0 %v11571_v8, %s9793_s16 }
 0xc07   :  { %7545 = vrot.lane.b32.xlu1 %v11575_v10, %s9794_s0 }
 0xc08   :  { %7382 = vrot.lane.b32.xlu0 %v11590_v17, %s9793_s16 }
 0xc0b   :  { %7549 = vrot.lane.b32.xlu1 %v11582_v49, %s9794_s0 }
 0xc0c   :  { %7543 = vrot.lane.b32.xlu0 %v11563_v63, %s9794_s0 }
 0xc0f   :  { %7710 = vrot.lane.b32.xlu1 %v11567_v2, %s9795_s17 }
 0xc10   :  { %7547 = vrot.lane.b32.xlu0 %v11571_v8, %s9794_s0 }
 0xc13   :  { %7714 = vrot.lane.b32.xlu1 %v11575_v10, %s9795_s17 }
 0xc14   :  { %7551 = vrot.lane.b32.xlu0 %v11590_v17, %s9794_s0 }
 0xc17   :  { %7718 = vrot.lane.b32.xlu1 %v11582_v49, %s9795_s17 }
 0xc18   :  { %7712 = vrot.lane.b32.xlu0 %v11563_v63, %s9795_s17 }
 0xc1b   :  { %7879 = vrot.lane.b32.xlu1 %v11567_v2, %s9796_s18 }
 0xc1c   :  { %7716 = vrot.lane.b32.xlu0 %v11571_v8, %s9795_s17 }
 0xc1f   :  { %7883 = vrot.lane.b32.xlu1 %v11575_v10, %s9796_s18 }
 0xc20   :  { %7720 = vrot.lane.b32.xlu0 %v11590_v17, %s9795_s17 }
 0xc23   :  { %7887 = vrot.lane.b32.xlu1 %v11582_v49, %s9796_s18 }
 0xc24   :  { %7881 = vrot.lane.b32.xlu0 %v11563_v63, %s9796_s18 }
 0xc27   :  { %8048 = vrot.lane.b32.xlu1 %v11567_v2, %s9797_s19 }
 0xc28   :  { %7885 = vrot.lane.b32.xlu0 %v11571_v8, %s9796_s18 }
 0xc2b   :  { %8052 = vrot.lane.b32.xlu1 %v11575_v10, %s9797_s19 }
 0xc2c   :  { %7889 = vrot.lane.b32.xlu0 %v11590_v17, %s9796_s18 }
 0xc2f   :  { %8056 = vrot.lane.b32.xlu1 %v11582_v49, %s9797_s19 }
 0xc30   :  { %8050 = vrot.lane.b32.xlu0 %v11563_v63, %s9797_s19 }
 0xc33   :  { %8217 = vrot.lane.b32.xlu1 %v11567_v2, %s9798_s20 }
 0xc34   :  { %8054 = vrot.lane.b32.xlu0 %v11571_v8, %s9797_s19 }
 0xc37   :  { %8221 = vrot.lane.b32.xlu1 %v11575_v10, %s9798_s20 }
 0xc38   :  { %8058 = vrot.lane.b32.xlu0 %v11590_v17, %s9797_s19 }
 0xc3b   :  { %8225 = vrot.lane.b32.xlu1 %v11582_v49, %s9798_s20 }
 0xc3c   :  { %8219 = vrot.lane.b32.xlu0 %v11563_v63, %s9798_s20 }
 0xc3f   :  { %8388 = vperm.xlu1 %9495, %v9036_v18  }
 0xc40   :  { %8223 = vrot.lane.b32.xlu0 %v11571_v8, %s9798_s20 }
 0xc44   :  { %8227 = vrot.lane.b32.xlu0 %v11590_v17, %s9798_s20 }
 0xc48   :  { %8401 = vperm.xlu0 %9494, %v9037_v19  }
 0xc4a   :  { %v6899_v22 = vpop.permute.xlu0 %6898 }
 0xc50   :  { %v6897_v21 = vpop.permute.xlu1 %6896 }
 0xc51   :  { %v6908_v23 = vsel %vm2147_vm7, %v6897_v21, %v6899_v22 }
 0xc52   :  { %v6917_v0 = vsel %vm2070_vm3, %v6908_v23, 0  ;;  %v6903_v27 = vpop.permute.xlu0 %6902 }
 0xc54   :  { %v6901_v15 = vpop.permute.xlu1 %6900 }
 0xc55   :  { %v6909_v26 = vsel %vm2147_vm7, %v6899_v22, %v6901_v15  ;;  %v6910_v29 = vsel %vm2147_vm7, %v6901_v15, %v6903_v27 }
 0xc56   :  { %8975 = vmatprep.subr.msk.bf16.mxu0 %vm2070_vm3, %v6909_v26  ;;  %v6923_v40 = vsel %vm2070_vm3, %v6910_v29, 0  ;;  %v9001_v29 = vld [vmem:[%s11905_s5 + $0x7c] sm:$0xf] }
 0xc57   :  { %6935 = vmatpush1.bf16.msra.mxu0 %v6917_v0 }
 0xc59   :  { %v6905_v30 = vpop.permute.xlu1 %6904 }
 0xc5a   :  { %8976 = vmatmul.mubr.msk.bf16.vlgmr.msra.gmra.mrb[24].mxu0 %vm78_vm0, %v8974_v28  ;;  %v6911_v32 = vsel %vm2147_vm7, %v6903_v27, %v6905_v30 }
 0xc5b   :  { %8977 = vmatprep.subr.msk.bf16.mxu0 %vm2070_vm3, %v6911_v32  ;;  %7007 = vmatprep.mubr.bf16.mxu0 %v9789_v9 }
 0xc5c   :  { %6976 = vmatpush1.bf16.msra.mxu0 %v6923_v40 }
 0xc5d   :  { %v7204_v39 = vpop.permute.xlu1 %7203 }
 0xc61   :  { %v7208_v42 = vpop.permute.xlu1 %7207 }
 0xc62   :  { %v6907_v34 = vpop.permute.xlu0 %6906  ;;  %8978 = vmatmul.mubr.msk.bf16.vlgmr.msra.gmra.mrb[28].mxu0 %vm78_vm0, %v8974_v28 }
 0xc63   :  { %v6912_v35 = vsel %vm2147_vm7, %v6905_v30, %v6907_v34  ;;  %8979 = vmatprep.subr.msk.bf16.mxu0 %vm2070_vm3, %v6907_v34  ;;  %7048 = vmatprep.mubr.bf16.mxu0 %v9789_v9  ;;  %vm11933_vm7 = vmmov %vm11930_vm2 }
 0xc64   :  { %v6929_v36 = vsel %vm2070_vm3, %v6912_v35, 0 }
 0xc65   :  { %7017 = vmatpush1.bf16.msra.mxu0 %v6929_v36  ;;  %v7212_v50 = vpop.permute.xlu1 %7211 }
 0xc66   :  { %8981 = vmatprep.subr.msk.bf16.mxu0 %vm2070_vm3, %v11563_v63  ;;  %v7206_v41 = vpop.permute.xlu0 %7205 }
 0xc67   :  { %v7216_v44 = vsel %vm2455_vm8, %v7206_v41, %v7208_v42  ;;  %v7215_v45 = vsel %vm2455_vm8, %v7204_v39, %v7206_v41 }
 0xc68   :  { %v7224_v47 = vsel %vm2070_vm3, %v7215_v45, 0  ;;  %v9008_v45 = vld [vmem:[%s11905_s5 + $0x80] sm:$0xf] }
 0xc69   :  { %v7373_v61 = vpop.permute.xlu1 %7372 }
 0xc6a   :  { %8980 = vmatmul.mubr.msk.bf16.vlgmr.msra.gmra.mrb[32].mxu0 %vm78_vm0, %v8974_v28  ;;  %v7210_v46 = vpop.permute.xlu0 %7209 }
 0xc6b   :  { %7079 = vmatpush1.bf16.msra.mxu0 %v7061_v37  ;;  %7110 = vmatprep.mubr.bf16.mxu0 %v9789_v9  ;;  %v7218_v51 = vsel %vm2455_vm8, %v7210_v46, %v7212_v50  ;;  %v7217_v53 = vsel %vm2455_vm8, %v7208_v42, %v7210_v46 }
 0xc6c   :  { %8983 = vmatprep.subr.msk.bf16.mxu0 %vm2070_vm3, %v11571_v8  ;;  %v7230_v58 = vsel %vm2070_vm3, %v7217_v53, 0 }
 0xc6d   :  { %v7377_v2 = vpop.permute.xlu1 %7376 }
 0xc6e   :  { %v7214_v59 = vpop.permute.xlu0 %7213 }
 0xc6f   :  { %v7219_v63 = vsel %vm2455_vm8, %v7212_v50, %v7214_v59  ;;  %vm11934_vm8 = vmmov %vm11930_vm2 }
 0xc70   :  { %v7236_v24 = vsel %vm2070_vm3, %v7219_v63, 0 }
 0xc71   :  { %v7381_v10 = vpop.permute.xlu1 %7380 }
 0xc72   :  { %8982 = vmatmul.mubr.msk.bf16.vlgmr.msra.gmra.mrb[24].mxu0 %vm78_vm0, %v8973_v1  ;;  %v7375_v62 = vpop.permute.xlu0 %7374 }
 0xc73   :  { %7120 = vmatpush1.bf16.msra.mxu0 %v7067_v38  ;;  %7151 = vmatprep.mubr.bf16.mxu0 %v9789_v9  ;;  %v7385_v4 = vsel %vm2625_vm9, %v7375_v62, %v7377_v2  ;;  %v7384_v5 = vsel %vm2625_vm9, %v7373_v61, %v7375_v62 }
 0xc74   :  { %8985 = vmatprep.subr.msk.bf16.mxu0 %vm2070_vm3, %v11590_v17  ;;  %v7393_v8 = vsel %vm2070_vm3, %v7384_v5, 0  ;;  %v9015_v5 = vld [vmem:[%s11905_s5 + $0x84] sm:$0xf] }
 0xc75   :  { %v7542_v56 = vpop.permute.xlu1 %7541 }
 0xc76   :  { %v7379_v6 = vpop.permute.xlu0 %7378 }
 0xc77   :  { %v7387_v11 = vsel %vm2625_vm9, %v7379_v6, %v7381_v10  ;;  %v7386_v12 = vsel %vm2625_vm9, %v7377_v2, %v7379_v6 }
 0xc78   :  { %v7399_v49 = vsel %vm2070_vm3, %v7386_v12, 0 }
 0xc79   :  { %v7546_v21 = vpop.permute.xlu1 %7545 }
 0xc7a   :  { %8984 = vmatmul.mubr.msk.bf16.vlgmr.msra.gmra.mrb[28].mxu0 %vm78_vm0, %v8973_v1  ;;  %v7383_v55 = vpop.permute.xlu0 %7382 }
 0xc7b   :  { %7161 = vmatpush1.bf16.msra.mxu0 %v7073_v43  ;;  %7192 = vmatprep.mubr.bf16.mxu0 %v9789_v9  ;;  %v7388_v17 = vsel %vm2625_vm9, %v7381_v10, %v7383_v55  ;;  %vm11935_vm9 = vcmask 744448  }
 0xc7c   :  { %8988 = vmatprep.subr.msk.bf16.mxu0 %vm2070_vm3, %v7216_v44  ;;  %v7405_v19 = vsel %vm2070_vm3, %v7388_v17, 0  ;;  %vm11938_vm12 = vmmov %vm11935_vm9 }
 0xc7d   :  { %v7550_v0 = vpop.permute.xlu1 %7549  ;;  %vm11939_vm13 = vmmov %vm11935_vm9 }
 0xc7e   :  { %v7544_v18 = vpop.permute.xlu0 %7543 }
 0xc7f   :  { %v7554_v22 = vsel %vm2795_vm10, %v7544_v18, %v7546_v21  ;;  %v7553_v23 = vsel %vm2795_vm10, %v7542_v56, %v7544_v18 }
 0xc80   :  { %v7562_v26 = vsel %vm2070_vm3, %v7553_v23, 0  ;;  %v9022_v23 = vld [vmem:[%s11905_s5 + $0x88] sm:$0xf] }
 0xc81   :  { %v7711_v40 = vpop.permute.xlu1 %7710 }
 0xc82   :  { %8986 = vmatmul.mubr.msk.bf16.vlgmr.msra.gmra.mrb[32].mxu0 %vm78_vm0, %v8973_v1  ;;  %v7548_v15 = vpop.permute.xlu0 %7547 }
 0xc83   :  { %7242 = vmatpush1.bf16.msra.mxu0 %v7224_v47  ;;  %7273 = vmatprep.mubr.bf16.mxu0 %v9789_v9  ;;  %v7556_v27 = vsel %vm2795_vm10, %v7548_v15, %v7550_v0  ;;  %v7555_v28 = vsel %vm2795_vm10, %v7546_v21, %v7548_v15 }
 0xc84   :  { %8990 = vmatprep.subr.msk.bf16.mxu0 %vm2070_vm3, %v7218_v51  ;;  %v7568_v30 = vsel %vm2070_vm3, %v7555_v28, 0 }
 0xc85   :  { %v7715_v37 = vpop.permute.xlu1 %7714 }
 0xc86   :  { %v7552_v32 = vpop.permute.xlu0 %7551 }
 0xc87   :  { %v7557_v34 = vsel %vm2795_vm10, %v7550_v0, %v7552_v32  ;;  %vm11936_vm10 = vmmov %vm11935_vm9 }
 0xc88   :  { %v7574_v36 = vsel %vm2070_vm3, %v7557_v34, 0 }
 0xc89   :  { %v7719_v42 = vpop.permute.xlu1 %7718 }
 0xc8a   :  { %8989 = vmatmul.mubr.msk.bf16.vlgmr.msra.gmra.mrb[24].mxu0 %vm78_vm0, %v8987_v54  ;;  %v7713_v35 = vpop.permute.xlu0 %7712 }
 0xc8b   :  { %7283 = vmatpush1.bf16.msra.mxu0 %v7230_v58  ;;  %7314 = vmatprep.mubr.bf16.mxu0 %v9789_v9  ;;  %v7723_v1 = vsel %vm2965_vm11, %v7713_v35, %v7715_v37  ;;  %v7722_v38 = vsel %vm2965_vm11, %v7711_v40, %v7713_v35 }
 0xc8c   :  { %8992 = vmatprep.subr.msk.bf16.mxu0 %vm2070_vm3, %v7214_v59  ;;  %v7731_v41 = vsel %vm2070_vm3, %v7722_v38, 0  ;;  %v9029_v38 = vld [vmem:[%s11905_s5 + $0x8c] sm:$0xf] }
 0xc8d   :  { %v7880_v50 = vpop.permute.xlu1 %7879 }
 0xc8e   :  { %v7717_v39 = vpop.permute.xlu0 %7716 }
 0xc8f   :  { %v7725_v43 = vsel %vm2965_vm11, %v7717_v39, %v7719_v42  ;;  %v7724_v44 = vsel %vm2965_vm11, %v7715_v37, %v7717_v39 }
 0xc90   :  { %v7737_v46 = vsel %vm2070_vm3, %v7724_v44, 0 }
 0xc91   :  { %v7884_v58 = vpop.permute.xlu1 %7883 }
 0xc92   :  { %8991 = vmatmul.mubr.msk.bf16.vlgmr.msra.gmra.mrb[28].mxu0 %vm78_vm0, %v8987_v54  ;;  %v7721_v47 = vpop.permute.xlu0 %7720 }
 0xc93   :  { %7324 = vmatpush1.bf16.msra.mxu0 %v7236_v24  ;;  %7355 = vmatprep.mubr.bf16.mxu0 %v9789_v9  ;;  %v7726_v51 = vsel %vm2965_vm11, %v7719_v42, %v7721_v47  ;;  %vm11937_vm11 = vmmov %vm11935_vm9 }
 0xc94   :  { %8995 = vmatprep.subr.msk.bf16.mxu0 %vm2070_vm3, %v7385_v4 }
 0xc95   :  { %v7888_v24 = vpop.permute.xlu1 %7887 }
 0xc96   :  { %v7882_v53 = vpop.permute.xlu0 %7881 }
 0xc97   :  { %v7892_v59 = vsel %vm11930_vm2, %v7882_v53, %v7884_v58  ;;  %v7891_v61 = vsel %vm11931_vm5, %v7880_v50, %v7882_v53  ;;  %vm11941_vm2 = vmmov %vm11940_vm14 }
 0xc98   :  { %v7900_v62 = vsel %vm2070_vm3, %v7891_v61, 0  ;;  %vm11942_vm5 = vmmov %vm11941_vm2 }
 0xc99   :  { %v8049_v10 = vpop.permute.xlu1 %8048 }
 0xc9a   :  { %8993 = vmatmul.mubr.msk.bf16.vlgmr.msra.gmra.mrb[32].mxu0 %vm78_vm0, %v8987_v54  ;;  %v7743_v54 = vsel %vm2070_vm3, %v7726_v51, 0  ;;  %v7886_v63 = vpop.permute.xlu0 %7885 }
 0xc9b   :  { %7411 = vmatpush1.bf16.msra.mxu0 %v7393_v8  ;;  %7442 = vmatprep.mubr.bf16.mxu0 %v9789_v9  ;;  %v7894_v2 = vsel %vm11932_vm6, %v7886_v63, %v7888_v24  ;;  %v7893_v4 = vsel %vm11933_vm7, %v7884_v58, %v7886_v63  ;;  %vm11943_vm6 = vmmov %vm11941_vm2 }
 0xc9c   :  { %8997 = vmatprep.subr.msk.bf16.mxu0 %vm2070_vm3, %v7387_v11  ;;  %v7906_v6 = vsel %vm2070_vm3, %v7893_v4, 0  ;;  %vm11944_vm7 = vmmov %vm11941_vm2 }
 0xc9e   :  { %v7890_v8 = vpop.permute.xlu0 %7889 }
 0xc9f   :  { %v7895_v11 = vsel %vm11934_vm8, %v7888_v24, %v7890_v8  ;;  %vm11946_vm8 = vcmp.eq.s32.totalorder %v10864_v60, 1 }
 0xca2   :  { %8996 = vmatmul.mubr.msk.bf16.vlgmr.msra.gmra.mrb[24].mxu0 %vm78_vm0, %v8994_v13  ;;  %v8051_v12 = vpop.permute.xlu0 %8050 }
 0xca3   :  { %7452 = vmatpush1.bf16.msra.mxu0 %v7399_v49  ;;  %7483 = vmatprep.mubr.bf16.mxu0 %v9789_v9  ;;  %v8053_v49 = vpop.permute.xlu1 %8052  ;;  %v8060_v56 = vsel %vm11936_vm10, %v8049_v10, %v8051_v12 }
 0xca4   :  { %8999 = vmatprep.subr.msk.bf16.mxu0 %vm2070_vm3, %v7383_v55  ;;  %v8061_v55 = vsel %vm11935_vm9, %v8051_v12, %v8053_v49  ;;  %v8069_v18 = vsel %vm2070_vm3, %v8060_v56, 0  ;;  %vm11947_vm9 = vcmp.eq.s32.totalorder %v10873_v14, 1 }
 0xca6   :  { %v8055_v17 = vpop.permute.xlu0 %8054 }
 0xcaa   :  { %8998 = vmatmul.mubr.msk.bf16.vlgmr.msra.gmra.mrb[28].mxu0 %vm78_vm0, %v8994_v13 }
 0xcab   :  { %7493 = vmatpush1.bf16.msra.mxu0 %v7405_v19  ;;  %7524 = vmatprep.mubr.bf16.mxu0 %v9789_v9  ;;  %v8057_v19 = vpop.permute.xlu1 %8056 }
 0xcac   :  { %9002 = vmatprep.subr.msk.bf16.mxu0 %vm2070_vm3, %v7554_v22  ;;  %v8063_v21 = vsel %vm11937_vm11, %v8055_v17, %v8057_v19  ;;  %v8062_v22 = vsel %vm11938_vm12, %v8053_v49, %v8055_v17 }
 0xcad   :  { %v8075_v15 = vsel %vm2070_vm3, %v8062_v22, 0 }
 0xcaf   :  { %v8218_v0 = vpop.permute.xlu1 %8217 }
 0xcb2   :  { %9000 = vmatmul.mubr.msk.bf16.vlgmr.msra.gmra.mrb[32].mxu0 %vm78_vm0, %v8994_v13  ;;  %v7912_v13 = vsel %vm2070_vm3, %v7895_v11, 0 }
 0xcb3   :  { %7580 = vmatpush1.bf16.msra.mxu0 %v7562_v26  ;;  %7611 = vmatprep.mubr.bf16.mxu0 %v9789_v9  ;;  %v8059_v26 = vpop.permute.xlu0 %8058 }
 0xcb4   :  { %9004 = vmatprep.subr.msk.bf16.mxu0 %vm2070_vm3, %v7556_v27  ;;  %v8064_v27 = vsel %vm11939_vm13, %v8057_v19, %v8059_v26 }
 0xcb7   :  { %v8220_v28 = vpop.permute.xlu0 %8219 }
 0xcb8   :  { %v8229_v40 = vsel %vm11941_vm2, %v8218_v0, %v8220_v28 }
 0xcb9   :  { %v8238_v35 = vsel %vm2070_vm3, %v8229_v40, 0 }
 0xcba   :  { %9003 = vmatmul.mubr.msk.bf16.vlgmr.msra.gmra.mrb[24].mxu0 %vm78_vm0, %v9001_v29 }
 0xcbb   :  { %7621 = vmatpush1.bf16.msra.mxu0 %v7568_v30  ;;  %7652 = vmatprep.mubr.bf16.mxu0 %v9789_v9  ;;  %v8222_v30 = vpop.permute.xlu1 %8221  ;;  %v8224_v34 = vpop.permute.xlu0 %8223 }
 0xcbc   :  { %9006 = vmatprep.subr.msk.bf16.mxu0 %vm2070_vm3, %v7552_v32  ;;  %v8230_v32 = vsel %vm11940_vm14, %v8220_v28, %v8222_v30 }
 0xcc2   :  { %9005 = vmatmul.mubr.msk.bf16.vlgmr.msra.gmra.mrb[28].mxu0 %vm78_vm0, %v9001_v29 }
 0xcc3   :  { %7662 = vmatpush1.bf16.msra.mxu0 %v7574_v36  ;;  %7693 = vmatprep.mubr.bf16.mxu0 %v9789_v9  ;;  %v8226_v36 = vpop.permute.xlu1 %8225 }
 0xcc4   :  { %9009 = vmatprep.subr.msk.bf16.mxu0 %vm2070_vm3, %v7723_v1  ;;  %v8232_v37 = vsel %vm11942_vm5, %v8224_v34, %v8226_v36  ;;  %v8231_v1 = vsel %vm11943_vm6, %v8222_v30, %v8224_v34 }
 0xcc5   :  { %v8244_v39 = vsel %vm2070_vm3, %v8231_v1, 0 }
 0xcc7   :  { %v8389_v44 = vpop.permute.xlu1 %8388 }
 0xcca   :  { %9007 = vmatmul.mubr.msk.bf16.vlgmr.msra.gmra.mrb[32].mxu0 %vm78_vm0, %v9001_v29  ;;  %v8081_v29 = vsel %vm2070_vm3, %v8064_v27, 0 }
 0xccb   :  { %7749 = vmatpush1.bf16.msra.mxu0 %v7731_v41  ;;  %7780 = vmatprep.mubr.bf16.mxu0 %v9789_v9  ;;  %v8228_v41 = vpop.permute.xlu0 %8227 }
 0xccc   :  { %9011 = vmatprep.subr.msk.bf16.mxu0 %vm2070_vm3, %v7725_v43  ;;  %v8233_v42 = vsel %vm11944_vm7, %v8226_v36, %v8228_v41 }
 0xccd   :  { %v8250_v43 = vsel %vm2070_vm3, %v8233_v42, 0 }
 0xccf   :  { %v8402_v50 = vpop.permute.xlu0 %8401 }
 0xcd2   :  { %9010 = vmatmul.mubr.msk.bf16.vlgmr.msra.gmra.mrb[24].mxu0 %vm78_vm0, %v9008_v45 }
 0xcd3   :  { %7790 = vmatpush1.bf16.msra.mxu0 %v7737_v46  ;;  %7821 = vmatprep.mubr.bf16.mxu0 %v9789_v9 }
 0xcd4   :  { %9013 = vmatprep.subr.msk.bf16.mxu0 %vm2070_vm3, %v7721_v47 }
 0xcda   :  { %9012 = vmatmul.mubr.msk.bf16.vlgmr.msra.gmra.mrb[28].mxu0 %vm78_vm0, %v9008_v45 }
 0xcdb   :  { %7831 = vmatpush1.bf16.msra.mxu0 %v7743_v54  ;;  %7862 = vmatprep.mubr.bf16.mxu0 %v9789_v9 }
 0xcdc   :  { %9016 = vmatprep.subr.msk.bf16.mxu0 %vm2070_vm3, %v7892_v59 }
 0xce2   :  { %9014 = vmatmul.mubr.msk.bf16.vlgmr.msra.gmra.mrb[32].mxu0 %vm78_vm0, %v9008_v45 }
 0xce3   :  { %7918 = vmatpush1.bf16.msra.mxu0 %v7900_v62  ;;  %7949 = vmatprep.mubr.bf16.mxu0 %v9789_v9 }
 0xce4   :  { %9018 = vmatprep.subr.msk.bf16.mxu0 %vm2070_vm3, %v7894_v2 }
 0xcea   :  { %9017 = vmatmul.mubr.msk.bf16.vlgmr.msra.gmra.mrb[24].mxu0 %vm78_vm0, %v9015_v5 }
 0xceb   :  { %7959 = vmatpush1.bf16.msra.mxu0 %v7906_v6  ;;  %7990 = vmatprep.mubr.bf16.mxu0 %v9789_v9 }
 0xcec   :  { %9020 = vmatprep.subr.msk.bf16.mxu0 %vm2070_vm3, %v7890_v8 }
 0xcf2   :  { %9019 = vmatmul.mubr.msk.bf16.vlgmr.msra.gmra.mrb[28].mxu0 %vm78_vm0, %v9015_v5 }
 0xcf3   :  { %8000 = vmatpush1.bf16.msra.mxu0 %v7912_v13  ;;  %8031 = vmatprep.mubr.bf16.mxu0 %v9789_v9 }
 0xcf4   :  { %9023 = vmatprep.subr.msk.bf16.mxu0 %vm2070_vm3, %v8061_v55 }
 0xcfa   :  { %9021 = vmatmul.mubr.msk.bf16.vlgmr.msra.gmra.mrb[32].mxu0 %vm78_vm0, %v9015_v5 }
 0xcfb   :  { %8087 = vmatpush1.bf16.msra.mxu0 %v8069_v18  ;;  %8118 = vmatprep.mubr.bf16.mxu0 %v9789_v9 }
 0xcfc   :  { %9025 = vmatprep.subr.msk.bf16.mxu0 %vm2070_vm3, %v8063_v21 }
 0xd02   :  { %9024 = vmatmul.mubr.msk.bf16.vlgmr.msra.gmra.mrb[24].mxu0 %vm78_vm0, %v9022_v23 }
 0xd03   :  { %8128 = vmatpush1.bf16.msra.mxu0 %v8075_v15  ;;  %8159 = vmatprep.mubr.bf16.mxu0 %v9789_v9 }
 0xd04   :  { %9027 = vmatprep.subr.msk.bf16.mxu0 %vm2070_vm3, %v8059_v26 }
 0xd0a   :  { %9026 = vmatmul.mubr.msk.bf16.vlgmr.msra.gmra.mrb[28].mxu0 %vm78_vm0, %v9022_v23 }
 0xd0b   :  { %8169 = vmatpush1.bf16.msra.mxu0 %v8081_v29  ;;  %8200 = vmatprep.mubr.bf16.mxu0 %v9789_v9 }
 0xd0c   :  { %9030 = vmatprep.subr.msk.bf16.mxu0 %vm2070_vm3, %v8230_v32 }
 0xd12   :  { %9028 = vmatmul.mubr.msk.bf16.vlgmr.msra.gmra.mrb[32].mxu0 %vm78_vm0, %v9022_v23 }
 0xd13   :  { %8256 = vmatpush1.bf16.msra.mxu0 %v8238_v35  ;;  %8287 = vmatprep.mubr.bf16.mxu0 %v9789_v9 }
 0xd14   :  { %9032 = vmatprep.subr.msk.bf16.mxu0 %vm2070_vm3, %v8232_v37 }
 0xd1a   :  { %9031 = vmatmul.mubr.msk.bf16.vlgmr.msra.gmra.mrb[24].mxu0 %vm78_vm0, %v9029_v38 }
 0xd1b   :  { %8297 = vmatpush1.bf16.msra.mxu0 %v8244_v39  ;;  %8328 = vmatprep.mubr.bf16.mxu0 %v9789_v9 }
 0xd1c   :  { %9034 = vmatprep.subr.msk.bf16.mxu0 %vm2070_vm3, %v8228_v41  ;;  %vm11945_vm3 = vcmp.eq.s32.totalorder %v10862_v57, 1 }
 0xd22   :  { %9033 = vmatmul.mubr.msk.bf16.vlgmr.msra.gmra.mrb[28].mxu0 %vm78_vm0, %v9029_v38 }
 0xd23   :  { %8338 = vmatpush1.bf16.msra.mxu0 %v8250_v43  ;;  %8369 = vmatprep.mubr.bf16.mxu0 %v9789_v9 }
 0xd2a   :  { %9035 = vmatmul.mubr.msk.bf16.vlgmr.msra.gmra.mrb[32].mxu0 %vm78_vm0, %v9029_v38 }
 0xded   :  { %v8289_v45 = vpop.f32.mrb[24].mxu0 }
 0xdee   :  { %v8391_v46 = vmul.f32 %v8389_v44, %v8289_v45  ;;  %v8291_v47 = vpop.f32.mrb[25].mxu0 }
 0xdef   :  { %v8392_v51 = vmul.f32 %v8389_v44, %v8291_v47  ;;  %v8293_v53 = vpop.f32.mrb[26].mxu0 }
 0xdf0   :  { %v8404_v54 = vadd.f32 %v8402_v50, %v8391_v46  ;;  %v8294_v58 = vpop.f32.mrb[27].mxu0 }
 0xdf1   :  { %v8405_v59 = vadd.f32 %v8402_v50, %v8392_v51 }
 0xdf2   :  { %v8410_v61 = vmax.f32 %v8404_v54, 0.0 }
 0xdf3   :  { %v8411_v63 = vmax.f32 %v8405_v59, 0.0 }
 0xdf4   :  { %v8416_v62 = vsel %vm11945_vm3, %v8410_v61, 0.0 }
 0xdf5   :  { %v8422_v24 = vadd.f32 %v8416_v62, %v11203_v48  ;;  %v8417_v9 = vsel %vm11946_vm8, %v8411_v63, 0.0  ;;  %v8330_v2 = vpop.f32.mrb[28].mxu0 }
 0xdf6   :  { %v8423_v4 = vadd.f32 %v8417_v9, %v11208_v52  ;;  %v8393_v5 = vmul.f32 %v8389_v44, %v8330_v2  ;;  %v8332_v6 = vpop.f32.mrb[29].mxu0 }
 0xdf7   :  { %8428 = vst [vmem:[%s11908_s9] sm:$0xff] %v8422_v24  ;;  %v8394_v8 = vmul.f32 %v8389_v44, %v8332_v6  ;;  %v8334_v10 = vpop.f32.mrb[30].mxu0 }
 0xdf8   :  { %8429 = vst [vmem:[%s11908_s9 + $0x8] sm:$0xff] %v8423_v4  ;;  %v8406_v57 = vadd.f32 %v8402_v50, %v8393_v5  ;;  %v8335_v48 = vpop.f32.mrb[31].mxu0 }
 0xdf9   :  { %v8407_v11 = vadd.f32 %v8402_v50, %v8394_v8 }
 0xdfa   :  { %v8412_v60 = vmax.f32 %v8406_v57, 0.0 }
 0xdfb   :  { %v8413_v12 = vmax.f32 %v8407_v11, 0.0 }
 0xdfc   :  { %v8418_v52 = vsel %vm11947_vm9, %v8412_v60, 0.0 }
 0xdfd   :  { %v8424_v13 = vadd.f32 %v8418_v52, %v11217_v25  ;;  %v8419_v49 = vsel %vm63_vm1, %v8413_v12, 0.0  ;;  %v8371_v55 = vpop.f32.mrb[32].mxu0 }
 0xdfe   :  { %v8425_v56 = vadd.f32 %v8419_v49, %v11222_v7  ;;  %v8395_v17 = vmul.f32 %v8389_v44, %v8371_v55  ;;  %v8373_v18 = vpop.f32.mrb[33].mxu0 }
 0xdff   :  { %8430 = vst [vmem:[%s11908_s9 + $0x10] sm:$0xff] %v8424_v13  ;;  %v8396_v19 = vmul.f32 %v8389_v44, %v8373_v18  ;;  %v8375_v21 = vpop.f32.mrb[34].mxu0 }
 0xe00   :  { %8431 = vst [vmem:[%s11908_s9 + $0x18] sm:$0xff] %v8425_v56  ;;  %v8408_v14 = vadd.f32 %v8402_v50, %v8395_v17  ;;  %v8376_v25 = vpop.f32.mrb[35].mxu0 }
 0xe01   :  { %v8409_v22 = vadd.f32 %v8402_v50, %v8396_v19 }
 0xe02   :  { %v8414_v16 = vmax.f32 %v8408_v14, 0.0 }
 0xe03   :  { %v8415_v23 = vmax.f32 %v8409_v22, 0.0 }
 0xe04   :  { %v8420_v7 = vsel %vm64_vm15, %v8414_v16, 0.0 }
 0xe05   :  { %v8426_v15 = vadd.f32 %v8420_v7, %v11231_v3  ;;  %v8421_v26 = vsel %vm65_vm4, %v8415_v23, 0.0 }
 0xe06   :  { %v8427_v0 = vadd.f32 %v8421_v26, %v11236_v20 }
 0xe07   :  { %8432 = vst [vmem:[%s11908_s9 + $0x20] sm:$0xff] %v8426_v15 }
 0xe08   :  { %8433 = vst.msk [vmem:[%s11908_s9 + $0x28] sm:$0xff] %vm78_vm0, %v8427_v0 }

</bundles_post_ra>
